<compile_context>
chip_gen: v7x
topology: tpu7x:2x2x1
jax: 0.10.0
libtpu: 0.0.40
codegen_flags: <defaults>
</compile_context>

<pallas_src>
import numpy as np
import jax
import jax.numpy as jnp
from jax import lax
from jax.experimental import pallas as pl
from jax.experimental.pallas import tpu as pltpu


# --------------------------------------------------------------------------
# Fused kernel: full multi-layer GraphSAGE forward for one board (grid over B).
#   sel_ref : (K*Np, Np)   one-hot neighbor-vertex gather matrix (constant)
#   ne_ref  : (1, K*Np, Fe) gathered neighbor-edge features (constant per board)
#   vf_ref  : (1, Np, Fp)  padded input vertex features
#   eWv_ref : (L, Fp, Ep)  embedding weight, vertex part (zero padded)
#   eWe_ref : (L, Fe, Ep)  embedding weight, edge part
#   eb_ref  : (L, 1, Ep)   embedding bias
#   hWv_ref : (L, Fp, Fp)  hidden weight, self-feature part
#   hWe_ref : (L, Ep, Fp)  hidden weight, pooled-embedding part
#   hb_ref  : (L, 1, Fp)   hidden bias
#   out_ref : (1, Np, Fp)  padded output (slice [:N, :out_size] in wrapper)
# --------------------------------------------------------------------------
def _fused_graphsage_kernel(sel_ref, ne_ref, vf_ref,
                            eWv_ref, eWe_ref, eb_ref,
                            hWv_ref, hWe_ref, hb_ref,
                            out_ref):
    KNp, Np = sel_ref.shape
    K = KNp // Np
    L = eWv_ref.shape[0]

    sel = sel_ref[...]          # (K*Np, Np)
    ne = ne_ref[0]              # (K*Np, Fe) -- constant across layers
    vf = vf_ref[0]              # (Np, Fp)   -- evolving vertex features (VMEM-resident)

    for i in range(L):          # statically unrolled layer loop
        # Neighbor-vertex gather as a single MXU matmul.
        nv = jnp.dot(sel, vf, preferred_element_type=jnp.float32)            # (K*Np, Fp)

        # Pooling aggregator: one stacked matmul over all K neighbor slots,
        # split weights instead of concat([nv, ne]).
        pre = (jnp.dot(nv, eWv_ref[i], preferred_element_type=jnp.float32) +
               jnp.dot(ne, eWe_ref[i], preferred_element_type=jnp.float32))  # (K*Np, Ep)

        # Max over K slots, then bias + tanh ONCE (tanh is monotone -> exact).
        m = pre[0:Np]
        for k in range(1, K):
            m = jnp.maximum(m, pre[k * Np:(k + 1) * Np])
        emb = jnp.tanh(m + eb_ref[i])                                        # (Np, Ep)

        # Hidden linear on concat([vf, emb]) done as split matmuls.
        h = (jnp.dot(vf, hWv_ref[i], preferred_element_type=jnp.float32) +
             jnp.dot(emb, hWe_ref[i], preferred_element_type=jnp.float32) +
             hb_ref[i])                                                      # (Np, Fp)

        if i < L - 1:
            h = jnp.tanh(h)
            h = h * lax.rsqrt(jnp.sum(h * h, axis=-1, keepdims=True) + 1e-12)
            vf = h
        else:
            out_ref[0] = h.astype(out_ref.dtype)


def _const_spec(shape):
    return pl.BlockSpec(shape, lambda b: (0,) * len(shape))


def _batch_spec(shape):
    return pl.BlockSpec(shape, lambda b: (b,) + (0,) * (len(shape) - 1))


# --------------------------------------------------------------------------
# Wrapper: one-time packing of weights / gather structure, then one pallas_call.
# --------------------------------------------------------------------------
def graphsage_forward(vertices, edges, structure, params):
    """vertices: (B,N,Fv), edges: (B,E,Fe), structure: (N,K,2) int32."""
    B, N, Fv0 = vertices.shape
    Fe = edges.shape[2]
    K = structure.shape[1]
    L = len(params)

    # ---- static padded sizes ------------------------------------------------
    v_ins = [int(p[0].shape[0]) - Fe for p in params]     # vertex-feature width per layer
    e_outs = [int(p[0].shape[1]) for p in params]
    h_outs = [int(p[2].shape[1]) for p in params]
    Fp = max(max(v_ins), max(h_outs))                     # padded vertex-feature width (32)
    Ep = max(e_outs)                                      # padded embedding width (32)
    Fep = -(-Fe // 8) * 8                                 # edge feats padded to sublane multiple
    Np = -(-N // 8) * 8                                   # rows padded to multiple of 8

    # ---- pack & zero-pad weights (exact) -------------------------------------
    eWv = np.zeros((L, Fp, Ep), np.float32)
    eWe = np.zeros((L, Fep, Ep), np.float32)
    eb = np.zeros((L, 1, Ep), np.float32)
    hWv = np.zeros((L, Fp, Fp), np.float32)
    hWe = np.zeros((L, Ep, Fp), np.float32)
    hb = np.zeros((L, 1, Fp), np.float32)
    for i, (eW_i, eb_i, hW_i, hb_i) in enumerate(params):
        vi, eo, ho = v_ins[i], e_outs[i], h_outs[i]
        eW_i = np.asarray(eW_i); eb_i = np.asarray(eb_i)
        hW_i = np.asarray(hW_i); hb_i = np.asarray(hb_i)
        eWv[i, :vi, :eo] = eW_i[:vi]
        eWe[i, :Fe, :eo] = eW_i[vi:]
        eb[i, 0, :eo] = eb_i.reshape(-1)
        hWv[i, :vi, :ho] = hW_i[:vi]
        hWe[i, :eo, :ho] = hW_i[vi:]
        hb[i, 0, :ho] = hb_i.reshape(-1)

    # ---- one-hot neighbor-vertex gather matrix (constant, built once) --------
    sv = np.asarray(structure[:, :, 0])                   # (N, K)
    se = np.asarray(structure[:, :, 1])                   # (N, K)
    sel = np.zeros((K * Np, Np), np.float32)
    for k in range(K):
        sel[k * Np + np.arange(N), sv[:, k]] = 1.0

    # ---- neighbor-edge gather: constant across layers, done exactly once -----
    edges_np = np.asarray(edges)                          # (B, E, Fe)
    ne = np.zeros((B, K * Np, Fep), np.float32)
    for k in range(K):
        ne[:, k * Np:k * Np + N, :Fe] = edges_np[:, se[:, k], :]

    # ---- padded input vertex features ----------------------------------------
    vf0 = np.zeros((B, Np, Fp), np.float32)
    vf0[:, :N, :Fv0] = np.asarray(vertices)

    out = pl.pallas_call(
        _fused_graphsage_kernel,
        out_shape=jax.ShapeDtypeStruct((B, Np, Fp), jnp.float32),
        grid=(B,),
        in_specs=[
            _const_spec((K * Np, Np)),        # sel
            _batch_spec((1, K * Np, Fep)),    # ne
            _batch_spec((1, Np, Fp)),         # vf
            _const_spec((L, Fp, Ep)),         # eWv
            _const_spec((L, Fep, Ep)),        # eWe
            _const_spec((L, 1, Ep)),          # eb
            _const_spec((L, Fp, Fp)),         # hWv
            _const_spec((L, Ep, Fp)),         # hWe
            _const_spec((L, 1, Fp)),          # hb
        ],
        out_specs=_batch_spec((1, Np, Fp)),
        compiler_params=pltpu.CompilerParams(
            dimension_semantics=("parallel",)),
    )(jnp.asarray(sel), jnp.asarray(ne), jnp.asarray(vf0),
      jnp.asarray(eWv), jnp.asarray(eWe), jnp.asarray(eb),
      jnp.asarray(hWv), jnp.asarray(hWe), jnp.asarray(hb))

    out_size = h_outs[-1]
    return out[:, :N, :out_size]


# --------------------------------------------------------------------------
# Pure-JAX reference mirroring the PyTorch forward exactly.
# --------------------------------------------------------------------------
def graphsage_reference(vertices, edges, structure, params):
    vf = vertices
    sv = structure[:, :, 0]
    se = structure[:, :, 1]
    n_layers = len(params)
    for i, (eW, eb, hW, hb) in enumerate(params):
        nfv = vf[:, sv]
        nfe = edges[:, se]
        nf = jnp.concatenate([nfv, nfe], axis=3)
        ne = jnp.tanh(nf @ eW + eb)
        ne_max = ne.max(axis=2)
        vi = jnp.concatenate([vf, ne_max], axis=2)
        vf = vi @ hW + hb
        if i < n_layers - 1:
            vf = jnp.tanh(vf)
            vf = vf / jnp.linalg.norm(vf, axis=2, keepdims=True)
    return vf


def init_linear(key, fan_in, fan_out):
    """Deterministic PyTorch-style Linear init; weight stored as (in, out)."""
    k1, k2 = jax.random.split(key)
    bound = 1.0 / np.sqrt(fan_in)
    W = jax.random.uniform(k1, (fan_in, fan_out), jnp.float32, -bound, bound)
    b = jax.random.uniform(k2, (1, fan_out), jnp.float32, -bound, bound)
    return W, b


if __name__ == "__main__":
    # Small Catan-like instance.
    B = 2                 # batch of boards
    N = 54                # vertices
    E = 72                # edges
    K = 3                 # neighbors per vertex (structure second dim)
    vertex_feat_size = 8
    edge_feat_size = 4
    out_size = 16
    hidden_sizes = [32, 32, 32, 32]
    embedding_sizes = [32, 32, 32, 32, 32]

    # Module dimension bookkeeping (as in GraphSAGENet.__init__).
    embedding_in_dims = ([vertex_feat_size + edge_feat_size] +
                         [e + edge_feat_size for e in embedding_sizes[:-1]])
    embedding_out_dims = embedding_sizes
    hidden_in_dims = [h + e for h, e in
                      zip([vertex_feat_size] + hidden_sizes, embedding_out_dims)]
    hidden_out_dims = hidden_sizes + [out_size]

    key = jax.random.PRNGKey(0)
    kv, ke, ks1, ks2, kp = jax.random.split(key, 5)

    vertices = jax.random.normal(kv, (B, N, vertex_feat_size), jnp.float32)
    edges = jax.random.normal(ke, (B, E, edge_feat_size), jnp.float32)
    structure = jnp.stack(
        [jax.random.randint(ks1, (N, K), 0, N, jnp.int32),
         jax.random.randint(ks2, (N, K), 0, E, jnp.int32)], axis=-1)  # (N,K,2)

    params = []
    pkeys = jax.random.split(kp, len(embedding_in_dims) * 2)
    for i in range(len(embedding_in_dims)):
        eW, eb = init_linear(pkeys[2 * i], embedding_in_dims[i],
                             embedding_out_dims[i])
        hW, hb = init_linear(pkeys[2 * i + 1], hidden_in_dims[i],
                             hidden_out_dims[i])
        params.append((eW, eb, hW, hb))

    out = graphsage_forward(vertices, edges, structure, params)
    out = jax.block_until_ready(out)
    assert out.shape == (B, N, out_size), out.shape

    ref = jax.block_until_ready(
        graphsage_reference(vertices, edges, structure, params))
    np.testing.assert_allclose(np.asarray(out), np.asarray(ref),
                               rtol=1e-2, atol=1e-2)

    print("KERNEL_OK")
</pallas_src>

<mosaic_0001>
module attributes {stable_mosaic.version = 11 : i64} {
  func.func @_fused_graphsage_kernel(%arg0: i32, %arg1: memref<168x56xf32, #tpu.memory_space<vmem>>, %arg2: memref<1x168x8xf32, #tpu.memory_space<vmem>>, %arg3: memref<1x56x32xf32, #tpu.memory_space<vmem>>, %arg4: memref<5x32x32xf32, #tpu.memory_space<vmem>>, %arg5: memref<5x8x32xf32, #tpu.memory_space<vmem>>, %arg6: memref<5x1x32xf32, #tpu.memory_space<vmem>>, %arg7: memref<5x32x32xf32, #tpu.memory_space<vmem>>, %arg8: memref<5x32x32xf32, #tpu.memory_space<vmem>>, %arg9: memref<5x1x32xf32, #tpu.memory_space<vmem>>, %arg10: memref<1x56x32xf32, #tpu.memory_space<vmem>>) attributes {dimension_semantics = [#tpu.dimension_semantics<parallel>], iteration_bounds = array<i64: 2>, scalar_prefetch = 0 : i64, scratch_operands = 0 : i64, tpu.core_type = #tpu.core_type<tc>, window_params = [{pipeline_mode = #tpu.pipeline_mode<synchronous>, transform_indices = @transform_0, window_bounds = array<i64: 168, 56>}, {transform_indices = @transform_1, window_bounds = array<i64: 1, 168, 8>}, {transform_indices = @transform_2, window_bounds = array<i64: 1, 56, 32>}, {pipeline_mode = #tpu.pipeline_mode<synchronous>, transform_indices = @transform_3, window_bounds = array<i64: 5, 32, 32>}, {pipeline_mode = #tpu.pipeline_mode<synchronous>, transform_indices = @transform_4, window_bounds = array<i64: 5, 8, 32>}, {pipeline_mode = #tpu.pipeline_mode<synchronous>, transform_indices = @transform_5, window_bounds = array<i64: 5, 1, 32>}, {pipeline_mode = #tpu.pipeline_mode<synchronous>, transform_indices = @transform_6, window_bounds = array<i64: 5, 32, 32>}, {pipeline_mode = #tpu.pipeline_mode<synchronous>, transform_indices = @transform_7, window_bounds = array<i64: 5, 32, 32>}, {pipeline_mode = #tpu.pipeline_mode<synchronous>, transform_indices = @transform_8, window_bounds = array<i64: 5, 1, 32>}, {transform_indices = @transform_9, window_bounds = array<i64: 1, 56, 32>}]} {
    %c0 = arith.constant 0 : index
    %c0_0 = arith.constant 0 : index
    %0 = vector.load %arg1[%c0, %c0_0] : memref<168x56xf32, #tpu.memory_space<vmem>>, vector<168x56xf32>
    %c0_1 = arith.constant 0 : index
    %c0_2 = arith.constant 0 : index
    %c0_3 = arith.constant 0 : index
    %1 = vector.load %arg2[%c0_1, %c0_2, %c0_3] : memref<1x168x8xf32, #tpu.memory_space<vmem>>, vector<1x168x8xf32>
    %2 = vector.shape_cast %1 : vector<1x168x8xf32> to vector<168x8xf32>
    %c0_4 = arith.constant 0 : index
    %c0_5 = arith.constant 0 : index
    %c0_6 = arith.constant 0 : index
    %3 = vector.load %arg3[%c0_4, %c0_5, %c0_6] : memref<1x56x32xf32, #tpu.memory_space<vmem>>, vector<1x56x32xf32>
    %4 = vector.shape_cast %3 : vector<1x56x32xf32> to vector<56x32xf32>
    %cst = arith.constant dense<0.000000e+00> : vector<168x32xf32>
    %5 = tpu.matmul %0, %4, %cst {dimension_numbers = #tpu.dot_dimension_numbers<[1], [0], [0], [1], [0, 0, 1, 1], [], []>} : vector<168x56xf32>, vector<56x32xf32>, vector<168x32xf32> -> vector<168x32xf32>
    %c0_7 = arith.constant 0 : index
    %c0_8 = arith.constant 0 : index
    %c0_9 = arith.constant 0 : index
    %6 = vector.load %arg4[%c0_7, %c0_8, %c0_9] : memref<5x32x32xf32, #tpu.memory_space<vmem>>, vector<1x32x32xf32>
    %7 = vector.shape_cast %6 : vector<1x32x32xf32> to vector<32x32xf32>
    %cst_10 = arith.constant dense<0.000000e+00> : vector<168x32xf32>
    %8 = tpu.matmul %5, %7, %cst_10 {dimension_numbers = #tpu.dot_dimension_numbers<[1], [0], [0], [1], [0, 0, 1, 1], [], []>} : vector<168x32xf32>, vector<32x32xf32>, vector<168x32xf32> -> vector<168x32xf32>
    %c0_11 = arith.constant 0 : index
    %c0_12 = arith.constant 0 : index
    %c0_13 = arith.constant 0 : index
    %9 = vector.load %arg5[%c0_11, %c0_12, %c0_13] : memref<5x8x32xf32, #tpu.memory_space<vmem>>, vector<1x8x32xf32>
    %10 = vector.shape_cast %9 : vector<1x8x32xf32> to vector<8x32xf32>
    %cst_14 = arith.constant dense<0.000000e+00> : vector<168x32xf32>
    %11 = tpu.matmul %2, %10, %cst_14 {dimension_numbers = #tpu.dot_dimension_numbers<[1], [0], [0], [1], [0, 0, 1, 1], [], []>} : vector<168x8xf32>, vector<8x32xf32>, vector<168x32xf32> -> vector<168x32xf32>
    %12 = arith.addf %8, %11 : vector<168x32xf32>
    %13 = vector.extract_strided_slice %12 {offsets = [0, 0], sizes = [56, 32], strides = [1, 1]} : vector<168x32xf32> to vector<56x32xf32>
    %14 = vector.extract_strided_slice %12 {offsets = [56, 0], sizes = [56, 32], strides = [1, 1]} : vector<168x32xf32> to vector<56x32xf32>
    %15 = arith.maximumf %13, %14 : vector<56x32xf32>
    %16 = vector.extract_strided_slice %12 {offsets = [112, 0], sizes = [56, 32], strides = [1, 1]} : vector<168x32xf32> to vector<56x32xf32>
    %17 = arith.maximumf %15, %16 : vector<56x32xf32>
    %c0_15 = arith.constant 0 : index
    %c0_16 = arith.constant 0 : index
    %c0_17 = arith.constant 0 : index
    %18 = vector.load %arg6[%c0_15, %c0_16, %c0_17] : memref<5x1x32xf32, #tpu.memory_space<vmem>>, vector<1x1x32xf32>
    %19 = vector.shape_cast %18 : vector<1x1x32xf32> to vector<1x32xf32>
    %20 = vector.broadcast %19 : vector<1x32xf32> to vector<56x32xf32>
    %21 = arith.addf %17, %20 : vector<56x32xf32>
    %22 = math.tanh %21 : vector<56x32xf32>
    %c0_18 = arith.constant 0 : index
    %c0_19 = arith.constant 0 : index
    %c0_20 = arith.constant 0 : index
    %23 = vector.load %arg7[%c0_18, %c0_19, %c0_20] : memref<5x32x32xf32, #tpu.memory_space<vmem>>, vector<1x32x32xf32>
    %24 = vector.shape_cast %23 : vector<1x32x32xf32> to vector<32x32xf32>
    %cst_21 = arith.constant dense<0.000000e+00> : vector<56x32xf32>
    %25 = tpu.matmul %4, %24, %cst_21 {dimension_numbers = #tpu.dot_dimension_numbers<[1], [0], [0], [1], [0, 0, 1, 1], [], []>} : vector<56x32xf32>, vector<32x32xf32>, vector<56x32xf32> -> vector<56x32xf32>
    %c0_22 = arith.constant 0 : index
    %c0_23 = arith.constant 0 : index
    %c0_24 = arith.constant 0 : index
    %26 = vector.load %arg8[%c0_22, %c0_23, %c0_24] : memref<5x32x32xf32, #tpu.memory_space<vmem>>, vector<1x32x32xf32>
    %27 = vector.shape_cast %26 : vector<1x32x32xf32> to vector<32x32xf32>
    %cst_25 = arith.constant dense<0.000000e+00> : vector<56x32xf32>
    %28 = tpu.matmul %22, %27, %cst_25 {dimension_numbers = #tpu.dot_dimension_numbers<[1], [0], [0], [1], [0, 0, 1, 1], [], []>} : vector<56x32xf32>, vector<32x32xf32>, vector<56x32xf32> -> vector<56x32xf32>
    %29 = arith.addf %25, %28 : vector<56x32xf32>
    %c0_26 = arith.constant 0 : index
    %c0_27 = arith.constant 0 : index
    %c0_28 = arith.constant 0 : index
    %30 = vector.load %arg9[%c0_26, %c0_27, %c0_28] : memref<5x1x32xf32, #tpu.memory_space<vmem>>, vector<1x1x32xf32>
    %31 = vector.shape_cast %30 : vector<1x1x32xf32> to vector<1x32xf32>
    %32 = vector.broadcast %31 : vector<1x32xf32> to vector<56x32xf32>
    %33 = arith.addf %29, %32 : vector<56x32xf32>
    %34 = math.tanh %33 : vector<56x32xf32>
    %35 = arith.mulf %34, %34 : vector<56x32xf32>
    %cst_29 = arith.constant dense<0.000000e+00> : vector<56xf32>
    %36 = vector.multi_reduction <add>, %35, %cst_29 [1] : vector<56x32xf32> to vector<56xf32>
    %37 = vector.shape_cast %36 : vector<56xf32> to vector<56x1xf32>
    %cst_30 = arith.constant 9.99999996E-13 : f32
    %38 = vector.broadcast %cst_30 : f32 to vector<56x1xf32>
    %39 = arith.addf %37, %38 : vector<56x1xf32>
    %40 = math.rsqrt %39 : vector<56x1xf32>
    %41 = vector.broadcast %40 : vector<56x1xf32> to vector<56x32xf32>
    %42 = arith.mulf %34, %41 : vector<56x32xf32>
    %cst_31 = arith.constant dense<0.000000e+00> : vector<168x32xf32>
    %43 = tpu.matmul %0, %42, %cst_31 {dimension_numbers = #tpu.dot_dimension_numbers<[1], [0], [0], [1], [0, 0, 1, 1], [], []>} : vector<168x56xf32>, vector<56x32xf32>, vector<168x32xf32> -> vector<168x32xf32>
    %c1 = arith.constant 1 : index
    %c0_32 = arith.constant 0 : index
    %c0_33 = arith.constant 0 : index
    %44 = vector.load %arg4[%c1, %c0_32, %c0_33] : memref<5x32x32xf32, #tpu.memory_space<vmem>>, vector<1x32x32xf32>
    %45 = vector.shape_cast %44 : vector<1x32x32xf32> to vector<32x32xf32>
    %cst_34 = arith.constant dense<0.000000e+00> : vector<168x32xf32>
    %46 = tpu.matmul %43, %45, %cst_34 {dimension_numbers = #tpu.dot_dimension_numbers<[1], [0], [0], [1], [0, 0, 1, 1], [], []>} : vector<168x32xf32>, vector<32x32xf32>, vector<168x32xf32> -> vector<168x32xf32>
    %c1_35 = arith.constant 1 : index
    %c0_36 = arith.constant 0 : index
    %c0_37 = arith.constant 0 : index
    %47 = vector.load %arg5[%c1_35, %c0_36, %c0_37] : memref<5x8x32xf32, #tpu.memory_space<vmem>>, vector<1x8x32xf32>
    %48 = vector.shape_cast %47 : vector<1x8x32xf32> to vector<8x32xf32>
    %cst_38 = arith.constant dense<0.000000e+00> : vector<168x32xf32>
    %49 = tpu.matmul %2, %48, %cst_38 {dimension_numbers = #tpu.dot_dimension_numbers<[1], [0], [0], [1], [0, 0, 1, 1], [], []>} : vector<168x8xf32>, vector<8x32xf32>, vector<168x32xf32> -> vector<168x32xf32>
    %50 = arith.addf %46, %49 : vector<168x32xf32>
    %51 = vector.extract_strided_slice %50 {offsets = [0, 0], sizes = [56, 32], strides = [1, 1]} : vector<168x32xf32> to vector<56x32xf32>
    %52 = vector.extract_strided_slice %50 {offsets = [56, 0], sizes = [56, 32], strides = [1, 1]} : vector<168x32xf32> to vector<56x32xf32>
    %53 = arith.maximumf %51, %52 : vector<56x32xf32>
    %54 = vector.extract_strided_slice %50 {offsets = [112, 0], sizes = [56, 32], strides = [1, 1]} : vector<168x32xf32> to vector<56x32xf32>
    %55 = arith.maximumf %53, %54 : vector<56x32xf32>
    %c1_39 = arith.constant 1 : index
    %c0_40 = arith.constant 0 : index
    %c0_41 = arith.constant 0 : index
    %56 = vector.load %arg6[%c1_39, %c0_40, %c0_41] : memref<5x1x32xf32, #tpu.memory_space<vmem>>, vector<1x1x32xf32>
    %57 = vector.shape_cast %56 : vector<1x1x32xf32> to vector<1x32xf32>
    %58 = vector.broadcast %57 : vector<1x32xf32> to vector<56x32xf32>
    %59 = arith.addf %55, %58 : vector<56x32xf32>
    %60 = math.tanh %59 : vector<56x32xf32>
    %c1_42 = arith.constant 1 : index
    %c0_43 = arith.constant 0 : index
    %c0_44 = arith.constant 0 : index
    %61 = vector.load %arg7[%c1_42, %c0_43, %c0_44] : memref<5x32x32xf32, #tpu.memory_space<vmem>>, vector<1x32x32xf32>
    %62 = vector.shape_cast %61 : vector<1x32x32xf32> to vector<32x32xf32>
    %cst_45 = arith.constant dense<0.000000e+00> : vector<56x32xf32>
    %63 = tpu.matmul %42, %62, %cst_45 {dimension_numbers = #tpu.dot_dimension_numbers<[1], [0], [0], [1], [0, 0, 1, 1], [], []>} : vector<56x32xf32>, vector<32x32xf32>, vector<56x32xf32> -> vector<56x32xf32>
    %c1_46 = arith.constant 1 : index
    %c0_47 = arith.constant 0 : index
    %c0_48 = arith.constant 0 : index
    %64 = vector.load %arg8[%c1_46, %c0_47, %c0_48] : memref<5x32x32xf32, #tpu.memory_space<vmem>>, vector<1x32x32xf32>
    %65 = vector.shape_cast %64 : vector<1x32x32xf32> to vector<32x32xf32>
    %cst_49 = arith.constant dense<0.000000e+00> : vector<56x32xf32>
    %66 = tpu.matmul %60, %65, %cst_49 {dimension_numbers = #tpu.dot_dimension_numbers<[1], [0], [0], [1], [0, 0, 1, 1], [], []>} : vector<56x32xf32>, vector<32x32xf32>, vector<56x32xf32> -> vector<56x32xf32>
    %67 = arith.addf %63, %66 : vector<56x32xf32>
    %c1_50 = arith.constant 1 : index
    %c0_51 = arith.constant 0 : index
    %c0_52 = arith.constant 0 : index
    %68 = vector.load %arg9[%c1_50, %c0_51, %c0_52] : memref<5x1x32xf32, #tpu.memory_space<vmem>>, vector<1x1x32xf32>
    %69 = vector.shape_cast %68 : vector<1x1x32xf32> to vector<1x32xf32>
    %70 = vector.broadcast %69 : vector<1x32xf32> to vector<56x32xf32>
    %71 = arith.addf %67, %70 : vector<56x32xf32>
    %72 = math.tanh %71 : vector<56x32xf32>
    %73 = arith.mulf %72, %72 : vector<56x32xf32>
    %cst_53 = arith.constant dense<0.000000e+00> : vector<56xf32>
    %74 = vector.multi_reduction <add>, %73, %cst_53 [1] : vector<56x32xf32> to vector<56xf32>
    %75 = vector.shape_cast %74 : vector<56xf32> to vector<56x1xf32>
    %cst_54 = arith.constant 9.99999996E-13 : f32
    %76 = vector.broadcast %cst_54 : f32 to vector<56x1xf32>
    %77 = arith.addf %75, %76 : vector<56x1xf32>
    %78 = math.rsqrt %77 : vector<56x1xf32>
    %79 = vector.broadcast %78 : vector<56x1xf32> to vector<56x32xf32>
    %80 = arith.mulf %72, %79 : vector<56x32xf32>
    %cst_55 = arith.constant dense<0.000000e+00> : vector<168x32xf32>
    %81 = tpu.matmul %0, %80, %cst_55 {dimension_numbers = #tpu.dot_dimension_numbers<[1], [0], [0], [1], [0, 0, 1, 1], [], []>} : vector<168x56xf32>, vector<56x32xf32>, vector<168x32xf32> -> vector<168x32xf32>
    %c2 = arith.constant 2 : index
    %c0_56 = arith.constant 0 : index
    %c0_57 = arith.constant 0 : index
    %82 = vector.load %arg4[%c2, %c0_56, %c0_57] : memref<5x32x32xf32, #tpu.memory_space<vmem>>, vector<1x32x32xf32>
    %83 = vector.shape_cast %82 : vector<1x32x32xf32> to vector<32x32xf32>
    %cst_58 = arith.constant dense<0.000000e+00> : vector<168x32xf32>
    %84 = tpu.matmul %81, %83, %cst_58 {dimension_numbers = #tpu.dot_dimension_numbers<[1], [0], [0], [1], [0, 0, 1, 1], [], []>} : vector<168x32xf32>, vector<32x32xf32>, vector<168x32xf32> -> vector<168x32xf32>
    %c2_59 = arith.constant 2 : index
    %c0_60 = arith.constant 0 : index
    %c0_61 = arith.constant 0 : index
    %85 = vector.load %arg5[%c2_59, %c0_60, %c0_61] : memref<5x8x32xf32, #tpu.memory_space<vmem>>, vector<1x8x32xf32>
    %86 = vector.shape_cast %85 : vector<1x8x32xf32> to vector<8x32xf32>
    %cst_62 = arith.constant dense<0.000000e+00> : vector<168x32xf32>
    %87 = tpu.matmul %2, %86, %cst_62 {dimension_numbers = #tpu.dot_dimension_numbers<[1], [0], [0], [1], [0, 0, 1, 1], [], []>} : vector<168x8xf32>, vector<8x32xf32>, vector<168x32xf32> -> vector<168x32xf32>
    %88 = arith.addf %84, %87 : vector<168x32xf32>
    %89 = vector.extract_strided_slice %88 {offsets = [0, 0], sizes = [56, 32], strides = [1, 1]} : vector<168x32xf32> to vector<56x32xf32>
    %90 = vector.extract_strided_slice %88 {offsets = [56, 0], sizes = [56, 32], strides = [1, 1]} : vector<168x32xf32> to vector<56x32xf32>
    %91 = arith.maximumf %89, %90 : vector<56x32xf32>
    %92 = vector.extract_strided_slice %88 {offsets = [112, 0], sizes = [56, 32], strides = [1, 1]} : vector<168x32xf32> to vector<56x32xf32>
    %93 = arith.maximumf %91, %92 : vector<56x32xf32>
    %c2_63 = arith.constant 2 : index
    %c0_64 = arith.constant 0 : index
    %c0_65 = arith.constant 0 : index
    %94 = vector.load %arg6[%c2_63, %c0_64, %c0_65] : memref<5x1x32xf32, #tpu.memory_space<vmem>>, vector<1x1x32xf32>
    %95 = vector.shape_cast %94 : vector<1x1x32xf32> to vector<1x32xf32>
    %96 = vector.broadcast %95 : vector<1x32xf32> to vector<56x32xf32>
    %97 = arith.addf %93, %96 : vector<56x32xf32>
    %98 = math.tanh %97 : vector<56x32xf32>
    %c2_66 = arith.constant 2 : index
    %c0_67 = arith.constant 0 : index
    %c0_68 = arith.constant 0 : index
    %99 = vector.load %arg7[%c2_66, %c0_67, %c0_68] : memref<5x32x32xf32, #tpu.memory_space<vmem>>, vector<1x32x32xf32>
    %100 = vector.shape_cast %99 : vector<1x32x32xf32> to vector<32x32xf32>
    %cst_69 = arith.constant dense<0.000000e+00> : vector<56x32xf32>
    %101 = tpu.matmul %80, %100, %cst_69 {dimension_numbers = #tpu.dot_dimension_numbers<[1], [0], [0], [1], [0, 0, 1, 1], [], []>} : vector<56x32xf32>, vector<32x32xf32>, vector<56x32xf32> -> vector<56x32xf32>
    %c2_70 = arith.constant 2 : index
    %c0_71 = arith.constant 0 : index
    %c0_72 = arith.constant 0 : index
    %102 = vector.load %arg8[%c2_70, %c0_71, %c0_72] : memref<5x32x32xf32, #tpu.memory_space<vmem>>, vector<1x32x32xf32>
    %103 = vector.shape_cast %102 : vector<1x32x32xf32> to vector<32x32xf32>
    %cst_73 = arith.constant dense<0.000000e+00> : vector<56x32xf32>
    %104 = tpu.matmul %98, %103, %cst_73 {dimension_numbers = #tpu.dot_dimension_numbers<[1], [0], [0], [1], [0, 0, 1, 1], [], []>} : vector<56x32xf32>, vector<32x32xf32>, vector<56x32xf32> -> vector<56x32xf32>
    %105 = arith.addf %101, %104 : vector<56x32xf32>
    %c2_74 = arith.constant 2 : index
    %c0_75 = arith.constant 0 : index
    %c0_76 = arith.constant 0 : index
    %106 = vector.load %arg9[%c2_74, %c0_75, %c0_76] : memref<5x1x32xf32, #tpu.memory_space<vmem>>, vector<1x1x32xf32>
    %107 = vector.shape_cast %106 : vector<1x1x32xf32> to vector<1x32xf32>
    %108 = vector.broadcast %107 : vector<1x32xf32> to vector<56x32xf32>
    %109 = arith.addf %105, %108 : vector<56x32xf32>
    %110 = math.tanh %109 : vector<56x32xf32>
    %111 = arith.mulf %110, %110 : vector<56x32xf32>
    %cst_77 = arith.constant dense<0.000000e+00> : vector<56xf32>
    %112 = vector.multi_reduction <add>, %111, %cst_77 [1] : vector<56x32xf32> to vector<56xf32>
    %113 = vector.shape_cast %112 : vector<56xf32> to vector<56x1xf32>
    %cst_78 = arith.constant 9.99999996E-13 : f32
    %114 = vector.broadcast %cst_78 : f32 to vector<56x1xf32>
    %115 = arith.addf %113, %114 : vector<56x1xf32>
    %116 = math.rsqrt %115 : vector<56x1xf32>
    %117 = vector.broadcast %116 : vector<56x1xf32> to vector<56x32xf32>
    %118 = arith.mulf %110, %117 : vector<56x32xf32>
    %cst_79 = arith.constant dense<0.000000e+00> : vector<168x32xf32>
    %119 = tpu.matmul %0, %118, %cst_79 {dimension_numbers = #tpu.dot_dimension_numbers<[1], [0], [0], [1], [0, 0, 1, 1], [], []>} : vector<168x56xf32>, vector<56x32xf32>, vector<168x32xf32> -> vector<168x32xf32>
    %c3 = arith.constant 3 : index
    %c0_80 = arith.constant 0 : index
    %c0_81 = arith.constant 0 : index
    %120 = vector.load %arg4[%c3, %c0_80, %c0_81] : memref<5x32x32xf32, #tpu.memory_space<vmem>>, vector<1x32x32xf32>
    %121 = vector.shape_cast %120 : vector<1x32x32xf32> to vector<32x32xf32>
    %cst_82 = arith.constant dense<0.000000e+00> : vector<168x32xf32>
    %122 = tpu.matmul %119, %121, %cst_82 {dimension_numbers = #tpu.dot_dimension_numbers<[1], [0], [0], [1], [0, 0, 1, 1], [], []>} : vector<168x32xf32>, vector<32x32xf32>, vector<168x32xf32> -> vector<168x32xf32>
    %c3_83 = arith.constant 3 : index
    %c0_84 = arith.constant 0 : index
    %c0_85 = arith.constant 0 : index
    %123 = vector.load %arg5[%c3_83, %c0_84, %c0_85] : memref<5x8x32xf32, #tpu.memory_space<vmem>>, vector<1x8x32xf32>
    %124 = vector.shape_cast %123 : vector<1x8x32xf32> to vector<8x32xf32>
    %cst_86 = arith.constant dense<0.000000e+00> : vector<168x32xf32>
    %125 = tpu.matmul %2, %124, %cst_86 {dimension_numbers = #tpu.dot_dimension_numbers<[1], [0], [0], [1], [0, 0, 1, 1], [], []>} : vector<168x8xf32>, vector<8x32xf32>, vector<168x32xf32> -> vector<168x32xf32>
    %126 = arith.addf %122, %125 : vector<168x32xf32>
    %127 = vector.extract_strided_slice %126 {offsets = [0, 0], sizes = [56, 32], strides = [1, 1]} : vector<168x32xf32> to vector<56x32xf32>
    %128 = vector.extract_strided_slice %126 {offsets = [56, 0], sizes = [56, 32], strides = [1, 1]} : vector<168x32xf32> to vector<56x32xf32>
    %129 = arith.maximumf %127, %128 : vector<56x32xf32>
    %130 = vector.extract_strided_slice %126 {offsets = [112, 0], sizes = [56, 32], strides = [1, 1]} : vector<168x32xf32> to vector<56x32xf32>
    %131 = arith.maximumf %129, %130 : vector<56x32xf32>
    %c3_87 = arith.constant 3 : index
    %c0_88 = arith.constant 0 : index
    %c0_89 = arith.constant 0 : index
    %132 = vector.load %arg6[%c3_87, %c0_88, %c0_89] : memref<5x1x32xf32, #tpu.memory_space<vmem>>, vector<1x1x32xf32>
    %133 = vector.shape_cast %132 : vector<1x1x32xf32> to vector<1x32xf32>
    %134 = vector.broadcast %133 : vector<1x32xf32> to vector<56x32xf32>
    %135 = arith.addf %131, %134 : vector<56x32xf32>
    %136 = math.tanh %135 : vector<56x32xf32>
    %c3_90 = arith.constant 3 : index
    %c0_91 = arith.constant 0 : index
    %c0_92 = arith.constant 0 : index
    %137 = vector.load %arg7[%c3_90, %c0_91, %c0_92] : memref<5x32x32xf32, #tpu.memory_space<vmem>>, vector<1x32x32xf32>
    %138 = vector.shape_cast %137 : vector<1x32x32xf32> to vector<32x32xf32>
    %cst_93 = arith.constant dense<0.000000e+00> : vector<56x32xf32>
    %139 = tpu.matmul %118, %138, %cst_93 {dimension_numbers = #tpu.dot_dimension_numbers<[1], [0], [0], [1], [0, 0, 1, 1], [], []>} : vector<56x32xf32>, vector<32x32xf32>, vector<56x32xf32> -> vector<56x32xf32>
    %c3_94 = arith.constant 3 : index
    %c0_95 = arith.constant 0 : index
    %c0_96 = arith.constant 0 : index
    %140 = vector.load %arg8[%c3_94, %c0_95, %c0_96] : memref<5x32x32xf32, #tpu.memory_space<vmem>>, vector<1x32x32xf32>
    %141 = vector.shape_cast %140 : vector<1x32x32xf32> to vector<32x32xf32>
    %cst_97 = arith.constant dense<0.000000e+00> : vector<56x32xf32>
    %142 = tpu.matmul %136, %141, %cst_97 {dimension_numbers = #tpu.dot_dimension_numbers<[1], [0], [0], [1], [0, 0, 1, 1], [], []>} : vector<56x32xf32>, vector<32x32xf32>, vector<56x32xf32> -> vector<56x32xf32>
    %143 = arith.addf %139, %142 : vector<56x32xf32>
    %c3_98 = arith.constant 3 : index
    %c0_99 = arith.constant 0 : index
    %c0_100 = arith.constant 0 : index
    %144 = vector.load %arg9[%c3_98, %c0_99, %c0_100] : memref<5x1x32xf32, #tpu.memory_space<vmem>>, vector<1x1x32xf32>
    %145 = vector.shape_cast %144 : vector<1x1x32xf32> to vector<1x32xf32>
    %146 = vector.broadcast %145 : vector<1x32xf32> to vector<56x32xf32>
    %147 = arith.addf %143, %146 : vector<56x32xf32>
    %148 = math.tanh %147 : vector<56x32xf32>
    %149 = arith.mulf %148, %148 : vector<56x32xf32>
    %cst_101 = arith.constant dense<0.000000e+00> : vector<56xf32>
    %150 = vector.multi_reduction <add>, %149, %cst_101 [1] : vector<56x32xf32> to vector<56xf32>
    %151 = vector.shape_cast %150 : vector<56xf32> to vector<56x1xf32>
    %cst_102 = arith.constant 9.99999996E-13 : f32
    %152 = vector.broadcast %cst_102 : f32 to vector<56x1xf32>
    %153 = arith.addf %151, %152 : vector<56x1xf32>
    %154 = math.rsqrt %153 : vector<56x1xf32>
    %155 = vector.broadcast %154 : vector<56x1xf32> to vector<56x32xf32>
    %156 = arith.mulf %148, %155 : vector<56x32xf32>
    %cst_103 = arith.constant dense<0.000000e+00> : vector<168x32xf32>
    %157 = tpu.matmul %0, %156, %cst_103 {dimension_numbers = #tpu.dot_dimension_numbers<[1], [0], [0], [1], [0, 0, 1, 1], [], []>} : vector<168x56xf32>, vector<56x32xf32>, vector<168x32xf32> -> vector<168x32xf32>
    %c4 = arith.constant 4 : index
    %c0_104 = arith.constant 0 : index
    %c0_105 = arith.constant 0 : index
    %158 = vector.load %arg4[%c4, %c0_104, %c0_105] : memref<5x32x32xf32, #tpu.memory_space<vmem>>, vector<1x32x32xf32>
    %159 = vector.shape_cast %158 : vector<1x32x32xf32> to vector<32x32xf32>
    %cst_106 = arith.constant dense<0.000000e+00> : vector<168x32xf32>
    %160 = tpu.matmul %157, %159, %cst_106 {dimension_numbers = #tpu.dot_dimension_numbers<[1], [0], [0], [1], [0, 0, 1, 1], [], []>} : vector<168x32xf32>, vector<32x32xf32>, vector<168x32xf32> -> vector<168x32xf32>
    %c4_107 = arith.constant 4 : index
    %c0_108 = arith.constant 0 : index
    %c0_109 = arith.constant 0 : index
    %161 = vector.load %arg5[%c4_107, %c0_108, %c0_109] : memref<5x8x32xf32, #tpu.memory_space<vmem>>, vector<1x8x32xf32>
    %162 = vector.shape_cast %161 : vector<1x8x32xf32> to vector<8x32xf32>
    %cst_110 = arith.constant dense<0.000000e+00> : vector<168x32xf32>
    %163 = tpu.matmul %2, %162, %cst_110 {dimension_numbers = #tpu.dot_dimension_numbers<[1], [0], [0], [1], [0, 0, 1, 1], [], []>} : vector<168x8xf32>, vector<8x32xf32>, vector<168x32xf32> -> vector<168x32xf32>
    %164 = arith.addf %160, %163 : vector<168x32xf32>
    %165 = vector.extract_strided_slice %164 {offsets = [0, 0], sizes = [56, 32], strides = [1, 1]} : vector<168x32xf32> to vector<56x32xf32>
    %166 = vector.extract_strided_slice %164 {offsets = [56, 0], sizes = [56, 32], strides = [1, 1]} : vector<168x32xf32> to vector<56x32xf32>
    %167 = arith.maximumf %165, %166 : vector<56x32xf32>
    %168 = vector.extract_strided_slice %164 {offsets = [112, 0], sizes = [56, 32], strides = [1, 1]} : vector<168x32xf32> to vector<56x32xf32>
    %169 = arith.maximumf %167, %168 : vector<56x32xf32>
    %c4_111 = arith.constant 4 : index
    %c0_112 = arith.constant 0 : index
    %c0_113 = arith.constant 0 : index
    %170 = vector.load %arg6[%c4_111, %c0_112, %c0_113] : memref<5x1x32xf32, #tpu.memory_space<vmem>>, vector<1x1x32xf32>
    %171 = vector.shape_cast %170 : vector<1x1x32xf32> to vector<1x32xf32>
    %172 = vector.broadcast %171 : vector<1x32xf32> to vector<56x32xf32>
    %173 = arith.addf %169, %172 : vector<56x32xf32>
    %174 = math.tanh %173 : vector<56x32xf32>
    %c4_114 = arith.constant 4 : index
    %c0_115 = arith.constant 0 : index
    %c0_116 = arith.constant 0 : index
    %175 = vector.load %arg7[%c4_114, %c0_115, %c0_116] : memref<5x32x32xf32, #tpu.memory_space<vmem>>, vector<1x32x32xf32>
    %176 = vector.shape_cast %175 : vector<1x32x32xf32> to vector<32x32xf32>
    %cst_117 = arith.constant dense<0.000000e+00> : vector<56x32xf32>
    %177 = tpu.matmul %156, %176, %cst_117 {dimension_numbers = #tpu.dot_dimension_numbers<[1], [0], [0], [1], [0, 0, 1, 1], [], []>} : vector<56x32xf32>, vector<32x32xf32>, vector<56x32xf32> -> vector<56x32xf32>
    %c4_118 = arith.constant 4 : index
    %c0_119 = arith.constant 0 : index
    %c0_120 = arith.constant 0 : index
    %178 = vector.load %arg8[%c4_118, %c0_119, %c0_120] : memref<5x32x32xf32, #tpu.memory_space<vmem>>, vector<1x32x32xf32>
    %179 = vector.shape_cast %178 : vector<1x32x32xf32> to vector<32x32xf32>
    %cst_121 = arith.constant dense<0.000000e+00> : vector<56x32xf32>
    %180 = tpu.matmul %174, %179, %cst_121 {dimension_numbers = #tpu.dot_dimension_numbers<[1], [0], [0], [1], [0, 0, 1, 1], [], []>} : vector<56x32xf32>, vector<32x32xf32>, vector<56x32xf32> -> vector<56x32xf32>
    %181 = arith.addf %177, %180 : vector<56x32xf32>
    %c4_122 = arith.constant 4 : index
    %c0_123 = arith.constant 0 : index
    %c0_124 = arith.constant 0 : index
    %182 = vector.load %arg9[%c4_122, %c0_123, %c0_124] : memref<5x1x32xf32, #tpu.memory_space<vmem>>, vector<1x1x32xf32>
    %183 = vector.shape_cast %182 : vector<1x1x32xf32> to vector<1x32xf32>
    %184 = vector.broadcast %183 : vector<1x32xf32> to vector<56x32xf32>
    %185 = arith.addf %181, %184 : vector<56x32xf32>
    %c0_125 = arith.constant 0 : index
    %c0_126 = arith.constant 0 : index
    %c0_127 = arith.constant 0 : index
    %186 = vector.load %arg10[%c0_125, %c0_126, %c0_127] : memref<1x56x32xf32, #tpu.memory_space<vmem>>, vector<1x56x32xf32>
    %187 = vector.shape_cast %186 : vector<1x56x32xf32> to vector<56x32xf32>
    %188 = vector.shape_cast %185 : vector<56x32xf32> to vector<1x56x32xf32>
    tpu.vector_store %arg10[%c0_125, %c0_126, %c0_127], %188 {strides = array<i32>} : memref<1x56x32xf32, #tpu.memory_space<vmem>>, vector<1x56x32xf32>,
    return
  }
  func.func @transform_0(%arg0: i32) -> (i32, i32) {
    %c0_i32 = arith.constant 0 : i32
    %c0_i32_0 = arith.constant 0 : i32
    %c0_i32_1 = arith.constant 0 : i32
    return %c0_i32, %c0_i32_0 : i32, i32
  }
  func.func @transform_1(%arg0: i32) -> (i32, i32, i32) {
    %c0_i32 = arith.constant 0 : i32
    %c0_i32_0 = arith.constant 0 : i32
    %c0_i32_1 = arith.constant 0 : i32
    return %arg0, %c0_i32, %c0_i32_0 : i32, i32, i32
  }
  func.func @transform_2(%arg0: i32) -> (i32, i32, i32) {
    %c0_i32 = arith.constant 0 : i32
    %c0_i32_0 = arith.constant 0 : i32
    %c0_i32_1 = arith.constant 0 : i32
    return %arg0, %c0_i32, %c0_i32_0 : i32, i32, i32
  }
  func.func @transform_3(%arg0: i32) -> (i32, i32, i32) {
    %c0_i32 = arith.constant 0 : i32
    %c0_i32_0 = arith.constant 0 : i32
    %c0_i32_1 = arith.constant 0 : i32
    %c0_i32_2 = arith.constant 0 : i32
    return %c0_i32, %c0_i32_0, %c0_i32_1 : i32, i32, i32
  }
  func.func @transform_4(%arg0: i32) -> (i32, i32, i32) {
    %c0_i32 = arith.constant 0 : i32
    %c0_i32_0 = arith.constant 0 : i32
    %c0_i32_1 = arith.constant 0 : i32
    %c0_i32_2 = arith.constant 0 : i32
    return %c0_i32, %c0_i32_0, %c0_i32_1 : i32, i32, i32
  }
  func.func @transform_5(%arg0: i32) -> (i32, i32, i32) {
    %c0_i32 = arith.constant 0 : i32
    %c0_i32_0 = arith.constant 0 : i32
    %c0_i32_1 = arith.constant 0 : i32
    %c0_i32_2 = arith.constant 0 : i32
    return %c0_i32, %c0_i32_0, %c0_i32_1 : i32, i32, i32
  }
  func.func @transform_6(%arg0: i32) -> (i32, i32, i32) {
    %c0_i32 = arith.constant 0 : i32
    %c0_i32_0 = arith.constant 0 : i32
    %c0_i32_1 = arith.constant 0 : i32
    %c0_i32_2 = arith.constant 0 : i32
    return %c0_i32, %c0_i32_0, %c0_i32_1 : i32, i32, i32
  }
  func.func @transform_7(%arg0: i32) -> (i32, i32, i32) {
    %c0_i32 = arith.constant 0 : i32
    %c0_i32_0 = arith.constant 0 : i32
    %c0_i32_1 = arith.constant 0 : i32
    %c0_i32_2 = arith.constant 0 : i32
    return %c0_i32, %c0_i32_0, %c0_i32_1 : i32, i32, i32
  }
  func.func @transform_8(%arg0: i32) -> (i32, i32, i32) {
    %c0_i32 = arith.constant 0 : i32
    %c0_i32_0 = arith.constant 0 : i32
    %c0_i32_1 = arith.constant 0 : i32
    %c0_i32_2 = arith.constant 0 : i32
    return %c0_i32, %c0_i32_0, %c0_i32_1 : i32, i32, i32
  }
  func.func @transform_9(%arg0: i32) -> (i32, i32, i32) {
    %c0_i32 = arith.constant 0 : i32
    %c0_i32_0 = arith.constant 0 : i32
    %c0_i32_1 = arith.constant 0 : i32
    return %arg0, %c0_i32, %c0_i32_0 : i32, i32, i32
  }
}

</mosaic_0001>

<bundles_post_ra>
// kernel: tpu_custom_call.1
= control target key start
LH: loop header
LB: loop body
LE: loop exit
PB: predicated region body
PF: predicated region fallthrough
CT: control target
= control target key end

     0   :  { %s8242_s30 = smov 0   ;;  %s10575_s0 = inlined_call_operand.vmem [shape: f32[168,56], index: 0, kind: input, shape index: {}]   ;;  %s10576_s1 = inlined_call_operand.vmem [shape: f32[2,168,8], index: 1, kind: input, shape index: {}]   ;;  %s10577_s2 = inlined_call_operand.vmem [shape: f32[2,56,32], index: 2, kind: input, shape index: {}]   ;;  %s10578_s3 = inlined_call_operand.vmem [shape: f32[5,32,32], index: 3, kind: input, shape index: {}]   ;;  %s10579_s4 = inlined_call_operand.vmem [shape: f32[5,8,32], index: 4, kind: input, shape index: {}]   ;;  %s10580_s5 = inlined_call_operand.vmem [shape: f32[5,1,32], index: 5, kind: input, shape index: {}]   ;;  %s10581_s6 = inlined_call_operand.vmem [shape: f32[5,32,32], index: 6, kind: input, shape index: {}]   ;;  %s10582_s7 = inlined_call_operand.vmem [shape: f32[5,32,32], index: 7, kind: input, shape index: {}]   ;;  %s10583_s8 = inlined_call_operand.vmem [shape: f32[5,1,32], index: 8, kind: input, shape index: {}]   ;;  %s10584_s9 = inlined_call_operand.vmem [shape: f32[2,56,32], index: 9, kind: output, shape index: {}]  }
   0x1 LB: > { %s5238_s10 = sadd.s32 4294967295, %s8187_s30   ;;  %p5242_p0 = scmp.ge.s32.totalorder %s8187_s30, 1  ;;  %s8187_s30 = sphi %s8242_s30, %s19_s30  }
   0x2   : > { %p297_p1 = scmp.lt.s32.totalorder %s8187_s30, 3 }
   0x4   : > { %p298_p2 = pnand %p5242_p0, %p297_p1 }
   0x6   : > { %301 = sbr.rel (%p298_p2) target bundleno = 4548 (0x11c4), region = 56 }
   0xd   : > { %p338_p3 = scmp.lt.s32.totalorder %s5238_s10, 1  ;;  %v10585_v0 = vmov 0.0|0.0   ;;  %vm8190_vm0 = vmmov 0   ;;  %v10587_v1 = vmov 0.0   ;;  %v640_v2 = vld [vmem:[%s10579_s4] sm:$0xff]  ;;  %vm641_vm1 = vcmask 64512  }
   0xe   : > { %7543 = vmatprep.subr.bf16.mxu0 %v10585_v0  ;;  %6202 = vmatprep.mubr.msk.f32.mxu0 %vm8190_vm0, %v10587_v1  ;;  %v636_v13 = vld [vmem:[%s10578_s3] sm:$0xff]  ;;  %v637_v14 = vld [vmem:[%s10578_s3 + $0x8] sm:$0xff]  ;;  %v638_v18 = vld [vmem:[%s10578_s3 + $0x10] sm:$0xff]  ;;  %vm402_vm2 = vcmask 457728   ;;  %vm875_vm3 = vcmask 261120  }
   0xf   : > { %s10628_s10 = smov (!%p338_p3, %s5238_s10), 1  ;;  %6265 = vmatprep.subr.mxu1 %v10587_v1  ;;  %6267 = vmatprep.mubr.msk.f32.mxu1 %vm8190_vm0, %v10587_v1  ;;  %v7553_v15 = vpack.c.bf16 %v637_v14, %v636_v13  ;;  %v639_v19 = vld [vmem:[%s10578_s3 + $0x18] sm:$0xff]  ;;  %v8335_v23 = vld [vmem:[%s10575_s0] sm:$0xff]  ;;  %v8350_v25 = vld [vmem:[%s10575_s0 + $0x8] sm:$0xff] }
  0x10   : > { %s7896_s11 = smul.u32 168, %s10628_s10  ;;  %6266 = vmatpush3.msra.mxu1 %v640_v2  ;;  %v7556_v20 = vpack.c.bf16 %v639_v19, %v638_v18  ;;  %v8364_v27 = vld [vmem:[%s10575_s0 + $0x10] sm:$0xff]  ;;  %v8379_v29 = vld [vmem:[%s10575_s0 + $0x18] sm:$0xff]  ;;  %v8395_v31 = vld [vmem:[%s10575_s0 + $0x20] sm:$0xff] }
  0x11   : > { %s7897_s12 = smul.u32 56, %s10628_s10  ;;  %7552 = vmatprep.subr.bf16.mxu1 %v10585_v0  ;;  %v8411_v33 = vld [vmem:[%s10575_s0 + $0x28] sm:$0xff]  ;;  %v8427_v35 = vld [vmem:[%s10575_s0 + $0x30] sm:$0xff]  ;;  %v8443_v37 = vld [vmem:[%s10575_s0 + $0x38] sm:$0xff] }
  0x12   : > { %s8263_s15 = scalar_lea.vmem %s10576_s1, %s7896_s11  ;;  %v8459_v39 = vld [vmem:[%s10575_s0 + $0x40] sm:$0xff]  ;;  %v8475_v41 = vld [vmem:[%s10575_s0 + $0x48] sm:$0xff]  ;;  %v8491_v43 = vld [vmem:[%s10575_s0 + $0x50] sm:$0xff] }
  0x13   : > { %s8270_s18 = scalar_lea.vmem %s10577_s2, %s7897_s12  ;;  %v374_v8 = vld [vmem:[%s8263_s15] sm:$0xff]  ;;  %v375_v12 = vld [vmem:[%s8263_s15 + $0x8] sm:$0xff]  ;;  %v376_v17 = vld [vmem:[%s8263_s15 + $0x10] sm:$0xff]  ;;  %s10556_s23 = scalar_lea.vmem %s10584_s9, %s7897_s12 }
  0x14   : > { %v8276_v3 = vld [vmem:[%s8270_s18] sm:$0xff]  ;;  %v8279_v4 = vld [vmem:[%s8270_s18 + $0x8] sm:$0xff]  ;;  %v8282_v5 = vld [vmem:[%s8270_s18 + $0x10] sm:$0xff]  ;;  %6268 = vmatmul.mubr.msk.f32.vlgmr.msra.gmra.mrb[0].mxu1 %vm641_vm1, %v374_v8 }
  0x15   : > { %v7544_v6 = vpack.c.bf16 %v8279_v4, %v8276_v3  ;;  %v8287_v7 = vld [vmem:[%s8270_s18 + $0x18] sm:$0xff]  ;;  %v8294_v10 = vld [vmem:[%s8270_s18 + $0x20] sm:$0xff]  ;;  %v8299_v11 = vld [vmem:[%s8270_s18 + $0x28] sm:$0xff]  ;;  %6270 = vmatprep.mubr.msk.f32.mxu1 %vm8190_vm0, %v10587_v1  ;;  %7554 = vmatpush3.bf16.msra.mxu1 %v7553_v15 }
  0x16   : > { %v7547_v9 = vpack.c.bf16 %v8287_v7, %v8282_v5  ;;  %v7550_v16 = vpack.c.bf16 %v8299_v11, %v8294_v10  ;;  %7555 = vmatprep.subr.bf16.mxu1 %v10585_v0  ;;  %v8327_v21 = vld [vmem:[%s8270_s18 + $0x30] sm:$0xff]  ;;  %v377_v22 = vld [vmem:[%s8263_s15 + $0x18] sm:$0xff]  ;;  %v378_v24 = vld [vmem:[%s8263_s15 + $0x20] sm:$0xff] }
  0x17   : > { %7545 = vmatpush3.bf16.msra.mxu0 %v7544_v6  ;;  %v379_v26 = vld [vmem:[%s8263_s15 + $0x28] sm:$0xff]  ;;  %v8372_v28 = vld [vmem:[%s8263_s15 + $0x30] sm:$0xff]  ;;  %v8388_v30 = vld [vmem:[%s8263_s15 + $0x38] sm:$0xff] }
  0x18   : > { %7546 = vmatprep.subr.bf16.mxu0 %v10585_v0  ;;  %6271 = vmatmul.mubr.msk.f32.gmra.mrb[2].mxu1 %vm641_vm1, %v375_v12  ;;  %v8404_v32 = vld [vmem:[%s8263_s15 + $0x40] sm:$0xff]  ;;  %v8420_v34 = vld [vmem:[%s8263_s15 + $0x48] sm:$0xff]  ;;  %v8436_v36 = vld [vmem:[%s8263_s15 + $0x50] sm:$0xff] }
  0x19   : > { %6273 = vmatprep.mubr.msk.f32.mxu1 %vm8190_vm0, %v10587_v1  ;;  %7557 = vmatpush3.bf16.msra.mxu1 %v7556_v20  ;;  %v8452_v38 = vld [vmem:[%s8263_s15 + $0x58] sm:$0xff]  ;;  %v8468_v40 = vld [vmem:[%s8263_s15 + $0x60] sm:$0xff]  ;;  %v8484_v42 = vld [vmem:[%s8263_s15 + $0x68] sm:$0xff] }
  0x1a   : > { %7678 = vmatprep.subr.bf16.mxu1 %v10585_v0  ;;  %v8500_v44 = vld [vmem:[%s8263_s15 + $0x70] sm:$0xff]  ;;  %v8507_v45 = vld [vmem:[%s10575_s0 + $0x58] sm:$0xff]  ;;  %v8523_v47 = vld [vmem:[%s10575_s0 + $0x60] sm:$0xff] }
  0x1b   : > { %7548 = vmatpush3.bf16.msra.mxu0 %v7547_v9  ;;  %v8516_v46 = vld [vmem:[%s8263_s15 + $0x78] sm:$0xff]  ;;  %v8532_v48 = vld [vmem:[%s8263_s15 + $0x80] sm:$0xff]  ;;  %v8539_v49 = vld [vmem:[%s10575_s0 + $0x68] sm:$0xff] }
  0x1c   : > { %7549 = vmatprep.subr.bf16.mxu0 %v10585_v0  ;;  %6274 = vmatmul.mubr.msk.f32.gmra.mrb[4].mxu1 %vm641_vm1, %v376_v17  ;;  %10601 = vst [vmem:[#allocation2_spill] sm:$0xff] %v8532_v48  ;;  %v8548_v50 = vld [vmem:[%s8263_s15 + $0x88] sm:$0xff]  ;;  %v8555_v51 = vld [vmem:[%s10575_s0 + $0x70] sm:$0xff]  ;;  %v8571_v53 = vld [vmem:[%s10575_s0 + $0x78] sm:$0xff] }
  0x1d   : > { %6276 = vmatprep.mubr.msk.f32.mxu1 %vm8190_vm0, %v10587_v1  ;;  %10602 = vst [vmem:[#allocation3_spill] sm:$0xff] %v8548_v50  ;;  %v8564_v52 = vld [vmem:[%s8263_s15 + $0x90] sm:$0xff]  ;;  %v8580_v54 = vld [vmem:[%s8263_s15 + $0x98] sm:$0xff]  ;;  %v8587_v55 = vld [vmem:[%s10575_s0 + $0x80] sm:$0xff] }
  0x1e   : > { %10603 = vst [vmem:[#allocation4_spill] sm:$0xff] %v8564_v52  ;;  %10604 = vst [vmem:[#allocation5_spill] sm:$0xff] %v8580_v54  ;;  %v8596_v56 = vld [vmem:[%s8263_s15 + $0xa0] sm:$0xff]  ;;  %v8603_v57 = vld [vmem:[%s10575_s0 + $0x88] sm:$0xff] }
  0x1f   : > { %7551 = vmatpush3.bf16.msra.mxu0 %v7550_v16  ;;  %10605 = vst [vmem:[#allocation6_spill] sm:$0xff] %v8596_v56  ;;  %v8616_v58 = vld [vmem:[%s10575_s0 + $0x90] sm:$0xff]  ;;  %v8625_v59 = vld [vmem:[%s10575_s0 + $0x98] sm:$0xff]  ;;  %v8634_v60 = vld [vmem:[%s10575_s0 + $0xa0] sm:$0xff] }
  0x20   : > { %6200 = vmatprep.subr.mxu0 %v10587_v1  ;;  %6277 = vmatmul.mubr.msk.f32.gmra.mrb[6].mxu1 %vm641_vm1, %v377_v22 }
  0x21   : > { %6279 = vmatprep.mubr.msk.f32.mxu1 %vm8190_vm0, %v10587_v1 }
  0x23   : > { %6201 = vmatpush3.msra.mxu0 %v8327_v21 }
  0x24   : > { %6203 = vmatmul.mubr.msk.f32.vlgmr.msra.gmra.mrb[0].mxu0 %vm402_vm2, %v8335_v23  ;;  %7558 = vmatprep.subr.bf16.mxu0 %v10585_v0 }
  0x25   : > { %6205 = vmatprep.mubr.msk.f32.mxu0 %vm8190_vm0, %v10587_v1  ;;  %6280 = vmatmul.mubr.msk.f32.gmra.mrb[8].mxu1 %vm641_vm1, %v378_v24 }
  0x26   : > { %6282 = vmatprep.mubr.msk.f32.mxu1 %vm8190_vm0, %v10587_v1 }
  0x28   : > { %6206 = vmatmul.mubr.msk.f32.gmra.mrb[2].mxu0 %vm402_vm2, %v8350_v25 }
  0x29   : > { %6208 = vmatprep.mubr.msk.f32.mxu0 %vm8190_vm0, %v10587_v1  ;;  %6283 = vmatmul.mubr.msk.f32.gmra.mrb[10].mxu1 %vm641_vm1, %v379_v26 }
  0x2a   : > { %6285 = vmatprep.mubr.msk.f32.mxu1 %vm8190_vm0, %v10587_v1 }
  0x2c   : > { %6209 = vmatmul.mubr.msk.f32.gmra.mrb[4].mxu0 %vm402_vm2, %v8364_v27 }
  0x2d   : > { %6211 = vmatprep.mubr.msk.f32.mxu0 %vm8190_vm0, %v10587_v1  ;;  %6286 = vmatmul.mubr.msk.f32.gmra.mrb[12].mxu1 %vm641_vm1, %v8372_v28 }
  0x2e   : > { %6288 = vmatprep.mubr.msk.f32.mxu1 %vm8190_vm0, %v10587_v1 }
  0x30   : > { %6212 = vmatmul.mubr.msk.f32.gmra.mrb[6].mxu0 %vm402_vm2, %v8379_v29 }
  0x31   : > { %6214 = vmatprep.mubr.msk.f32.mxu0 %vm8190_vm0, %v10587_v1  ;;  %6289 = vmatmul.mubr.msk.f32.gmra.mrb[14].mxu1 %vm641_vm1, %v8388_v30 }
  0x32   : > { %6291 = vmatprep.mubr.msk.f32.mxu1 %vm8190_vm0, %v10587_v1 }
  0x34   : > { %6215 = vmatmul.mubr.msk.f32.gmra.mrb[8].mxu0 %vm402_vm2, %v8395_v31 }
  0x35   : > { %6217 = vmatprep.mubr.msk.f32.mxu0 %vm8190_vm0, %v10587_v1  ;;  %6292 = vmatmul.mubr.msk.f32.gmra.mrb[16].mxu1 %vm641_vm1, %v8404_v32 }
  0x36   : > { %6294 = vmatprep.mubr.msk.f32.mxu1 %vm8190_vm0, %v10587_v1 }
  0x38   : > { %6218 = vmatmul.mubr.msk.f32.gmra.mrb[10].mxu0 %vm402_vm2, %v8411_v33 }
  0x39   : > { %6220 = vmatprep.mubr.msk.f32.mxu0 %vm8190_vm0, %v10587_v1  ;;  %6295 = vmatmul.mubr.msk.f32.gmra.mrb[18].mxu1 %vm641_vm1, %v8420_v34 }
  0x3a   : > { %6297 = vmatprep.mubr.msk.f32.mxu1 %vm8190_vm0, %v10587_v1 }
  0x3c   : > { %6221 = vmatmul.mubr.msk.f32.gmra.mrb[12].mxu0 %vm402_vm2, %v8427_v35 }
  0x3d   : > { %6223 = vmatprep.mubr.msk.f32.mxu0 %vm8190_vm0, %v10587_v1  ;;  %6298 = vmatmul.mubr.msk.f32.gmra.mrb[20].mxu1 %vm641_vm1, %v8436_v36 }
  0x3e   : > { %6300 = vmatprep.mubr.msk.f32.mxu1 %vm8190_vm0, %v10587_v1 }
  0x40   : > { %6224 = vmatmul.mubr.msk.f32.gmra.mrb[14].mxu0 %vm402_vm2, %v8443_v37 }
  0x41   : > { %6226 = vmatprep.mubr.msk.f32.mxu0 %vm8190_vm0, %v10587_v1  ;;  %6301 = vmatmul.mubr.msk.f32.gmra.mrb[22].mxu1 %vm641_vm1, %v8452_v38 }
  0x42   : > { %6303 = vmatprep.mubr.msk.f32.mxu1 %vm8190_vm0, %v10587_v1 }
  0x44   : > { %6227 = vmatmul.mubr.msk.f32.gmra.mrb[16].mxu0 %vm402_vm2, %v8459_v39 }
  0x45   : > { %6229 = vmatprep.mubr.msk.f32.mxu0 %vm8190_vm0, %v10587_v1  ;;  %6304 = vmatmul.mubr.msk.f32.gmra.mrb[24].mxu1 %vm641_vm1, %v8468_v40 }
  0x46   : > { %6306 = vmatprep.mubr.msk.f32.mxu1 %vm8190_vm0, %v10587_v1 }
  0x48   : > { %6230 = vmatmul.mubr.msk.f32.gmra.mrb[18].mxu0 %vm402_vm2, %v8475_v41 }
  0x49   : > { %6232 = vmatprep.mubr.msk.f32.mxu0 %vm8190_vm0, %v10587_v1  ;;  %6307 = vmatmul.mubr.msk.f32.gmra.mrb[26].mxu1 %vm641_vm1, %v8484_v42 }
  0x4a   : > { %6309 = vmatprep.mubr.msk.f32.mxu1 %vm8190_vm0, %v10587_v1 }
  0x4c   : > { %6233 = vmatmul.mubr.msk.f32.gmra.mrb[20].mxu0 %vm402_vm2, %v8491_v43 }
  0x4d   : > { %6235 = vmatprep.mubr.msk.f32.mxu0 %vm8190_vm0, %v10587_v1  ;;  %6310 = vmatmul.mubr.msk.f32.gmra.mrb[28].mxu1 %vm641_vm1, %v8500_v44 }
  0x4e   : > { %6312 = vmatprep.mubr.msk.f32.mxu1 %vm8190_vm0, %v10587_v1 }
  0x50   : > { %6236 = vmatmul.mubr.msk.f32.gmra.mrb[22].mxu0 %vm402_vm2, %v8507_v45 }
  0x51   : > { %6238 = vmatprep.mubr.msk.f32.mxu0 %vm8190_vm0, %v10587_v1  ;;  %6313 = vmatmul.mubr.msk.f32.gmra.mrb[30].mxu1 %vm641_vm1, %v8516_v46 }
  0x52   : > { %6315 = vmatprep.mubr.msk.f32.mxu1 %vm8190_vm0, %v10587_v1 }
  0x54   : > { %6239 = vmatmul.mubr.msk.f32.gmra.mrb[24].mxu0 %vm402_vm2, %v8523_v47 }
  0x55   : > { %6241 = vmatprep.mubr.msk.f32.mxu0 %vm8190_vm0, %v10587_v1  ;;  %6316 = vmatmul.mubr.msk.f32.gmra.mrb[32].mxu1 %vm641_vm1, %v8532_v48 }
  0x56   : > { %6318 = vmatprep.mubr.msk.f32.mxu1 %vm8190_vm0, %v10587_v1 }
  0x58   : > { %6242 = vmatmul.mubr.msk.f32.gmra.mrb[26].mxu0 %vm402_vm2, %v8539_v49 }
  0x59   : > { %6244 = vmatprep.mubr.msk.f32.mxu0 %vm8190_vm0, %v10587_v1  ;;  %6319 = vmatmul.mubr.msk.f32.gmra.mrb[34].mxu1 %vm641_vm1, %v8548_v50 }
  0x5a   : > { %6321 = vmatprep.mubr.msk.f32.mxu1 %vm8190_vm0, %v10587_v1 }
  0x5c   : > { %6245 = vmatmul.mubr.msk.f32.gmra.mrb[28].mxu0 %vm402_vm2, %v8555_v51 }
  0x5d   : > { %6247 = vmatprep.mubr.msk.f32.mxu0 %vm8190_vm0, %v10587_v1  ;;  %6322 = vmatmul.mubr.msk.f32.gmra.mrb[36].mxu1 %vm641_vm1, %v8564_v52 }
  0x5e   : > { %6324 = vmatprep.mubr.msk.f32.mxu1 %vm8190_vm0, %v10587_v1 }
  0x60   : > { %6248 = vmatmul.mubr.msk.f32.gmra.mrb[30].mxu0 %vm402_vm2, %v8571_v53 }
  0x61   : > { %6250 = vmatprep.mubr.msk.f32.mxu0 %vm8190_vm0, %v10587_v1  ;;  %6325 = vmatmul.mubr.msk.f32.gmra.mrb[38].mxu1 %vm641_vm1, %v8580_v54 }
  0x62   : > { %6327 = vmatprep.mubr.msk.f32.mxu1 %vm8190_vm0, %v10587_v1 }
  0x64   : > { %6251 = vmatmul.mubr.msk.f32.gmra.mrb[32].mxu0 %vm402_vm2, %v8587_v55 }
  0x65   : > { %6253 = vmatprep.mubr.msk.f32.mxu0 %vm8190_vm0, %v10587_v1  ;;  %6328 = vmatmul.mubr.msk.f32.gmra.mrb[40].mxu1 %vm641_vm1, %v8596_v56 }
  0x66   : > { %6338 = vmatprep.mubr.msk.f32.mxu1 %vm8190_vm0, %v10587_v1 }
  0x68   : > { %6254 = vmatmul.mubr.msk.f32.gmra.mrb[34].mxu0 %vm402_vm2, %v8603_v57 }
  0x69   : > { %6256 = vmatprep.mubr.msk.f32.mxu0 %vm8190_vm0, %v10587_v1 }
  0x6c   : > { %6257 = vmatmul.mubr.msk.f32.gmra.mrb[36].mxu0 %vm402_vm2, %v8616_v58 }
  0x6d   : > { %6259 = vmatprep.mubr.msk.f32.mxu0 %vm8190_vm0, %v10587_v1 }
  0x70   : > { %6260 = vmatmul.mubr.msk.f32.gmra.mrb[38].mxu0 %vm402_vm2, %v8625_v59 }
  0x71   : > { %6262 = vmatprep.mubr.msk.f32.mxu0 %vm8190_vm0, %v10587_v1 }
  0x74   : > { %6263 = vmatmul.mubr.msk.f32.gmra.mrb[40].mxu0 %vm402_vm2, %v8634_v60 }
  0x75   : > { %6409 = vmatprep.mubr.msk.f32.mxu0 %vm8190_vm0, %v10587_v1 }
  0xf7   : > { %v532_v61 = vpop.f32.mrb[0].mxu0 }
  0xf8   : > { %v6204_v62 = vpop.f32.mrb[1].mxu0  ;;  %6339 = vmatmul.mubr.msk.f32.vlgmr.msra.gmra.mrb[0].mxu1 %vm875_vm3, %v532_v61 }
  0xf9   : > { %6341 = vmatprep.mubr.msk.f32.mxu1 %vm8190_vm0, %v10587_v1 }
  0xfb   : > { %v537_v63 = vpop.f32.mrb[2].mxu0 }
  0xfc   : > { %v6207_v2 = vpop.f32.mrb[3].mxu0  ;;  %6342 = vmatmul.mubr.msk.f32.gmra.mrb[2].mxu1 %vm875_vm3, %v537_v63 }
  0xfd   : > { %6344 = vmatprep.mubr.msk.f32.mxu1 %vm8190_vm0, %v10587_v1 }
  0xff   : > { %v542_v6 = vpop.f32.mrb[4].mxu0 }
 0x100   : > { %v6210_v8 = vpop.f32.mrb[5].mxu0  ;;  %6345 = vmatmul.mubr.msk.f32.gmra.mrb[4].mxu1 %vm875_vm3, %v542_v6 }
 0x101   : > { %6347 = vmatprep.mubr.msk.f32.mxu1 %vm8190_vm0, %v10587_v1 }
 0x103   : > { %v547_v9 = vpop.f32.mrb[6].mxu0 }
 0x104   : > { %v6213_v12 = vpop.f32.mrb[7].mxu0  ;;  %6348 = vmatmul.mubr.msk.f32.gmra.mrb[6].mxu1 %vm875_vm3, %v547_v9 }
 0x105   : > { %6350 = vmatprep.mubr.msk.f32.mxu1 %vm8190_vm0, %v10587_v1 }
 0x107   : > { %v552_v13 = vpop.f32.mrb[8].mxu0 }
 0x108   : > { %v6216_v14 = vpop.f32.mrb[9].mxu0  ;;  %6351 = vmatmul.mubr.msk.f32.gmra.mrb[8].mxu1 %vm875_vm3, %v552_v13 }
 0x109   : > { %6353 = vmatprep.mubr.msk.f32.mxu1 %vm8190_vm0, %v10587_v1 }
 0x10b   : > { %v557_v15 = vpop.f32.mrb[10].mxu0 }
 0x10c   : > { %v6219_v16 = vpop.f32.mrb[11].mxu0  ;;  %6354 = vmatmul.mubr.msk.f32.gmra.mrb[10].mxu1 %vm875_vm3, %v557_v15 }
 0x10d   : > { %6356 = vmatprep.mubr.msk.f32.mxu1 %vm8190_vm0, %v10587_v1 }
 0x10f   : > { %v562_v17 = vpop.f32.mrb[12].mxu0 }
 0x110   : > { %v6222_v18 = vpop.f32.mrb[13].mxu0  ;;  %6357 = vmatmul.mubr.msk.f32.gmra.mrb[12].mxu1 %vm875_vm3, %v562_v17 }
 0x111   : > { %6359 = vmatprep.mubr.msk.f32.mxu1 %vm8190_vm0, %v10587_v1 }
 0x113   : > { %v567_v19 = vpop.f32.mrb[14].mxu0 }
 0x114   : > { %v6225_v20 = vpop.f32.mrb[15].mxu0  ;;  %6360 = vmatmul.mubr.msk.f32.gmra.mrb[14].mxu1 %vm875_vm3, %v567_v19 }
 0x115   : > { %6362 = vmatprep.mubr.msk.f32.mxu1 %vm8190_vm0, %v10587_v1 }
 0x117   : > { %v572_v22 = vpop.f32.mrb[16].mxu0 }
 0x118   : > { %v6228_v24 = vpop.f32.mrb[17].mxu0  ;;  %6363 = vmatmul.mubr.msk.f32.gmra.mrb[16].mxu1 %vm875_vm3, %v572_v22 }
 0x119   : > { %6365 = vmatprep.mubr.msk.f32.mxu1 %vm8190_vm0, %v10587_v1 }
 0x11b   : > { %v577_v26 = vpop.f32.mrb[18].mxu0 }
 0x11c   : > { %v6231_v61 = vpop.f32.mrb[19].mxu0  ;;  %6366 = vmatmul.mubr.msk.f32.gmra.mrb[18].mxu1 %vm875_vm3, %v577_v26 }
 0x11d   : > { %6368 = vmatprep.mubr.msk.f32.mxu1 %vm8190_vm0, %v10587_v1 }
 0x11f   : > { %v582_v62 = vpop.f32.mrb[20].mxu0 }
 0x120   : > { %v6234_v63 = vpop.f32.mrb[21].mxu0  ;;  %6369 = vmatmul.mubr.msk.f32.gmra.mrb[20].mxu1 %vm875_vm3, %v582_v62 }
 0x121   : > { %6371 = vmatprep.mubr.msk.f32.mxu1 %vm8190_vm0, %v10587_v1 }
 0x123   : > { %v587_v2 = vpop.f32.mrb[22].mxu0 }
 0x124   : > { %v6237_v6 = vpop.f32.mrb[23].mxu0  ;;  %6372 = vmatmul.mubr.msk.f32.gmra.mrb[22].mxu1 %vm875_vm3, %v587_v2 }
 0x125   : > { %6374 = vmatprep.mubr.msk.f32.mxu1 %vm8190_vm0, %v10587_v1  ;;  %v1148_v6 = vld [vmem:[%s10582_s7] sm:$0xff] }
 0x127   : > { %v592_v8 = vpop.f32.mrb[24].mxu0 }
 0x128   : > { %v6240_v9 = vpop.f32.mrb[25].mxu0  ;;  %6375 = vmatmul.mubr.msk.f32.gmra.mrb[24].mxu1 %vm875_vm3, %v592_v8  ;;  %v1149_v8 = vld [vmem:[%s10582_s7 + $0x8] sm:$0xff] }
 0x129   : > { %6377 = vmatprep.mubr.msk.f32.mxu1 %vm8190_vm0, %v10587_v1  ;;  %v7559_v9 = vpack.c.bf16 %v1149_v8, %v1148_v6 }
 0x12b   : > { %v597_v12 = vpop.f32.mrb[26].mxu0  ;;  %7560 = vmatpush3.bf16.msra.mxu0 %v7559_v9 }
 0x12c   : > { %v6243_v13 = vpop.f32.mrb[27].mxu0  ;;  %6378 = vmatmul.mubr.msk.f32.gmra.mrb[26].mxu1 %vm875_vm3, %v597_v12  ;;  %7561 = vmatprep.subr.bf16.mxu0 %v10585_v0  ;;  %v1150_v12 = vld [vmem:[%s10582_s7 + $0x10] sm:$0xff] }
 0x12d   : > { %6380 = vmatprep.mubr.msk.f32.mxu1 %vm8190_vm0, %v10587_v1  ;;  %v1151_v13 = vld [vmem:[%s10582_s7 + $0x18] sm:$0xff] }
 0x12f   : > { %v602_v14 = vpop.f32.mrb[28].mxu0 }
 0x130   : > { %v6246_v15 = vpop.f32.mrb[29].mxu0  ;;  %6381 = vmatmul.mubr.msk.f32.gmra.mrb[28].mxu1 %vm875_vm3, %v602_v14  ;;  %v7562_v14 = vpack.c.bf16 %v1151_v13, %v1150_v12 }
 0x131   : > { %6383 = vmatprep.mubr.msk.f32.mxu1 %vm8190_vm0, %v10587_v1 }
 0x132   : > { %7563 = vmatpush3.bf16.msra.mxu0 %v7562_v14 }
 0x133   : > { %v607_v16 = vpop.f32.mrb[30].mxu0  ;;  %7564 = vmatprep.subr.bf16.mxu0 %v10585_v0 }
 0x134   : > { %v6249_v17 = vpop.f32.mrb[31].mxu0  ;;  %6384 = vmatmul.mubr.msk.f32.gmra.mrb[30].mxu1 %vm875_vm3, %v607_v16 }
 0x135   : > { %6386 = vmatprep.mubr.msk.f32.mxu1 %vm8190_vm0, %v10587_v1 }
 0x137   : > { %v612_v18 = vpop.f32.mrb[32].mxu0 }
 0x138   : > { %v6252_v19 = vpop.f32.mrb[33].mxu0  ;;  %6387 = vmatmul.mubr.msk.f32.gmra.mrb[32].mxu1 %vm875_vm3, %v612_v18 }
 0x139   : > { %6389 = vmatprep.mubr.msk.f32.mxu1 %vm8190_vm0, %v10587_v1 }
 0x13b   : > { %v617_v20 = vpop.f32.mrb[34].mxu0 }
 0x13c   : > { %v6255_v22 = vpop.f32.mrb[35].mxu0  ;;  %6390 = vmatmul.mubr.msk.f32.gmra.mrb[34].mxu1 %vm875_vm3, %v617_v20 }
 0x13d   : > { %6392 = vmatprep.mubr.msk.f32.mxu1 %vm8190_vm0, %v10587_v1 }
 0x13f   : > { %v622_v24 = vpop.f32.mrb[36].mxu0 }
 0x140   : > { %v6258_v26 = vpop.f32.mrb[37].mxu0  ;;  %6393 = vmatmul.mubr.msk.f32.gmra.mrb[36].mxu1 %vm875_vm3, %v622_v24 }
 0x141   : > { %6395 = vmatprep.mubr.msk.f32.mxu1 %vm8190_vm0, %v10587_v1 }
 0x143   : > { %v627_v61 = vpop.f32.mrb[38].mxu0 }
 0x144   : > { %v6261_v62 = vpop.f32.mrb[39].mxu0  ;;  %6396 = vmatmul.mubr.msk.f32.gmra.mrb[38].mxu1 %vm875_vm3, %v627_v61 }
 0x145   : > { %6398 = vmatprep.mubr.msk.f32.mxu1 %vm8190_vm0, %v10587_v1 }
 0x147   : > { %v632_v63 = vpop.f32.mrb[40].mxu0 }
 0x148   : > { %v6264_v2 = vpop.f32.mrb[41].mxu0  ;;  %6399 = vmatmul.mubr.msk.f32.gmra.mrb[40].mxu1 %vm875_vm3, %v632_v63 }
 0x149   : > { %6500 = vmatprep.mubr.msk.f32.mxu1 %vm8190_vm0, %v10587_v1 }
 0x1cb   : > { %v1005_v15 = vpop.f32.mrb[0].mxu1 }
 0x1cc   : > { %v6340_v16 = vpop.f32.mrb[1].mxu1 }
 0x1cf   : > { %v1010_v17 = vpop.f32.mrb[2].mxu1 }
 0x1d0   : > { %v6343_v18 = vpop.f32.mrb[3].mxu1 }
 0x1d3   : > { %v1015_v19 = vpop.f32.mrb[4].mxu1 }
 0x1d4   : > { %v6346_v20 = vpop.f32.mrb[5].mxu1 }
 0x1d7   : > { %v1020_v22 = vpop.f32.mrb[6].mxu1 }
 0x1d8   : > { %v6349_v24 = vpop.f32.mrb[7].mxu1 }
 0x1db   : > { %v1025_v26 = vpop.f32.mrb[8].mxu1 }
 0x1dc   : > { %v6352_v61 = vpop.f32.mrb[9].mxu1 }
 0x1df   : > { %v8717_v62 = vpop.f32.mrb[10].mxu1 }
 0x1e0   : > { %v6355_v63 = vpop.f32.mrb[11].mxu1 }
 0x1e3   : > { %v8719_v2 = vpop.f32.mrb[12].mxu1 }
 0x1e4   : > { %v6358_v6 = vpop.f32.mrb[13].mxu1 }
 0x1e7   : > { %v1040_v8 = vpop.f32.mrb[14].mxu1 }
 0x1e8   : > { %v1109_v9 = vmax.f32 %v1005_v15, %v1040_v8  ;;  %v6361_v12 = vpop.f32.mrb[15].mxu1 }
 0x1eb   : > { %v1045_v13 = vpop.f32.mrb[16].mxu1 }
 0x1ec   : > { %v1110_v14 = vmax.f32 %v1010_v17, %v1045_v13  ;;  %v6364_v16 = vpop.f32.mrb[17].mxu1 }
 0x1ef   : > { %v1050_v0 = vpop.f32.mrb[18].mxu1 }
 0x1f0   : > { %v1111_v18 = vmax.f32 %v1015_v19, %v1050_v0  ;;  %v6367_v1 = vpop.f32.mrb[19].mxu1  ;;  %v5309_v0 = vld [vmem:[%s10580_s5] ss:$0 sm:$0xff] }
 0x1f3   : > { %v1055_v20 = vpop.f32.mrb[20].mxu1 }
 0x1f4   : > { %v1112_v56 = vmax.f32 %v1020_v22, %v1055_v20  ;;  %v6370_v24 = vpop.f32.mrb[21].mxu1 }
 0x1f7   : > { %v1060_v54 = vpop.f32.mrb[22].mxu1 }
 0x1f8   : > { %v1113_v61 = vmax.f32 %v1025_v26, %v1060_v54  ;;  %v6373_v52 = vpop.f32.mrb[23].mxu1 }
 0x1fb   : > { %v1065_v50 = vpop.f32.mrb[24].mxu1 }
 0x1fc   : > { %v1114_v63 = vmax.f32 %v8717_v62, %v1065_v50  ;;  %v6376_v48 = vpop.f32.mrb[25].mxu1  ;;  %v1144_v62 = vld [vmem:[%s10581_s6] sm:$0xff] }
 0x1ff   : > { %v1070_v6 = vpop.f32.mrb[26].mxu1 }
 0x200   : > { %v1115_v15 = vmax.f32 %v8719_v2, %v1070_v6  ;;  %v6379_v8 = vpop.f32.mrb[27].mxu1  ;;  %v1145_v2 = vld [vmem:[%s10581_s6 + $0x8] sm:$0xff]  ;;  %v1146_v6 = vld [vmem:[%s10581_s6 + $0x10] sm:$0xff] }
 0x203   : > { %v1075_v12 = vpop.f32.mrb[28].mxu1 }
 0x204   : > { %v1116_v1 = vmax.f32 %v1109_v9, %v1075_v12  ;;  %v6382_v17 = vpop.f32.mrb[29].mxu1 }
 0x206   : > { %v1130_v19 = vadd.f32 %v5309_v0, %v1116_v1 }
 0x207   : > { %v1080_v22 = vpop.f32.mrb[30].mxu1 }
 0x208   : > { %7909 = vtanh.f32 %v1130_v19  ;;  %v1117_v54 = vmax.f32 %v1110_v14, %v1080_v22  ;;  %v6385_v52 = vpop.f32.mrb[31].mxu1  ;;  %v7565_v14 = vpack.c.bf16 %v1145_v2, %v1144_v62  ;;  %v10606_v22 = vmov 0.0  }
 0x20a   : > { %v1131_v26 = vadd.f32 %v5309_v0, %v1117_v54  ;;  %v10607_v54 = vmov 0.0|0.0  }
 0x20b   : > { %v1085_v13 = vpop.f32.mrb[32].mxu1 }
 0x20c   : > { %7911 = vtanh.f32 %v1131_v26  ;;  %v1118_v48 = vmax.f32 %v1111_v18, %v1085_v13  ;;  %v6388_v50 = vpop.f32.mrb[33].mxu1  ;;  %v1147_v18 = vld [vmem:[%s10581_s6 + $0x18] sm:$0xff] }
 0x20e   : > { %v1132_v9 = vadd.f32 %v5309_v0, %v1118_v48 }
 0x20f   : > { %v1090_v16 = vpop.f32.mrb[34].mxu1 }
 0x210   : > { %7913 = vtanh.f32 %v1132_v9  ;;  %v1119_v20 = vmax.f32 %v1112_v56, %v1090_v16  ;;  %v6391_v24 = vpop.f32.mrb[35].mxu1  ;;  %v7568_v56 = vpack.c.bf16 %v1147_v18, %v1146_v6 }
 0x212   : > { %v7910_v8 = vpop.eup %7909  ;;  %v1133_v12 = vadd.f32 %v5309_v0, %v1119_v20 }
 0x213   : > { %v1095_v1 = vpop.f32.mrb[36].mxu1  ;;  %6410 = vmatmul.mubr.msk.f32.vlgmr.msra.gmra.mrb[42].mxu0 %vm875_vm3, %v7910_v8 }
 0x214   : > { %7915 = vtanh.f32 %v1133_v12  ;;  %v1120_v17 = vmax.f32 %v1113_v61, %v1095_v1  ;;  %v6394_v19 = vpop.f32.mrb[37].mxu1  ;;  %6412 = vmatprep.mubr.msk.f32.mxu0 %vm8190_vm0, %v10606_v22  ;;  %7566 = vmatpush3.bf16.msra.mxu0 %v7565_v14 }
 0x215   : > { %7567 = vmatprep.subr.bf16.mxu0 %v10607_v54 }
 0x216   : > { %v7912_v52 = vpop.eup %7911  ;;  %v1134_v26 = vadd.f32 %v5309_v0, %v1120_v17 }
 0x217   : > { %v1100_v13 = vpop.f32.mrb[38].mxu1  ;;  %6413 = vmatmul.mubr.msk.f32.gmra.mrb[44].mxu0 %vm875_vm3, %v7912_v52 }
 0x218   : > { %7917 = vtanh.f32 %v1134_v26  ;;  %v1121_v48 = vmax.f32 %v1114_v63, %v1100_v13  ;;  %v6397_v50 = vpop.f32.mrb[39].mxu1  ;;  %6415 = vmatprep.mubr.msk.f32.mxu0 %vm8190_vm0, %v10606_v22  ;;  %7569 = vmatpush3.bf16.msra.mxu0 %v7568_v56 }
 0x219   : > { %7570 = vmatprep.subr.bf16.mxu0 %v10607_v54 }
 0x21a   : > { %v7914_v61 = vpop.eup %7913  ;;  %v1135_v62 = vadd.f32 %v5309_v0, %v1121_v48 }
 0x21b   : > { %v1105_v2 = vpop.f32.mrb[40].mxu1  ;;  %6416 = vmatmul.mubr.msk.f32.gmra.mrb[46].mxu0 %vm875_vm3, %v7914_v61 }
 0x21c   : > { %7919 = vtanh.f32 %v1135_v62  ;;  %v1122_v9 = vmax.f32 %v1115_v15, %v1105_v2  ;;  %v6400_v16 = vpop.f32.mrb[41].mxu1  ;;  %6418 = vmatprep.mubr.msk.f32.mxu0 %vm8190_vm0, %v10606_v22 }
 0x21e   : > { %v7916_v20 = vpop.eup %7915  ;;  %v1136_v63 = vadd.f32 %v5309_v0, %v1122_v9 }
 0x21f   : > { %6419 = vmatmul.mubr.msk.f32.gmra.mrb[48].mxu0 %vm875_vm3, %v7916_v20 }
 0x220   : > { %7921 = vtanh.f32 %v1136_v63  ;;  %6421 = vmatprep.mubr.msk.f32.mxu0 %vm8190_vm0, %v10606_v22 }
 0x222   : > { %v7918_v24 = vpop.eup %7917 }
 0x223   : > { %6422 = vmatmul.mubr.msk.f32.gmra.mrb[50].mxu0 %vm875_vm3, %v7918_v24 }
 0x224   : > { %6424 = vmatprep.mubr.msk.f32.mxu0 %vm8190_vm0, %v10606_v22 }
 0x226   : > { %v7920_v14 = vpop.eup %7919 }
 0x227   : > { %6425 = vmatmul.mubr.msk.f32.gmra.mrb[52].mxu0 %vm875_vm3, %v7920_v14 }
 0x228   : > { %6427 = vmatprep.mubr.msk.f32.mxu0 %vm8190_vm0, %v10606_v22 }
 0x22a   : > { %v7922_v15 = vpop.eup %7921 }
 0x22b   : > { %6428 = vmatmul.mubr.msk.f32.gmra.mrb[54].mxu0 %vm875_vm3, %v7922_v15 }
 0x22c   : > { %6438 = vmatprep.mubr.msk.f32.mxu0 %vm8190_vm0, %v10606_v22 }
 0x22f   : > { %6439 = vmatmul.mubr.msk.f32.vlgmr.msra.gmra.mrb[56].mxu0 %vm875_vm3, %v8276_v3 }
 0x230   : > { %6441 = vmatprep.mubr.msk.f32.mxu0 %vm8190_vm0, %v10606_v22 }
 0x233   : > { %6442 = vmatmul.mubr.msk.f32.gmra.mrb[58].mxu0 %vm875_vm3, %v8279_v4 }
 0x234   : > { %6444 = vmatprep.mubr.msk.f32.mxu0 %vm8190_vm0, %v10606_v22 }
 0x237   : > { %6445 = vmatmul.mubr.msk.f32.gmra.mrb[60].mxu0 %vm875_vm3, %v8282_v5 }
 0x238   : > { %6447 = vmatprep.mubr.msk.f32.mxu0 %vm8190_vm0, %v10606_v22 }
 0x23b   : > { %6448 = vmatmul.mubr.msk.f32.gmra.mrb[62].mxu0 %vm875_vm3, %v8287_v7 }
 0x23c   : > { %6450 = vmatprep.mubr.msk.f32.mxu0 %vm8190_vm0, %v10606_v22 }
 0x23f   : > { %6451 = vmatmul.mubr.msk.f32.gmra.mrb[64].mxu0 %vm875_vm3, %v8294_v10 }
 0x240   : > { %6453 = vmatprep.mubr.msk.f32.mxu0 %vm8190_vm0, %v10606_v22 }
 0x243   : > { %6454 = vmatmul.mubr.msk.f32.gmra.mrb[66].mxu0 %vm875_vm3, %v8299_v11 }
 0x244   : > { %6456 = vmatprep.mubr.msk.f32.mxu0 %vm8190_vm0, %v10606_v22 }
 0x247   : > { %6457 = vmatmul.mubr.msk.f32.gmra.mrb[68].mxu0 %vm875_vm3, %v8327_v21  ;;  %v5324_v21 = vld [vmem:[%s10583_s8] ss:$0 sm:$0xff] }
 0x248   : > { %6473 = vmatprep.mubr.msk.f32.mxu0 %vm8190_vm0, %v10606_v22 }
 0x2e6   : > { %v1239_v3 = vpop.f32.mrb[42].mxu0 }
 0x2e7   : > { %v6411_v4 = vpop.f32.mrb[43].mxu0 }
 0x2ea   : > { %v1244_v5 = vpop.f32.mrb[44].mxu0 }
 0x2eb   : > { %v6414_v7 = vpop.f32.mrb[45].mxu0 }
 0x2ee   : > { %v1249_v10 = vpop.f32.mrb[46].mxu0 }
 0x2ef   : > { %v6417_v0 = vpop.f32.mrb[47].mxu0 }
 0x2f2   : > { %v1254_v6 = vpop.f32.mrb[48].mxu0 }
 0x2f3   : > { %v6420_v18 = vpop.f32.mrb[49].mxu0 }
 0x2f6   : > { %v1259_v8 = vpop.f32.mrb[50].mxu0 }
 0x2f7   : > { %v6423_v12 = vpop.f32.mrb[51].mxu0 }
 0x2fa   : > { %v1264_v11 = vpop.f32.mrb[52].mxu0 }
 0x2fb   : > { %v6426_v1 = vpop.f32.mrb[53].mxu0 }
 0x2fe   : > { %v1269_v17 = vpop.f32.mrb[54].mxu0 }
 0x2ff   : > { %v6429_v19 = vpop.f32.mrb[55].mxu0 }
 0x302   : > { %v1360_v56 = vpop.f32.mrb[56].mxu0 }
 0x303   : > { %v1361_v52 = vadd.f32 %v1360_v56, %v1239_v3  ;;  %v6440_v26 = vpop.f32.mrb[57].mxu0 }
 0x305   : > { %v1401_v13 = vadd.f32 %v5324_v21, %v1361_v52 }
 0x306   : > { %v1365_v48 = vpop.f32.mrb[58].mxu0 }
 0x307   : > { %7923 = vtanh.f32 %v1401_v13  ;;  %v1366_v50 = vadd.f32 %v1365_v48, %v1244_v5  ;;  %v6443_v61 = vpop.f32.mrb[59].mxu0 }
 0x309   : > { %v1402_v62 = vadd.f32 %v5324_v21, %v1366_v50 }
 0x30a   : > { %v1370_v2 = vpop.f32.mrb[60].mxu0 }
 0x30b   : > { %7925 = vtanh.f32 %v1402_v62  ;;  %v1371_v9 = vadd.f32 %v1370_v2, %v1249_v10  ;;  %v6446_v16 = vpop.f32.mrb[61].mxu0 }
 0x30d   : > { %v1403_v20 = vadd.f32 %v5324_v21, %v1371_v9 }
 0x30e   : > { %v1375_v63 = vpop.f32.mrb[62].mxu0 }
 0x30f   : > { %7927 = vtanh.f32 %v1403_v20  ;;  %v1376_v24 = vadd.f32 %v1375_v63, %v1254_v6  ;;  %v6449_v14 = vpop.f32.mrb[63].mxu0 }
 0x311   : > { %v7924_v15 = vpop.eup %7923  ;;  %v1404_v4 = vadd.f32 %v5324_v21, %v1376_v24 }
 0x312   : > { %v1380_v7 = vpop.f32.mrb[64].mxu0  ;;  %v1415_v3 = vmul.f32 %v7924_v15, %v7924_v15 }
 0x313   : > { %7929 = vtanh.f32 %v1404_v4  ;;  %v1381_v0 = vadd.f32 %v1380_v7, %v1259_v8  ;;  %v6452_v18 = vpop.f32.mrb[65].mxu0 }
 0x314   : > { %v1422_v5 = vsel %vm875_vm3, %v1415_v3, 0.0 }
 0x315   : > { %v7926_v12 = vpop.eup %7925  ;;  %v1405_v1 = vadd.f32 %v5324_v21, %v1381_v0  ;;  %1423 = vadd.xlane.f32.xlu0 %v1422_v5 }
 0x316   : > { %v1385_v19 = vpop.f32.mrb[66].mxu0  ;;  %v1416_v10 = vmul.f32 %v7926_v12, %v7926_v12 }
 0x317   : > { %7931 = vtanh.f32 %v1405_v1  ;;  %v1386_v56 = vadd.f32 %v1385_v19, %v1264_v11  ;;  %v6455_v52 = vpop.f32.mrb[67].mxu0 }
 0x318   : > { %v1425_v6 = vsel %vm875_vm3, %v1416_v10, 0.0 }
 0x319   : > { %v7928_v26 = vpop.eup %7927  ;;  %v1406_v13 = vadd.f32 %v5324_v21, %v1386_v56  ;;  %1426 = vadd.xlane.f32.xlu0 %v1425_v6 }
 0x31a   : > { %v1390_v48 = vpop.f32.mrb[68].mxu0  ;;  %v1417_v50 = vmul.f32 %v7928_v26, %v7928_v26 }
 0x31b   : > { %7933 = vtanh.f32 %v1406_v13  ;;  %v1391_v8 = vadd.f32 %v1390_v48, %v1269_v17  ;;  %v6458_v61 = vpop.f32.mrb[69].mxu0 }
 0x31c   : > { %v1428_v62 = vsel %vm875_vm3, %v1417_v50, 0.0 }
 0x31d   : > { %v7930_v2 = vpop.eup %7929  ;;  %v1407_v9 = vadd.f32 %v5324_v21, %v1391_v8  ;;  %1429 = vadd.xlane.f32.xlu1 %v1428_v62 }
 0x31e   : > { %v1418_v16 = vmul.f32 %v7930_v2, %v7930_v2 }
 0x31f   : > { %7935 = vtanh.f32 %v1407_v9 }
 0x320   : > { %v1431_v11 = vsel %vm875_vm3, %v1418_v16, 0.0 }
 0x321   : > { %v7932_v20 = vpop.eup %7931  ;;  %1432 = vadd.xlane.f32.xlu1 %v1431_v11 }
 0x322   : > { %v1419_v63 = vmul.f32 %v7932_v20, %v7932_v20 }
 0x324   : > { %v1434_v24 = vsel %vm875_vm3, %v1419_v63, 0.0 }
 0x325   : > { %v7934_v14 = vpop.eup %7933  ;;  %1435 = vadd.xlane.f32.xlu0 %v1434_v24 }
 0x326   : > { %v1420_v4 = vmul.f32 %v7934_v14, %v7934_v14 }
 0x328   : > { %v1437_v17 = vsel %vm875_vm3, %v1420_v4, 0.0 }
 0x329   : > { %v7936_v7 = vpop.eup %7935  ;;  %1438 = vadd.xlane.f32.xlu1 %v1437_v17 }
 0x32a   : > { %v1421_v3 = vmul.f32 %v7936_v7, %v7936_v7 }
 0x32c   : > { %v1440_v21 = vsel %vm875_vm3, %v1421_v3, 0.0 }
 0x32d   : > { %1441 = vadd.xlane.f32.xlu0 %v1440_v21 }
 0x3a2   : > { %v1424_v0 = vpop.xlane.xlu0 %1423 }
 0x3a3   : > { %v1443_v18 = vadd.f32 1e-12, %v1424_v0 }
 0x3a5   : > { %7937 = vrsqrt.f32 %v1443_v18 }
 0x3a6   : > { %v1427_v5 = vpop.xlane.xlu0 %1426 }
 0x3a7   : > { %v1444_v1 = vadd.f32 1e-12, %v1427_v5 }
 0x3a9   : > { %7939 = vrsqrt.f32 %v1444_v1 }
 0x3aa   : > { %v1430_v19 = vpop.xlane.xlu1 %1429 }
 0x3ab   : > { %v1445_v10 = vadd.f32 1e-12, %v1430_v19 }
 0x3ad   : > { %7941 = vrsqrt.f32 %v1445_v10 }
 0x3ae   : > { %v1433_v56 = vpop.xlane.xlu1 %1432 }
 0x3af   : > { %v1446_v52 = vadd.f32 1e-12, %v1433_v56  ;;  %v7938_v6 = vpop.eup %7937 }
 0x3b0   : > { %v8799_v8 = vmul.f32 %v7938_v6, %v7924_v15 }
 0x3b1   : > { %7943 = vrsqrt.f32 %v1446_v52 }
 0x3b2   : > { %v1436_v13 = vpop.xlane.xlu0 %1435 }
 0x3b3   : > { %v7940_v48 = vpop.eup %7939  ;;  %v1447_v50 = vadd.f32 1e-12, %v1436_v13 }
 0x3b4   : > { %v8801_v61 = vmul.f32 %v7940_v48, %v7926_v12 }
 0x3b5   : > { %7945 = vrsqrt.f32 %v1447_v50 }
 0x3b6   : > { %v1439_v62 = vpop.xlane.xlu1 %1438  ;;  %v7571_v9 = vpack.c.bf16 %v8801_v61, %v8799_v8 }
 0x3b7   : > { %v1448_v16 = vadd.f32 1e-12, %v1439_v62  ;;  %v7942_v11 = vpop.eup %7941 }
 0x3b8   : > { %7572 = vmatpush3.bf16.msra.mxu0 %v7571_v9  ;;  %7682 = vmatpush3.bf16.msra.mxu1 %v7571_v9  ;;  %v8807_v4 = vmul.f32 %v7942_v11, %v7928_v26 }
 0x3b9   : > { %7947 = vrsqrt.f32 %v1448_v16  ;;  %7573 = vmatprep.subr.bf16.mxu0 %v10607_v54  ;;  %7679 = vmatprep.subr.bf16.mxu1 %v10607_v54 }
 0x3ba   : > { %v1442_v63 = vpop.xlane.xlu0 %1441 }
 0x3bb   : > { %v7944_v24 = vpop.eup %7943  ;;  %v1449_v15 = vadd.f32 1e-12, %v1442_v63 }
 0x3bc   : > { %v8809_v12 = vmul.f32 %v7944_v24, %v7930_v2 }
 0x3bd   : > { %7949 = vrsqrt.f32 %v1449_v15 }
 0x3be   : > { %v7574_v17 = vpack.c.bf16 %v8809_v12, %v8807_v4 }
 0x3bf   : > { %v7946_v3 = vpop.eup %7945 }
 0x3c0   : > { %7575 = vmatpush3.bf16.msra.mxu0 %v7574_v17  ;;  %7683 = vmatpush3.bf16.msra.mxu1 %v7574_v17  ;;  %v8815_v0 = vmul.f32 %v7946_v3, %v7932_v20  ;;  %v5350_v20 = vld [vmem:[%s10579_s4 + $0x8] sm:$0xff] }
 0x3c1   : > { %7576 = vmatprep.subr.bf16.mxu0 %v10607_v54  ;;  %7680 = vmatprep.subr.bf16.mxu1 %v10607_v54 }
 0x3c3   : > { %v7948_v21 = vpop.eup %7947 }
 0x3c4   : > { %v8817_v18 = vmul.f32 %v7948_v21, %v7934_v14 }
 0x3c6   : > { %v7577_v26 = vpack.c.bf16 %v8817_v18, %v8815_v0 }
 0x3c7   : > { %v7950_v2 = vpop.eup %7949 }
 0x3c8   : > { %7578 = vmatpush3.bf16.msra.mxu0 %v7577_v26  ;;  %7684 = vmatpush3.bf16.msra.mxu1 %v7577_v26  ;;  %v8823_v5 = vmul.f32 %v7950_v2, %v7936_v7 }
 0x3c9   : > { %6471 = vmatprep.subr.mxu0 %v10606_v22  ;;  %7681 = vmatprep.subr.mxu1 %v10606_v22 }
 0x3cc   : > { %6472 = vmatpush3.msra.mxu0 %v8823_v5  ;;  %7685 = vmatpush3.msra.mxu1 %v8823_v5 }
 0x3cd   : > { %6474 = vmatmul.mubr.msk.f32.vlgmr.msra.gmra.mrb[70].mxu0 %vm402_vm2, %v8335_v23  ;;  %6501 = vmatmul.mubr.msk.f32.vlgmr.msra.gmra.mrb[42].mxu1 %vm402_vm2, %v8475_v41  ;;  %v5346_v23 = vld [vmem:[%s10578_s3 + $0x20] sm:$0xff]  ;;  %v8953_v41 = vld [vmem:[%s8263_s15 + $0x18] sm:$0xff] }
 0x3ce   : > { %6476 = vmatprep.mubr.msk.f32.mxu0 %vm8190_vm0, %v10606_v22  ;;  %6503 = vmatprep.mubr.msk.f32.mxu1 %vm8190_vm0, %v10606_v22 }
 0x3cf   : > { %6536 = vmatprep.subr.mxu1 %v10606_v22  ;;  %7585 = vmatprep.subr.bf16.mxu0 %v10607_v54 }
 0x3d0   : > { %6537 = vmatpush3.msra.mxu1 %v5350_v20 }
 0x3d1   : > { %6477 = vmatmul.mubr.msk.f32.gmra.mrb[72].mxu0 %vm402_vm2, %v8350_v25  ;;  %6504 = vmatmul.mubr.msk.f32.gmra.mrb[44].mxu1 %vm402_vm2, %v8491_v43  ;;  %v5347_v25 = vld [vmem:[%s10578_s3 + $0x28] sm:$0xff]  ;;  %v8960_v43 = vld [vmem:[%s8263_s15 + $0x20] sm:$0xff] }
 0x3d2   : > { %6479 = vmatprep.mubr.msk.f32.mxu0 %vm8190_vm0, %v10606_v22  ;;  %6506 = vmatprep.mubr.msk.f32.mxu1 %vm8190_vm0, %v10606_v22 }
 0x3d3   : > { %7579 = vmatprep.subr.bf16.mxu1 %v10607_v54 }
 0x3d5   : > { %6480 = vmatmul.mubr.msk.f32.gmra.mrb[74].mxu0 %vm402_vm2, %v8364_v27  ;;  %6507 = vmatmul.mubr.msk.f32.gmra.mrb[46].mxu1 %vm402_vm2, %v8507_v45  ;;  %v7580_v27 = vpack.c.bf16 %v5347_v25, %v5346_v23  ;;  %v8967_v45 = vld [vmem:[%s8263_s15 + $0x28] sm:$0xff] }
 0x3d6   : > { %6482 = vmatprep.mubr.msk.f32.mxu0 %vm8190_vm0, %v10606_v22  ;;  %6509 = vmatprep.mubr.msk.f32.mxu1 %vm8190_vm0, %v10606_v22 }
 0x3d9   : > { %6483 = vmatmul.mubr.msk.f32.gmra.mrb[76].mxu0 %vm402_vm2, %v8379_v29  ;;  %6510 = vmatmul.mubr.msk.f32.gmra.mrb[48].mxu1 %vm402_vm2, %v8523_v47  ;;  %v5348_v29 = vld [vmem:[%s10578_s3 + $0x30] sm:$0xff] }
 0x3da   : > { %6485 = vmatprep.mubr.msk.f32.mxu0 %vm8190_vm0, %v10606_v22  ;;  %6512 = vmatprep.mubr.msk.f32.mxu1 %vm8190_vm0, %v10606_v22 }
 0x3dd   : > { %6486 = vmatmul.mubr.msk.f32.gmra.mrb[78].mxu0 %vm402_vm2, %v8395_v31  ;;  %6513 = vmatmul.mubr.msk.f32.gmra.mrb[50].mxu1 %vm402_vm2, %v8539_v49  ;;  %v5349_v31 = vld [vmem:[%s10578_s3 + $0x38] sm:$0xff] }
 0x3de   : > { %6488 = vmatprep.mubr.msk.f32.mxu0 %vm8190_vm0, %v10606_v22  ;;  %6515 = vmatprep.mubr.msk.f32.mxu1 %vm8190_vm0, %v10606_v22 }
 0x3e1   : > { %6489 = vmatmul.mubr.msk.f32.gmra.mrb[80].mxu0 %vm402_vm2, %v8411_v33  ;;  %6516 = vmatmul.mubr.msk.f32.gmra.mrb[52].mxu1 %vm402_vm2, %v8555_v51  ;;  %v8930_v33 = vld [vmem:[%s8263_s15] sm:$0xff] }
 0x3e2   : > { %6491 = vmatprep.mubr.msk.f32.mxu0 %vm8190_vm0, %v10606_v22  ;;  %6518 = vmatprep.mubr.msk.f32.mxu1 %vm8190_vm0, %v10606_v22 }
 0x3e5   : > { %6492 = vmatmul.mubr.msk.f32.gmra.mrb[82].mxu0 %vm402_vm2, %v8427_v35  ;;  %6519 = vmatmul.mubr.msk.f32.gmra.mrb[54].mxu1 %vm402_vm2, %v8571_v53  ;;  %v7583_v35 = vpack.c.bf16 %v5349_v31, %v5348_v29  ;;  %v5399_v31 = vld [vmem:[%s10582_s7 + $0x20] sm:$0xff] }
 0x3e6   : > { %6494 = vmatprep.mubr.msk.f32.mxu0 %vm8190_vm0, %v10606_v22  ;;  %6521 = vmatprep.mubr.msk.f32.mxu1 %vm8190_vm0, %v10606_v22 }
 0x3e9   : > { %6495 = vmatmul.mubr.msk.f32.gmra.mrb[84].mxu0 %vm402_vm2, %v8443_v37  ;;  %6522 = vmatmul.mubr.msk.f32.gmra.mrb[56].mxu1 %vm402_vm2, %v8587_v55  ;;  %v8938_v37 = vld [vmem:[%s8263_s15 + $0x8] sm:$0xff] }
 0x3ea   : > { %6497 = vmatprep.mubr.msk.f32.mxu0 %vm8190_vm0, %v10606_v22  ;;  %6524 = vmatprep.mubr.msk.f32.mxu1 %vm8190_vm0, %v10606_v22 }
 0x3ed   : > { %6498 = vmatmul.mubr.msk.f32.gmra.mrb[86].mxu0 %vm402_vm2, %v8459_v39  ;;  %6525 = vmatmul.mubr.msk.f32.gmra.mrb[58].mxu1 %vm402_vm2, %v8603_v57  ;;  %v8946_v39 = vld [vmem:[%s8263_s15 + $0x10] sm:$0xff] }
 0x3ee   : > { %6527 = vmatprep.mubr.msk.f32.mxu1 %vm8190_vm0, %v10606_v22  ;;  %6680 = vmatprep.mubr.msk.f32.mxu0 %vm8190_vm0, %v10606_v22 }
 0x3f1   : > { %6528 = vmatmul.mubr.msk.f32.gmra.mrb[60].mxu1 %vm402_vm2, %v8616_v58 }
 0x3f2   : > { %6530 = vmatprep.mubr.msk.f32.mxu1 %vm8190_vm0, %v10606_v22 }
 0x3f5   : > { %6531 = vmatmul.mubr.msk.f32.gmra.mrb[62].mxu1 %vm402_vm2, %v8625_v59 }
 0x3f6   : > { %6533 = vmatprep.mubr.msk.f32.mxu1 %vm8190_vm0, %v10606_v22 }
 0x3f9   : > { %6534 = vmatmul.mubr.msk.f32.gmra.mrb[64].mxu1 %vm402_vm2, %v8634_v60 }
 0x3fa   : > { %6538 = vmatprep.mubr.msk.f32.mxu1 %vm8190_vm0, %v10606_v22 }
 0x3fd   : > { %6539 = vmatmul.mubr.msk.f32.vlgmr.msra.gmra.mrb[66].mxu1 %vm641_vm1, %v8930_v33 }
 0x3fe   : > { %6541 = vmatprep.mubr.msk.f32.mxu1 %vm8190_vm0, %v10606_v22  ;;  %7581 = vmatpush3.bf16.msra.mxu1 %v7580_v27 }
 0x3ff   : > { %7582 = vmatprep.subr.bf16.mxu1 %v10607_v54 }
 0x401   : > { %6542 = vmatmul.mubr.msk.f32.gmra.mrb[68].mxu1 %vm641_vm1, %v8938_v37 }
 0x402   : > { %6544 = vmatprep.mubr.msk.f32.mxu1 %vm8190_vm0, %v10606_v22  ;;  %7584 = vmatpush3.bf16.msra.mxu1 %v7583_v35  ;;  %v5400_v35 = vld [vmem:[%s10582_s7 + $0x28] sm:$0xff] }
 0x403   : > { %6807 = vmatprep.subr.mxu1 %v10606_v22 }
 0x405   : > { %6545 = vmatmul.mubr.msk.f32.gmra.mrb[70].mxu1 %vm641_vm1, %v8946_v39 }
 0x406   : > { %6547 = vmatprep.mubr.msk.f32.mxu1 %vm8190_vm0, %v10606_v22 }
 0x409   : > { %6548 = vmatmul.mubr.msk.f32.gmra.mrb[72].mxu1 %vm641_vm1, %v8953_v41 }
 0x40a   : > { %6550 = vmatprep.mubr.msk.f32.mxu1 %vm8190_vm0, %v10606_v22 }
 0x40d   : > { %6551 = vmatmul.mubr.msk.f32.gmra.mrb[74].mxu1 %vm641_vm1, %v8960_v43 }
 0x40e   : > { %6553 = vmatprep.mubr.msk.f32.mxu1 %vm8190_vm0, %v10606_v22 }
 0x411   : > { %6554 = vmatmul.mubr.msk.f32.gmra.mrb[76].mxu1 %vm641_vm1, %v8967_v45 }
 0x412   : > { %6556 = vmatprep.mubr.msk.f32.mxu1 %vm8190_vm0, %v10606_v22 }
 0x415   : > { %6557 = vmatmul.mubr.msk.f32.gmra.mrb[78].mxu1 %vm641_vm1, %v8372_v28  ;;  %v10608_v28 = vld [vmem:[#allocation2_spill] sm:$0xff] }
 0x416   : > { %6559 = vmatprep.mubr.msk.f32.mxu1 %vm8190_vm0, %v10606_v22 }
 0x419   : > { %6560 = vmatmul.mubr.msk.f32.gmra.mrb[80].mxu1 %vm641_vm1, %v8388_v30  ;;  %v10609_v30 = vld [vmem:[#allocation3_spill] sm:$0xff] }
 0x41a   : > { %6562 = vmatprep.mubr.msk.f32.mxu1 %vm8190_vm0, %v10606_v22 }
 0x41d   : > { %6563 = vmatmul.mubr.msk.f32.gmra.mrb[82].mxu1 %vm641_vm1, %v8404_v32  ;;  %v10610_v32 = vld [vmem:[#allocation4_spill] sm:$0xff] }
 0x41e   : > { %6565 = vmatprep.mubr.msk.f32.mxu1 %vm8190_vm0, %v10606_v22 }
 0x421   : > { %6566 = vmatmul.mubr.msk.f32.gmra.mrb[84].mxu1 %vm641_vm1, %v8420_v34  ;;  %v10611_v34 = vld [vmem:[#allocation5_spill] sm:$0xff] }
 0x422   : > { %6568 = vmatprep.mubr.msk.f32.mxu1 %vm8190_vm0, %v10606_v22 }
 0x425   : > { %6569 = vmatmul.mubr.msk.f32.gmra.mrb[86].mxu1 %vm641_vm1, %v8436_v36  ;;  %v10612_v36 = vld [vmem:[#allocation6_spill] sm:$0xff] }
 0x426   : > { %6571 = vmatprep.mubr.msk.f32.mxu1 %vm8190_vm0, %v10606_v22 }
 0x429   : > { %6572 = vmatmul.mubr.msk.f32.gmra.mrb[88].mxu1 %vm641_vm1, %v8452_v38 }
 0x42a   : > { %6574 = vmatprep.mubr.msk.f32.mxu1 %vm8190_vm0, %v10606_v22 }
 0x42d   : > { %6575 = vmatmul.mubr.msk.f32.gmra.mrb[90].mxu1 %vm641_vm1, %v8468_v40 }
 0x42e   : > { %6577 = vmatprep.mubr.msk.f32.mxu1 %vm8190_vm0, %v10606_v22 }
 0x431   : > { %6578 = vmatmul.mubr.msk.f32.gmra.mrb[92].mxu1 %vm641_vm1, %v8484_v42 }
 0x432   : > { %6580 = vmatprep.mubr.msk.f32.mxu1 %vm8190_vm0, %v10606_v22 }
 0x435   : > { %6581 = vmatmul.mubr.msk.f32.gmra.mrb[94].mxu1 %vm641_vm1, %v8500_v44 }
 0x436   : > { %6583 = vmatprep.mubr.msk.f32.mxu1 %vm8190_vm0, %v10606_v22 }
 0x439   : > { %6584 = vmatmul.mubr.msk.f32.gmra.mrb[96].mxu1 %vm641_vm1, %v8516_v46 }
 0x43a   : > { %6586 = vmatprep.mubr.msk.f32.mxu1 %vm8190_vm0, %v10606_v22 }
 0x43d   : > { %6587 = vmatmul.mubr.msk.f32.gmra.mrb[98].mxu1 %vm641_vm1, %v10608_v28  ;;  %v7586_v28 = vpack.c.bf16 %v5400_v35, %v5399_v31 }
 0x43e   : > { %6589 = vmatprep.mubr.msk.f32.mxu1 %vm8190_vm0, %v10606_v22 }
 0x43f   : > { %7587 = vmatpush3.bf16.msra.mxu0 %v7586_v28 }
 0x440   : > { %7588 = vmatprep.subr.bf16.mxu0 %v10607_v54 }
 0x441   : > { %6590 = vmatmul.mubr.msk.f32.gmra.mrb[100].mxu1 %vm641_vm1, %v10609_v30  ;;  %v5401_v30 = vld [vmem:[%s10582_s7 + $0x30] sm:$0xff] }
 0x442   : > { %6592 = vmatprep.mubr.msk.f32.mxu1 %vm8190_vm0, %v10606_v22 }
 0x445   : > { %6593 = vmatmul.mubr.msk.f32.gmra.mrb[102].mxu1 %vm641_vm1, %v10610_v32  ;;  %v5402_v32 = vld [vmem:[%s10582_s7 + $0x38] sm:$0xff] }
 0x446   : > { %6595 = vmatprep.mubr.msk.f32.mxu1 %vm8190_vm0, %v10606_v22 }
 0x449   : > { %6596 = vmatmul.mubr.msk.f32.gmra.mrb[104].mxu1 %vm641_vm1, %v10611_v34  ;;  %v7589_v34 = vpack.c.bf16 %v5402_v32, %v5401_v30  ;;  %v5395_v32 = vld [vmem:[%s10581_s6 + $0x20] sm:$0xff] }
 0x44a   : > { %6598 = vmatprep.mubr.msk.f32.mxu1 %vm8190_vm0, %v10606_v22 }
 0x44b   : > { %7590 = vmatpush3.bf16.msra.mxu0 %v7589_v34  ;;  %v5396_v34 = vld [vmem:[%s10581_s6 + $0x28] sm:$0xff] }
 0x44c   : > { %7591 = vmatprep.subr.bf16.mxu0 %v10607_v54 }
 0x44d   : > { %6599 = vmatmul.mubr.msk.f32.gmra.mrb[106].mxu1 %vm641_vm1, %v10612_v36 }
 0x44e   : > { %6609 = vmatprep.mubr.msk.f32.mxu1 %vm8190_vm0, %v10606_v22 }
 0x4a0   : > { %v1530_v38 = vpop.f32.mrb[70].mxu0  ;;  %v1575_v40 = vpop.f32.mrb[42].mxu1 }
 0x4a1   : > { %6610 = vmatmul.mubr.msk.f32.vlgmr.msra.gmra.mrb[66].mxu1 %vm875_vm3, %v1530_v38  ;;  %v6475_v42 = vpop.f32.mrb[71].mxu0  ;;  %v6502_v44 = vpop.f32.mrb[43].mxu1 }
 0x4a2   : > { %6612 = vmatprep.mubr.msk.f32.mxu1 %vm8190_vm0, %v10606_v22 }
 0x4a4   : > { %v1535_v46 = vpop.f32.mrb[72].mxu0  ;;  %v1580_v47 = vpop.f32.mrb[44].mxu1 }
 0x4a5   : > { %6613 = vmatmul.mubr.msk.f32.gmra.mrb[68].mxu1 %vm875_vm3, %v1535_v46  ;;  %v6478_v49 = vpop.f32.mrb[73].mxu0  ;;  %v6505_v51 = vpop.f32.mrb[45].mxu1 }
 0x4a6   : > { %6615 = vmatprep.mubr.msk.f32.mxu1 %vm8190_vm0, %v10606_v22 }
 0x4a8   : > { %v1540_v53 = vpop.f32.mrb[74].mxu0  ;;  %v1585_v55 = vpop.f32.mrb[46].mxu1 }
 0x4a9   : > { %6616 = vmatmul.mubr.msk.f32.gmra.mrb[70].mxu1 %vm875_vm3, %v1540_v53  ;;  %v6481_v57 = vpop.f32.mrb[75].mxu0  ;;  %v6508_v58 = vpop.f32.mrb[47].mxu1 }
 0x4aa   : > { %6618 = vmatprep.mubr.msk.f32.mxu1 %vm8190_vm0, %v10606_v22 }
 0x4ac   : > { %v1545_v59 = vpop.f32.mrb[76].mxu0  ;;  %v1590_v60 = vpop.f32.mrb[48].mxu1 }
 0x4ad   : > { %6619 = vmatmul.mubr.msk.f32.gmra.mrb[72].mxu1 %vm875_vm3, %v1545_v59  ;;  %v6484_v14 = vpop.f32.mrb[77].mxu0  ;;  %v6511_v7 = vpop.f32.mrb[49].mxu1 }
 0x4ae   : > { %6621 = vmatprep.mubr.msk.f32.mxu1 %vm8190_vm0, %v10606_v22 }
 0x4b0   : > { %v1550_v1 = vpop.f32.mrb[78].mxu0  ;;  %v1595_v19 = vpop.f32.mrb[50].mxu1 }
 0x4b1   : > { %6622 = vmatmul.mubr.msk.f32.gmra.mrb[74].mxu1 %vm875_vm3, %v1550_v1  ;;  %v6487_v10 = vpop.f32.mrb[79].mxu0  ;;  %v6514_v56 = vpop.f32.mrb[51].mxu1 }
 0x4b2   : > { %6624 = vmatprep.mubr.msk.f32.mxu1 %vm8190_vm0, %v10606_v22 }
 0x4b4   : > { %v1555_v52 = vpop.f32.mrb[80].mxu0  ;;  %v1600_v6 = vpop.f32.mrb[52].mxu1 }
 0x4b5   : > { %6625 = vmatmul.mubr.msk.f32.gmra.mrb[76].mxu1 %vm875_vm3, %v1555_v52  ;;  %v6490_v13 = vpop.f32.mrb[81].mxu0  ;;  %v6517_v48 = vpop.f32.mrb[53].mxu1 }
 0x4b6   : > { %6627 = vmatprep.mubr.msk.f32.mxu1 %vm8190_vm0, %v10606_v22 }
 0x4b8   : > { %v1560_v50 = vpop.f32.mrb[82].mxu0  ;;  %v1605_v62 = vpop.f32.mrb[54].mxu1 }
 0x4b9   : > { %6628 = vmatmul.mubr.msk.f32.gmra.mrb[78].mxu1 %vm875_vm3, %v1560_v50  ;;  %v6493_v9 = vpop.f32.mrb[83].mxu0  ;;  %v6520_v16 = vpop.f32.mrb[55].mxu1 }
 0x4ba   : > { %6630 = vmatprep.mubr.msk.f32.mxu1 %vm8190_vm0, %v10606_v22 }
 0x4bc   : > { %v1565_v11 = vpop.f32.mrb[84].mxu0  ;;  %v1610_v63 = vpop.f32.mrb[56].mxu1 }
 0x4bd   : > { %6631 = vmatmul.mubr.msk.f32.gmra.mrb[80].mxu1 %vm875_vm3, %v1565_v11  ;;  %v6496_v24 = vpop.f32.mrb[85].mxu0  ;;  %v6523_v15 = vpop.f32.mrb[57].mxu1 }
 0x4be   : > { %6633 = vmatprep.mubr.msk.f32.mxu1 %vm8190_vm0, %v10606_v22 }
 0x4c0   : > { %v1570_v17 = vpop.f32.mrb[86].mxu0  ;;  %v1615_v3 = vpop.f32.mrb[58].mxu1 }
 0x4c1   : > { %6634 = vmatmul.mubr.msk.f32.gmra.mrb[82].mxu1 %vm875_vm3, %v1570_v17  ;;  %v6499_v21 = vpop.f32.mrb[87].mxu0  ;;  %v6526_v26 = vpop.f32.mrb[59].mxu1 }
 0x4c2   : > { %6636 = vmatprep.mubr.msk.f32.mxu1 %vm8190_vm0, %v10606_v22  ;;  %v5394_v26 = vld [vmem:[%s10580_s5 + $0x1] ss:$0 sm:$0xff] }
 0x4c4   : > { %v1620_v2 = vpop.f32.mrb[60].mxu1 }
 0x4c5   : > { %6637 = vmatmul.mubr.msk.f32.gmra.mrb[84].mxu1 %vm875_vm3, %v1575_v40  ;;  %v6529_v20 = vpop.f32.mrb[61].mxu1 }
 0x4c6   : > { %6639 = vmatprep.mubr.msk.f32.mxu1 %vm8190_vm0, %v10606_v22 }
 0x4c8   : > { %v1625_v23 = vpop.f32.mrb[62].mxu1 }
 0x4c9   : > { %6640 = vmatmul.mubr.msk.f32.gmra.mrb[86].mxu1 %vm875_vm3, %v1580_v47  ;;  %v6532_v25 = vpop.f32.mrb[63].mxu1 }
 0x4ca   : > { %6642 = vmatprep.mubr.msk.f32.mxu1 %vm8190_vm0, %v10606_v22 }
 0x4cc   : > { %v1630_v27 = vpop.f32.mrb[64].mxu1 }
 0x4cd   : > { %6643 = vmatmul.mubr.msk.f32.gmra.mrb[88].mxu1 %vm875_vm3, %v1585_v55  ;;  %v6535_v29 = vpop.f32.mrb[65].mxu1 }
 0x4ce   : > { %6645 = vmatprep.mubr.msk.f32.mxu1 %vm8190_vm0, %v10606_v22 }
 0x4d1   : > { %6646 = vmatmul.mubr.msk.f32.gmra.mrb[90].mxu1 %vm875_vm3, %v1590_v60 }
 0x4d2   : > { %6648 = vmatprep.mubr.msk.f32.mxu1 %vm8190_vm0, %v10606_v22 }
 0x4d5   : > { %6649 = vmatmul.mubr.msk.f32.gmra.mrb[92].mxu1 %vm875_vm3, %v1595_v19 }
 0x4d6   : > { %6651 = vmatprep.mubr.msk.f32.mxu1 %vm8190_vm0, %v10606_v22 }
 0x4d9   : > { %6652 = vmatmul.mubr.msk.f32.gmra.mrb[94].mxu1 %vm875_vm3, %v1600_v6 }
 0x4da   : > { %6654 = vmatprep.mubr.msk.f32.mxu1 %vm8190_vm0, %v10606_v22 }
 0x4dd   : > { %6655 = vmatmul.mubr.msk.f32.gmra.mrb[96].mxu1 %vm875_vm3, %v1605_v62 }
 0x4de   : > { %6657 = vmatprep.mubr.msk.f32.mxu1 %vm8190_vm0, %v10606_v22 }
 0x4e1   : > { %6658 = vmatmul.mubr.msk.f32.gmra.mrb[98].mxu1 %vm875_vm3, %v1610_v63 }
 0x4e2   : > { %6660 = vmatprep.mubr.msk.f32.mxu1 %vm8190_vm0, %v10606_v22 }
 0x4e5   : > { %6661 = vmatmul.mubr.msk.f32.gmra.mrb[100].mxu1 %vm875_vm3, %v1615_v3 }
 0x4e6   : > { %6663 = vmatprep.mubr.msk.f32.mxu1 %vm8190_vm0, %v10606_v22 }
 0x4e9   : > { %6664 = vmatmul.mubr.msk.f32.gmra.mrb[102].mxu1 %vm875_vm3, %v1620_v2 }
 0x4ea   : > { %6666 = vmatprep.mubr.msk.f32.mxu1 %vm8190_vm0, %v10606_v22 }
 0x4ed   : > { %6667 = vmatmul.mubr.msk.f32.gmra.mrb[104].mxu1 %vm875_vm3, %v1625_v23 }
 0x4ee   : > { %6669 = vmatprep.mubr.msk.f32.mxu1 %vm8190_vm0, %v10606_v22 }
 0x4f1   : > { %6670 = vmatmul.mubr.msk.f32.gmra.mrb[106].mxu1 %vm875_vm3, %v1630_v27 }
 0x4f2   : > { %6809 = vmatprep.mubr.msk.f32.mxu1 %vm8190_vm0, %v10606_v22 }
 0x574   : > { %v1940_v36 = vpop.f32.mrb[66].mxu1 }
 0x575   : > { %v6611_v38 = vpop.f32.mrb[67].mxu1 }
 0x578   : > { %v1945_v40 = vpop.f32.mrb[68].mxu1 }
 0x579   : > { %v6614_v42 = vpop.f32.mrb[69].mxu1 }
 0x57c   : > { %v1950_v44 = vpop.f32.mrb[70].mxu1 }
 0x57d   : > { %v6617_v46 = vpop.f32.mrb[71].mxu1 }
 0x57e   : > { %v5397_v46 = vld [vmem:[%s10581_s6 + $0x30] sm:$0xff] }
 0x580   : > { %v1955_v47 = vpop.f32.mrb[72].mxu1 }
 0x581   : > { %v6620_v49 = vpop.f32.mrb[73].mxu1 }
 0x584   : > { %v1960_v51 = vpop.f32.mrb[74].mxu1 }
 0x585   : > { %v6623_v53 = vpop.f32.mrb[75].mxu1 }
 0x588   : > { %v9110_v55 = vpop.f32.mrb[76].mxu1 }
 0x589   : > { %v6626_v57 = vpop.f32.mrb[77].mxu1 }
 0x58c   : > { %v9112_v58 = vpop.f32.mrb[78].mxu1 }
 0x58d   : > { %v6629_v59 = vpop.f32.mrb[79].mxu1 }
 0x590   : > { %v1975_v60 = vpop.f32.mrb[80].mxu1 }
 0x591   : > { %v2044_v14 = vmax.f32 %v1940_v36, %v1975_v60  ;;  %v6632_v7 = vpop.f32.mrb[81].mxu1 }
 0x594   : > { %v1980_v1 = vpop.f32.mrb[82].mxu1 }
 0x595   : > { %v2045_v19 = vmax.f32 %v1945_v40, %v1980_v1  ;;  %v6635_v10 = vpop.f32.mrb[83].mxu1 }
 0x598   : > { %v1985_v56 = vpop.f32.mrb[84].mxu1 }
 0x599   : > { %v2046_v52 = vmax.f32 %v1950_v44, %v1985_v56  ;;  %v6638_v6 = vpop.f32.mrb[85].mxu1  ;;  %v7592_v44 = vpack.c.bf16 %v5396_v34, %v5395_v32 }
 0x59c   : > { %v1990_v13 = vpop.f32.mrb[86].mxu1 }
 0x59d   : > { %v2047_v48 = vmax.f32 %v1955_v47, %v1990_v13  ;;  %v6641_v50 = vpop.f32.mrb[87].mxu1  ;;  %v5398_v47 = vld [vmem:[%s10581_s6 + $0x38] sm:$0xff] }
 0x5a0   : > { %v1995_v62 = vpop.f32.mrb[88].mxu1 }
 0x5a1   : > { %v2048_v9 = vmax.f32 %v1960_v51, %v1995_v62  ;;  %v6644_v16 = vpop.f32.mrb[89].mxu1 }
 0x5a4   : > { %v2000_v11 = vpop.f32.mrb[90].mxu1 }
 0x5a5   : > { %v2049_v63 = vmax.f32 %v9110_v55, %v2000_v11  ;;  %v6647_v24 = vpop.f32.mrb[91].mxu1 }
 0x5a8   : > { %v2005_v15 = vpop.f32.mrb[92].mxu1 }
 0x5a9   : > { %v2050_v17 = vmax.f32 %v9112_v58, %v2005_v15  ;;  %v6650_v3 = vpop.f32.mrb[93].mxu1  ;;  %v7595_v58 = vpack.c.bf16 %v5398_v47, %v5397_v46 }
 0x5ac   : > { %v2010_v21 = vpop.f32.mrb[94].mxu1 }
 0x5ad   : > { %v2051_v2 = vmax.f32 %v2044_v14, %v2010_v21  ;;  %v6653_v20 = vpop.f32.mrb[95].mxu1 }
 0x5af   : > { %v2066_v23 = vadd.f32 %v5394_v26, %v2051_v2 }
 0x5b0   : > { %v2015_v25 = vpop.f32.mrb[96].mxu1 }
 0x5b1   : > { %7951 = vtanh.f32 %v2066_v23  ;;  %v2052_v27 = vmax.f32 %v2045_v19, %v2015_v25  ;;  %v6656_v29 = vpop.f32.mrb[97].mxu1 }
 0x5b3   : > { %v2067_v31 = vadd.f32 %v5394_v26, %v2052_v27 }
 0x5b4   : > { %v2020_v35 = vpop.f32.mrb[98].mxu1 }
 0x5b5   : > { %7953 = vtanh.f32 %v2067_v31  ;;  %v2053_v28 = vmax.f32 %v2046_v52, %v2020_v35  ;;  %v6659_v30 = vpop.f32.mrb[99].mxu1 }
 0x5b7   : > { %v2068_v36 = vadd.f32 %v5394_v26, %v2053_v28 }
 0x5b8   : > { %v2025_v38 = vpop.f32.mrb[100].mxu1 }
 0x5b9   : > { %7955 = vtanh.f32 %v2068_v36  ;;  %v2054_v40 = vmax.f32 %v2047_v48, %v2025_v38  ;;  %v6662_v42 = vpop.f32.mrb[101].mxu1 }
 0x5bb   : > { %v7952_v49 = vpop.eup %7951  ;;  %v2069_v51 = vadd.f32 %v5394_v26, %v2054_v40 }
 0x5bc   : > { %v2030_v53 = vpop.f32.mrb[102].mxu1  ;;  %6681 = vmatmul.mubr.msk.f32.vlgmr.msra.gmra.mrb[88].mxu0 %vm875_vm3, %v7952_v49 }
 0x5bd   : > { %7957 = vtanh.f32 %v2069_v51  ;;  %v2055_v55 = vmax.f32 %v2048_v9, %v2030_v53  ;;  %v6665_v57 = vpop.f32.mrb[103].mxu1  ;;  %6683 = vmatprep.mubr.msk.f32.mxu0 %vm8190_vm0, %v10606_v22  ;;  %7593 = vmatpush3.bf16.msra.mxu0 %v7592_v44 }
 0x5be   : > { %7594 = vmatprep.subr.bf16.mxu0 %v10607_v54 }
 0x5bf   : > { %v7954_v59 = vpop.eup %7953  ;;  %v2070_v60 = vadd.f32 %v5394_v26, %v2055_v55 }
 0x5c0   : > { %v2035_v14 = vpop.f32.mrb[104].mxu1  ;;  %6684 = vmatmul.mubr.msk.f32.gmra.mrb[90].mxu0 %vm875_vm3, %v7954_v59 }
 0x5c1   : > { %7959 = vtanh.f32 %v2070_v60  ;;  %v2056_v7 = vmax.f32 %v2049_v63, %v2035_v14  ;;  %v6668_v1 = vpop.f32.mrb[105].mxu1  ;;  %6686 = vmatprep.mubr.msk.f32.mxu0 %vm8190_vm0, %v10606_v22  ;;  %7596 = vmatpush3.bf16.msra.mxu0 %v7595_v58 }
 0x5c2   : > { %7597 = vmatprep.subr.bf16.mxu0 %v10607_v54 }
 0x5c3   : > { %v7956_v19 = vpop.eup %7955  ;;  %v2071_v10 = vadd.f32 %v5394_v26, %v2056_v7 }
 0x5c4   : > { %v2040_v56 = vpop.f32.mrb[106].mxu1  ;;  %6687 = vmatmul.mubr.msk.f32.gmra.mrb[92].mxu0 %vm875_vm3, %v7956_v19 }
 0x5c5   : > { %7961 = vtanh.f32 %v2071_v10  ;;  %v2057_v52 = vmax.f32 %v2050_v17, %v2040_v56  ;;  %v6671_v6 = vpop.f32.mrb[107].mxu1  ;;  %6689 = vmatprep.mubr.msk.f32.mxu0 %vm8190_vm0, %v10606_v22 }
 0x5c7   : > { %v7958_v13 = vpop.eup %7957  ;;  %v2072_v48 = vadd.f32 %v5394_v26, %v2057_v52 }
 0x5c8   : > { %6690 = vmatmul.mubr.msk.f32.gmra.mrb[94].mxu0 %vm875_vm3, %v7958_v13 }
 0x5c9   : > { %7963 = vtanh.f32 %v2072_v48  ;;  %6692 = vmatprep.mubr.msk.f32.mxu0 %vm8190_vm0, %v10606_v22 }
 0x5cb   : > { %v7960_v50 = vpop.eup %7959 }
 0x5cc   : > { %6693 = vmatmul.mubr.msk.f32.gmra.mrb[96].mxu0 %vm875_vm3, %v7960_v50 }
 0x5cd   : > { %6695 = vmatprep.mubr.msk.f32.mxu0 %vm8190_vm0, %v10606_v22 }
 0x5cf   : > { %v7962_v62 = vpop.eup %7961 }
 0x5d0   : > { %6696 = vmatmul.mubr.msk.f32.gmra.mrb[98].mxu0 %vm875_vm3, %v7962_v62 }
 0x5d1   : > { %6698 = vmatprep.mubr.msk.f32.mxu0 %vm8190_vm0, %v10606_v22 }
 0x5d3   : > { %v7964_v9 = vpop.eup %7963 }
 0x5d4   : > { %6699 = vmatmul.mubr.msk.f32.gmra.mrb[100].mxu0 %vm875_vm3, %v7964_v9 }
 0x5d5   : > { %6709 = vmatprep.mubr.msk.f32.mxu0 %vm8190_vm0, %v10606_v22 }
 0x5d8   : > { %6710 = vmatmul.mubr.msk.f32.vlgmr.msra.gmra.mrb[102].mxu0 %vm875_vm3, %v8799_v8 }
 0x5d9   : > { %6712 = vmatprep.mubr.msk.f32.mxu0 %vm8190_vm0, %v10606_v22 }
 0x5dc   : > { %6713 = vmatmul.mubr.msk.f32.gmra.mrb[104].mxu0 %vm875_vm3, %v8801_v61 }
 0x5dd   : > { %6715 = vmatprep.mubr.msk.f32.mxu0 %vm8190_vm0, %v10606_v22 }
 0x5e0   : > { %6716 = vmatmul.mubr.msk.f32.gmra.mrb[106].mxu0 %vm875_vm3, %v8807_v4 }
 0x5e1   : > { %6718 = vmatprep.mubr.msk.f32.mxu0 %vm8190_vm0, %v10606_v22 }
 0x5e4   : > { %6719 = vmatmul.mubr.msk.f32.gmra.mrb[108].mxu0 %vm875_vm3, %v8809_v12 }
 0x5e5   : > { %6721 = vmatprep.mubr.msk.f32.mxu0 %vm8190_vm0, %v10606_v22 }
 0x5e8   : > { %6722 = vmatmul.mubr.msk.f32.gmra.mrb[110].mxu0 %vm875_vm3, %v8815_v0 }
 0x5e9   : > { %6724 = vmatprep.mubr.msk.f32.mxu0 %vm8190_vm0, %v10606_v22 }
 0x5ec   : > { %6725 = vmatmul.mubr.msk.f32.gmra.mrb[112].mxu0 %vm875_vm3, %v8817_v18 }
 0x5ed   : > { %6727 = vmatprep.mubr.msk.f32.mxu0 %vm8190_vm0, %v10606_v22 }
 0x5f0   : > { %6728 = vmatmul.mubr.msk.f32.gmra.mrb[114].mxu0 %vm875_vm3, %v8823_v5  ;;  %v5418_v5 = vld [vmem:[%s10583_s8 + $0x1] ss:$0 sm:$0xff] }
 0x5f1   : > { %6744 = vmatprep.mubr.msk.f32.mxu0 %vm8190_vm0, %v10606_v22 }
 0x68f   : > { %v2177_v8 = vpop.f32.mrb[88].mxu0 }
 0x690   : > { %v6682_v61 = vpop.f32.mrb[89].mxu0 }
 0x693   : > { %v2182_v4 = vpop.f32.mrb[90].mxu0 }
 0x694   : > { %v6685_v12 = vpop.f32.mrb[91].mxu0 }
 0x697   : > { %v2187_v0 = vpop.f32.mrb[92].mxu0 }
 0x698   : > { %v6688_v16 = vpop.f32.mrb[93].mxu0 }
 0x69b   : > { %v2192_v11 = vpop.f32.mrb[94].mxu0 }
 0x69c   : > { %v6691_v63 = vpop.f32.mrb[95].mxu0 }
 0x69f   : > { %v2197_v24 = vpop.f32.mrb[96].mxu0 }
 0x6a0   : > { %v6694_v15 = vpop.f32.mrb[97].mxu0 }
 0x6a1   : > { %v5441_v15 = vld [vmem:[%s10578_s3 + $0x48] sm:$0xff] }
 0x6a3   : > { %v2202_v18 = vpop.f32.mrb[98].mxu0 }
 0x6a4   : > { %v6697_v17 = vpop.f32.mrb[99].mxu0 }
 0x6a7   : > { %v2207_v3 = vpop.f32.mrb[100].mxu0 }
 0x6a8   : > { %v6700_v21 = vpop.f32.mrb[101].mxu0 }
 0x6ab   : > { %v2298_v26 = vpop.f32.mrb[102].mxu0 }
 0x6ac   : > { %v2299_v2 = vadd.f32 %v2298_v26, %v2177_v8  ;;  %v6711_v20 = vpop.f32.mrb[103].mxu0 }
 0x6ae   : > { %v2340_v23 = vadd.f32 %v5418_v5, %v2299_v2 }
 0x6af   : > { %v2303_v25 = vpop.f32.mrb[104].mxu0 }
 0x6b0   : > { %7965 = vtanh.f32 %v2340_v23  ;;  %v2304_v27 = vadd.f32 %v2303_v25, %v2182_v4  ;;  %v6714_v29 = vpop.f32.mrb[105].mxu0  ;;  %v9270_v25 = vld [vmem:[%s8263_s15 + $0x38] sm:$0xff] }
 0x6b2   : > { %v2341_v31 = vadd.f32 %v5418_v5, %v2304_v27 }
 0x6b3   : > { %v2308_v35 = vpop.f32.mrb[106].mxu0 }
 0x6b4   : > { %7967 = vtanh.f32 %v2341_v31  ;;  %v2309_v28 = vadd.f32 %v2308_v35, %v2187_v0  ;;  %v6717_v30 = vpop.f32.mrb[107].mxu0 }
 0x6b5   : > { %v9283_v30 = vld [vmem:[%s8263_s15 + $0x40] sm:$0xff] }
 0x6b6   : > { %v2342_v32 = vadd.f32 %v5418_v5, %v2309_v28 }
 0x6b7   : > { %v2313_v34 = vpop.f32.mrb[108].mxu0 }
 0x6b8   : > { %7969 = vtanh.f32 %v2342_v32  ;;  %v2314_v36 = vadd.f32 %v2313_v34, %v2192_v11  ;;  %v6720_v38 = vpop.f32.mrb[109].mxu0 }
 0x6b9   : > { %v9292_v38 = vld [vmem:[%s8263_s15 + $0x48] sm:$0xff] }
 0x6ba   : > { %v9185_v40 = vpop.eup %7965  ;;  %v2343_v42 = vadd.f32 %v5418_v5, %v2314_v36 }
 0x6bb   : > { %v2318_v44 = vpop.f32.mrb[110].mxu0  ;;  %v2354_v46 = vmul.f32 %v9185_v40, %v9185_v40 }
 0x6bc   : > { %7971 = vtanh.f32 %v2343_v42  ;;  %v2319_v47 = vadd.f32 %v2318_v44, %v2197_v24  ;;  %v6723_v49 = vpop.f32.mrb[111].mxu0  ;;  %v5444_v24 = vld [vmem:[%s10579_s4 + $0x10] sm:$0xff] }
 0x6bd   : > { %v2361_v51 = vsel %vm875_vm3, %v2354_v46, 0.0  ;;  %6808 = vmatpush3.msra.mxu1 %v5444_v24  ;;  %v9483_v24 = vld [vmem:[%s10575_s0 + $0x48] sm:$0xff] }
 0x6be   : > { %v9190_v53 = vpop.eup %7967  ;;  %v2344_v55 = vadd.f32 %v5418_v5, %v2319_v47  ;;  %2362 = vadd.xlane.f32.xlu1 %v2361_v51  ;;  %6810 = vmatmul.mubr.msk.f32.vlgmr.msra.gmra.mrb[108].mxu1 %vm641_vm1, %v8930_v33  ;;  %v5440_v33 = vld [vmem:[%s10578_s3 + $0x40] sm:$0xff]  ;;  %v9306_v51 = vld [vmem:[%s8263_s15 + $0x50] sm:$0xff] }
 0x6bf   : > { %v2323_v57 = vpop.f32.mrb[112].mxu0  ;;  %v2355_v58 = vmul.f32 %v9190_v53, %v9190_v53  ;;  %7606 = vmatprep.subr.bf16.mxu1 %v10607_v54  ;;  %6812 = vmatprep.mubr.msk.f32.mxu1 %vm8190_vm0, %v10606_v22 }
 0x6c0   : > { %7973 = vtanh.f32 %v2344_v55  ;;  %v2324_v59 = vadd.f32 %v2323_v57, %v2202_v18  ;;  %v6726_v60 = vpop.f32.mrb[113].mxu0  ;;  %v7607_v18 = vpack.c.bf16 %v5441_v15, %v5440_v33  ;;  %v9315_v55 = vld [vmem:[%s8263_s15 + $0x58] sm:$0xff]  ;;  %v9492_v33 = vld [vmem:[%s10575_s0 + $0x50] sm:$0xff] }
 0x6c1   : > { %v2364_v14 = vsel %vm875_vm3, %v2355_v58, 0.0  ;;  %v9501_v15 = vld [vmem:[%s10575_s0 + $0x58] sm:$0xff] }
 0x6c2   : > { %v9195_v7 = vpop.eup %7969  ;;  %v2345_v1 = vadd.f32 %v5418_v5, %v2324_v59  ;;  %2365 = vadd.xlane.f32.xlu0 %v2364_v14  ;;  %6813 = vmatmul.mubr.msk.f32.gmra.mrb[110].mxu1 %vm641_vm1, %v8938_v37  ;;  %v5442_v37 = vld [vmem:[%s10578_s3 + $0x50] sm:$0xff]  ;;  %v9329_v14 = vld [vmem:[%s8263_s15 + $0x60] sm:$0xff] }
 0x6c3   : > { %v2328_v19 = vpop.f32.mrb[114].mxu0  ;;  %v2356_v10 = vmul.f32 %v9195_v7, %v9195_v7  ;;  %6815 = vmatprep.mubr.msk.f32.mxu1 %vm8190_vm0, %v10606_v22  ;;  %7608 = vmatpush3.bf16.msra.mxu1 %v7607_v18  ;;  %v9510_v18 = vld [vmem:[%s10575_s0 + $0x60] sm:$0xff] }
 0x6c4   : > { %7975 = vtanh.f32 %v2345_v1  ;;  %v2329_v56 = vadd.f32 %v2328_v19, %v2207_v3  ;;  %v6729_v52 = vpop.f32.mrb[115].mxu0  ;;  %7609 = vmatprep.subr.bf16.mxu1 %v10607_v54  ;;  %v9338_v19 = vld [vmem:[%s8263_s15 + $0x68] sm:$0xff] }
 0x6c5   : > { %v2367_v6 = vsel %vm875_vm3, %v2356_v10, 0.0  ;;  %v9357_v52 = vld [vmem:[%s10575_s0] sm:$0xff] }
 0x6c6   : > { %v9200_v13 = vpop.eup %7971  ;;  %v2346_v48 = vadd.f32 %v5418_v5, %v2329_v56  ;;  %2368 = vadd.xlane.f32.xlu1 %v2367_v6  ;;  %6816 = vmatmul.mubr.msk.f32.gmra.mrb[112].mxu1 %vm641_vm1, %v8946_v39  ;;  %v5443_v39 = vld [vmem:[%s10578_s3 + $0x58] sm:$0xff]  ;;  %v9350_v56 = vld [vmem:[%s8263_s15 + $0x70] sm:$0xff] }
 0x6c7   : > { %v2357_v50 = vmul.f32 %v9200_v13, %v9200_v13  ;;  %6818 = vmatprep.mubr.msk.f32.mxu1 %vm8190_vm0, %v10606_v22  ;;  %v7610_v17 = vpack.c.bf16 %v5443_v39, %v5442_v37  ;;  %v9367_v6 = vld [vmem:[%s8263_s15 + $0x78] sm:$0xff]  ;;  %v9519_v37 = vld [vmem:[%s10575_s0 + $0x68] sm:$0xff]  ;;  %v9528_v39 = vld [vmem:[%s10575_s0 + $0x70] sm:$0xff] }
 0x6c8   : > { %7977 = vtanh.f32 %v2346_v48  ;;  %v9383_v48 = vld [vmem:[%s8263_s15 + $0x80] sm:$0xff]  ;;  %10613 = vst [vmem:[#allocation2_spill] sm:$0xff] %v9528_v39 }
 0x6c9   : > { %v2370_v62 = vsel %vm875_vm3, %v2357_v50, 0.0  ;;  %7611 = vmatpush3.bf16.msra.mxu1 %v7610_v17  ;;  %v9390_v50 = vld [vmem:[%s10575_s0 + $0x10] sm:$0xff]  ;;  %v9537_v17 = vld [vmem:[%s10575_s0 + $0x78] sm:$0xff] }
 0x6ca   : > { %v9205_v9 = vpop.eup %7973  ;;  %2371 = vadd.xlane.f32.xlu0 %v2370_v62  ;;  %6819 = vmatmul.mubr.msk.f32.gmra.mrb[114].mxu1 %vm641_vm1, %v8953_v41  ;;  %v9399_v62 = vld [vmem:[%s8263_s15 + $0x88] sm:$0xff]  ;;  %10614 = vst [vmem:[#allocation3_spill] sm:$0xff] %v9537_v17 }
 0x6cb   : > { %v2358_v8 = vmul.f32 %v9205_v9, %v9205_v9  ;;  %6821 = vmatprep.mubr.msk.f32.mxu1 %vm8190_vm0, %v10606_v22  ;;  %7078 = vmatprep.subr.mxu1 %v10606_v22 }
 0x6cd   : > { %v2373_v61 = vsel %vm875_vm3, %v2358_v8, 0.0  ;;  %v9415_v8 = vld [vmem:[%s8263_s15 + $0x90] sm:$0xff] }
 0x6ce   : > { %v9210_v4 = vpop.eup %7975  ;;  %2374 = vadd.xlane.f32.xlu1 %v2373_v61  ;;  %6822 = vmatmul.mubr.msk.f32.gmra.mrb[116].mxu1 %vm641_vm1, %v8960_v43  ;;  %v9263_v43 = vld [vmem:[%s8263_s15 + $0x30] sm:$0xff]  ;;  %v9422_v61 = vld [vmem:[%s10575_s0 + $0x20] sm:$0xff] }
 0x6cf   : > { %v2359_v12 = vmul.f32 %v9210_v4, %v9210_v4  ;;  %6824 = vmatprep.mubr.msk.f32.mxu1 %vm8190_vm0, %v10606_v22 }
 0x6d1   : > { %v2376_v0 = vsel %vm875_vm3, %v2359_v12, 0.0  ;;  %v9438_v12 = vld [vmem:[%s10575_s0 + $0x28] sm:$0xff] }
 0x6d2   : > { %v9215_v16 = vpop.eup %7977  ;;  %2377 = vadd.xlane.f32.xlu0 %v2376_v0  ;;  %6825 = vmatmul.mubr.msk.f32.gmra.mrb[118].mxu1 %vm641_vm1, %v8967_v45  ;;  %v9447_v0 = vld [vmem:[%s8263_s15 + $0xa0] sm:$0xff] }
 0x6d3   : > { %v2360_v11 = vmul.f32 %v9215_v16, %v9215_v16  ;;  %6827 = vmatprep.mubr.msk.f32.mxu1 %vm8190_vm0, %v10606_v22 }
 0x6d5   : > { %v2379_v63 = vsel %vm875_vm3, %v2360_v11, 0.0  ;;  %v9465_v11 = vld [vmem:[%s10575_s0 + $0x38] sm:$0xff] }
 0x6d6   : > { %2380 = vadd.xlane.f32.xlu1 %v2379_v63  ;;  %6828 = vmatmul.mubr.msk.f32.gmra.mrb[120].mxu1 %vm641_vm1, %v9263_v43  ;;  %v9474_v63 = vld [vmem:[%s10575_s0 + $0x40] sm:$0xff] }
 0x6d7   : > { %6830 = vmatprep.mubr.msk.f32.mxu1 %vm8190_vm0, %v10606_v22 }
 0x6da   : > { %6831 = vmatmul.mubr.msk.f32.gmra.mrb[122].mxu1 %vm641_vm1, %v9270_v25 }
 0x6db   : > { %6833 = vmatprep.mubr.msk.f32.mxu1 %vm8190_vm0, %v10606_v22 }
 0x6de   : > { %6834 = vmatmul.mubr.msk.f32.gmra.mrb[124].mxu1 %vm641_vm1, %v9283_v30 }
 0x6df   : > { %6836 = vmatprep.mubr.msk.f32.mxu1 %vm8190_vm0, %v10606_v22 }
 0x6e2   : > { %6837 = vmatmul.mubr.msk.f32.gmra.mrb[126].mxu1 %vm641_vm1, %v9292_v38 }
 0x6e3   : > { %6839 = vmatprep.mubr.msk.f32.mxu1 %vm8190_vm0, %v10606_v22 }
 0x6e6   : > { %6840 = vmatmul.mubr.msk.f32.gmra.mrb[128].mxu1 %vm641_vm1, %v9306_v51 }
 0x6e7   : > { %6842 = vmatprep.mubr.msk.f32.mxu1 %vm8190_vm0, %v10606_v22 }
 0x6ea   : > { %6843 = vmatmul.mubr.msk.f32.gmra.mrb[130].mxu1 %vm641_vm1, %v9315_v55 }
 0x6eb   : > { %6845 = vmatprep.mubr.msk.f32.mxu1 %vm8190_vm0, %v10606_v22 }
 0x6ee   : > { %6846 = vmatmul.mubr.msk.f32.gmra.mrb[132].mxu1 %vm641_vm1, %v9329_v14 }
 0x6ef   : > { %6848 = vmatprep.mubr.msk.f32.mxu1 %vm8190_vm0, %v10606_v22 }
 0x6f2   : > { %6849 = vmatmul.mubr.msk.f32.gmra.mrb[134].mxu1 %vm641_vm1, %v9338_v19 }
 0x6f3   : > { %6851 = vmatprep.mubr.msk.f32.mxu1 %vm8190_vm0, %v10606_v22 }
 0x6f6   : > { %6852 = vmatmul.mubr.msk.f32.gmra.mrb[136].mxu1 %vm641_vm1, %v9350_v56 }
 0x6f7   : > { %6854 = vmatprep.mubr.msk.f32.mxu1 %vm8190_vm0, %v10606_v22 }
 0x6fa   : > { %6855 = vmatmul.mubr.msk.f32.gmra.mrb[138].mxu1 %vm641_vm1, %v9367_v6 }
 0x6fb   : > { %6857 = vmatprep.mubr.msk.f32.mxu1 %vm8190_vm0, %v10606_v22 }
 0x6fe   : > { %6858 = vmatmul.mubr.msk.f32.gmra.mrb[140].mxu1 %vm641_vm1, %v9383_v48 }
 0x6ff   : > { %6860 = vmatprep.mubr.msk.f32.mxu1 %vm8190_vm0, %v10606_v22 }
 0x702   : > { %6861 = vmatmul.mubr.msk.f32.gmra.mrb[142].mxu1 %vm641_vm1, %v9399_v62 }
 0x703   : > { %6863 = vmatprep.mubr.msk.f32.mxu1 %vm8190_vm0, %v10606_v22 }
 0x706   : > { %6864 = vmatmul.mubr.msk.f32.gmra.mrb[144].mxu1 %vm641_vm1, %v9415_v8 }
 0x707   : > { %6866 = vmatprep.mubr.msk.f32.mxu1 %vm8190_vm0, %v10606_v22 }
 0x74b   : > { %v2363_v3 = vpop.xlane.xlu1 %2362 }
 0x74c   : > { %v2382_v21 = vadd.f32 1e-12, %v2363_v3  ;;  %v9546_v3 = vld [vmem:[%s10575_s0 + $0x80] sm:$0xff] }
 0x74d   : > { %10615 = vst [vmem:[#allocation4_spill] sm:$0xff] %v9546_v3 }
 0x74e   : > { %7979 = vrsqrt.f32 %v2382_v21  ;;  %v9555_v21 = vld [vmem:[%s10575_s0 + $0x88] sm:$0xff] }
 0x74f   : > { %v2366_v26 = vpop.xlane.xlu0 %2365  ;;  %10616 = vst [vmem:[#allocation5_spill] sm:$0xff] %v9555_v21 }
 0x750   : > { %v2383_v41 = vadd.f32 1e-12, %v2366_v26  ;;  %v9564_v26 = vld [vmem:[%s10575_s0 + $0x90] sm:$0xff] }
 0x751   : > { %10617 = vst [vmem:[#allocation6_spill] sm:$0xff] %v9564_v26 }
 0x752   : > { %7981 = vrsqrt.f32 %v2383_v41  ;;  %v9573_v41 = vld [vmem:[%s10575_s0 + $0x98] sm:$0xff] }
 0x753   : > { %v2369_v5 = vpop.xlane.xlu1 %2368  ;;  %10618 = vst [vmem:[#allocation7_spill] sm:$0xff] %v9573_v41 }
 0x754   : > { %v2384_v2 = vadd.f32 1e-12, %v2369_v5  ;;  %v9582_v5 = vld [vmem:[%s10575_s0 + $0xa0] sm:$0xff] }
 0x755   : > { %10619 = vst [vmem:[#allocation8_spill] sm:$0xff] %v9582_v5 }
 0x756   : > { %7983 = vrsqrt.f32 %v2384_v2 }
 0x757   : > { %v2372_v20 = vpop.xlane.xlu0 %2371 }
 0x758   : > { %v2385_v23 = vadd.f32 1e-12, %v2372_v20  ;;  %v7980_v45 = vpop.eup %7979 }
 0x759   : > { %v9277_v35 = vmul.f32 %v7980_v45, %v9185_v40 }
 0x75a   : > { %7985 = vrsqrt.f32 %v2385_v23 }
 0x75b   : > { %v2375_v27 = vpop.xlane.xlu1 %2374 }
 0x75c   : > { %v7982_v29 = vpop.eup %7981  ;;  %v2386_v31 = vadd.f32 1e-12, %v2375_v27 }
 0x75d   : > { %v9280_v28 = vmul.f32 %v7982_v29, %v9190_v53 }
 0x75e   : > { %7987 = vrsqrt.f32 %v2386_v31 }
 0x75f   : > { %v2378_v32 = vpop.xlane.xlu0 %2377  ;;  %v7598_v34 = vpack.c.bf16 %v9280_v28, %v9277_v35 }
 0x760   : > { %v2387_v36 = vadd.f32 1e-12, %v2378_v32  ;;  %v7984_v40 = vpop.eup %7983 }
 0x761   : > { %7599 = vmatpush3.bf16.msra.mxu0 %v7598_v34  ;;  %v9300_v47 = vmul.f32 %v7984_v40, %v9195_v7 }
 0x762   : > { %7989 = vrsqrt.f32 %v2387_v36  ;;  %7600 = vmatprep.subr.bf16.mxu0 %v10607_v54 }
 0x763   : > { %v2381_v42 = vpop.xlane.xlu1 %2380 }
 0x764   : > { %v7986_v44 = vpop.eup %7985  ;;  %v2388_v46 = vadd.f32 1e-12, %v2381_v42 }
 0x765   : > { %v9303_v49 = vmul.f32 %v7986_v44, %v9200_v13  ;;  %v9374_v13 = vld [vmem:[%s10575_s0 + $0x8] sm:$0xff] }
 0x766   : > { %7991 = vrsqrt.f32 %v2388_v46 }
 0x767   : > { %v7601_v53 = vpack.c.bf16 %v9303_v49, %v9300_v47 }
 0x768   : > { %v7988_v57 = vpop.eup %7987 }
 0x769   : > { %7602 = vmatpush3.bf16.msra.mxu0 %v7601_v53  ;;  %v9323_v59 = vmul.f32 %v7988_v57, %v9205_v9  ;;  %v9406_v9 = vld [vmem:[%s10575_s0 + $0x18] sm:$0xff] }
 0x76a   : > { %7603 = vmatprep.subr.bf16.mxu0 %v10607_v54 }
 0x76c   : > { %v7990_v58 = vpop.eup %7989 }
 0x76d   : > { %v9326_v60 = vmul.f32 %v7990_v58, %v9210_v4  ;;  %v9431_v4 = vld [vmem:[%s8263_s15 + $0x98] sm:$0xff] }
 0x76e   : > { %6867 = vmatmul.mubr.msk.f32.gmra.mrb[146].mxu1 %vm641_vm1, %v9431_v4 }
 0x76f   : > { %v7604_v7 = vpack.c.bf16 %v9326_v60, %v9323_v59  ;;  %6869 = vmatprep.mubr.msk.f32.mxu1 %vm8190_vm0, %v10606_v22 }
 0x770   : > { %v7992_v1 = vpop.eup %7991 }
 0x771   : > { %7605 = vmatpush3.bf16.msra.mxu0 %v7604_v7  ;;  %v9346_v10 = vmul.f32 %v7992_v1, %v9215_v16  ;;  %v9454_v16 = vld [vmem:[%s10575_s0 + $0x30] sm:$0xff] }
 0x772   : > { %6742 = vmatprep.subr.mxu0 %v10606_v22  ;;  %6870 = vmatmul.mubr.msk.f32.gmra.mrb[148].mxu1 %vm641_vm1, %v9447_v0 }
 0x773   : > { %6880 = vmatprep.mubr.msk.f32.mxu1 %vm8190_vm0, %v10606_v22 }
 0x775   : > { %6743 = vmatpush3.msra.mxu0 %v9346_v10 }
 0x776   : > { %6745 = vmatmul.mubr.msk.f32.vlgmr.msra.gmra.mrb[116].mxu0 %vm402_vm2, %v9357_v52  ;;  %7612 = vmatprep.subr.bf16.mxu0 %v10607_v54 }
 0x777   : > { %6747 = vmatprep.mubr.msk.f32.mxu0 %vm8190_vm0, %v10606_v22 }
 0x77a   : > { %6748 = vmatmul.mubr.msk.f32.gmra.mrb[118].mxu0 %vm402_vm2, %v9374_v13 }
 0x77b   : > { %6750 = vmatprep.mubr.msk.f32.mxu0 %vm8190_vm0, %v10606_v22 }
 0x77e   : > { %6751 = vmatmul.mubr.msk.f32.gmra.mrb[120].mxu0 %vm402_vm2, %v9390_v50 }
 0x77f   : > { %6753 = vmatprep.mubr.msk.f32.mxu0 %vm8190_vm0, %v10606_v22 }
 0x782   : > { %6754 = vmatmul.mubr.msk.f32.gmra.mrb[122].mxu0 %vm402_vm2, %v9406_v9 }
 0x783   : > { %6756 = vmatprep.mubr.msk.f32.mxu0 %vm8190_vm0, %v10606_v22 }
 0x786   : > { %6757 = vmatmul.mubr.msk.f32.gmra.mrb[124].mxu0 %vm402_vm2, %v9422_v61 }
 0x787   : > { %6759 = vmatprep.mubr.msk.f32.mxu0 %vm8190_vm0, %v10606_v22 }
 0x78a   : > { %6760 = vmatmul.mubr.msk.f32.gmra.mrb[126].mxu0 %vm402_vm2, %v9438_v12 }
 0x78b   : > { %6762 = vmatprep.mubr.msk.f32.mxu0 %vm8190_vm0, %v10606_v22 }
 0x78e   : > { %6763 = vmatmul.mubr.msk.f32.gmra.mrb[128].mxu0 %vm402_vm2, %v9454_v16 }
 0x78f   : > { %6765 = vmatprep.mubr.msk.f32.mxu0 %vm8190_vm0, %v10606_v22 }
 0x792   : > { %6766 = vmatmul.mubr.msk.f32.gmra.mrb[130].mxu0 %vm402_vm2, %v9465_v11 }
 0x793   : > { %6768 = vmatprep.mubr.msk.f32.mxu0 %vm8190_vm0, %v10606_v22 }
 0x796   : > { %6769 = vmatmul.mubr.msk.f32.gmra.mrb[132].mxu0 %vm402_vm2, %v9474_v63 }
 0x797   : > { %6771 = vmatprep.mubr.msk.f32.mxu0 %vm8190_vm0, %v10606_v22 }
 0x79a   : > { %6772 = vmatmul.mubr.msk.f32.gmra.mrb[134].mxu0 %vm402_vm2, %v9483_v24 }
 0x79b   : > { %6774 = vmatprep.mubr.msk.f32.mxu0 %vm8190_vm0, %v10606_v22 }
 0x79e   : > { %6775 = vmatmul.mubr.msk.f32.gmra.mrb[136].mxu0 %vm402_vm2, %v9492_v33 }
 0x79f   : > { %6777 = vmatprep.mubr.msk.f32.mxu0 %vm8190_vm0, %v10606_v22 }
 0x7a2   : > { %6778 = vmatmul.mubr.msk.f32.gmra.mrb[138].mxu0 %vm402_vm2, %v9501_v15 }
 0x7a3   : > { %6780 = vmatprep.mubr.msk.f32.mxu0 %vm8190_vm0, %v10606_v22 }
 0x7a6   : > { %6781 = vmatmul.mubr.msk.f32.gmra.mrb[140].mxu0 %vm402_vm2, %v9510_v18 }
 0x7a7   : > { %6783 = vmatprep.mubr.msk.f32.mxu0 %vm8190_vm0, %v10606_v22 }
 0x7aa   : > { %6784 = vmatmul.mubr.msk.f32.gmra.mrb[142].mxu0 %vm402_vm2, %v9519_v37 }
 0x7ab   : > { %6786 = vmatprep.mubr.msk.f32.mxu0 %vm8190_vm0, %v10606_v22 }
 0x7ae   : > { %6787 = vmatmul.mubr.msk.f32.gmra.mrb[144].mxu0 %vm402_vm2, %v9528_v39 }
 0x7af   : > { %6789 = vmatprep.mubr.msk.f32.mxu0 %vm8190_vm0, %v10606_v22 }
 0x7b2   : > { %6790 = vmatmul.mubr.msk.f32.gmra.mrb[146].mxu0 %vm402_vm2, %v9537_v17 }
 0x7b3   : > { %6792 = vmatprep.mubr.msk.f32.mxu0 %vm8190_vm0, %v10606_v22 }
 0x7b6   : > { %6793 = vmatmul.mubr.msk.f32.gmra.mrb[148].mxu0 %vm402_vm2, %v9546_v3 }
 0x7b7   : > { %6795 = vmatprep.mubr.msk.f32.mxu0 %vm8190_vm0, %v10606_v22 }
 0x7ba   : > { %6796 = vmatmul.mubr.msk.f32.gmra.mrb[150].mxu0 %vm402_vm2, %v9555_v21 }
 0x7bb   : > { %6798 = vmatprep.mubr.msk.f32.mxu0 %vm8190_vm0, %v10606_v22 }
 0x7be   : > { %6799 = vmatmul.mubr.msk.f32.gmra.mrb[152].mxu0 %vm402_vm2, %v9564_v26 }
 0x7bf   : > { %6801 = vmatprep.mubr.msk.f32.mxu0 %vm8190_vm0, %v10606_v22 }
 0x7c2   : > { %6802 = vmatmul.mubr.msk.f32.gmra.mrb[154].mxu0 %vm402_vm2, %v9573_v41 }
 0x7c3   : > { %6804 = vmatprep.mubr.msk.f32.mxu0 %vm8190_vm0, %v10606_v22 }
 0x7c6   : > { %6805 = vmatmul.mubr.msk.f32.gmra.mrb[156].mxu0 %vm402_vm2, %v9582_v5 }
 0x7c7   : > { %6951 = vmatprep.mubr.msk.f32.mxu0 %vm8190_vm0, %v10606_v22 }
 0x849   : > { %v2469_v2 = vpop.f32.mrb[116].mxu0 }
 0x84a   : > { %6881 = vmatmul.mubr.msk.f32.vlgmr.msra.gmra.mrb[108].mxu1 %vm875_vm3, %v2469_v2  ;;  %v6746_v20 = vpop.f32.mrb[117].mxu0 }
 0x84b   : > { %6883 = vmatprep.mubr.msk.f32.mxu1 %vm8190_vm0, %v10606_v22 }
 0x84d   : > { %v2474_v23 = vpop.f32.mrb[118].mxu0 }
 0x84e   : > { %6884 = vmatmul.mubr.msk.f32.gmra.mrb[110].mxu1 %vm875_vm3, %v2474_v23  ;;  %v6749_v45 = vpop.f32.mrb[119].mxu0 }
 0x84f   : > { %6886 = vmatprep.mubr.msk.f32.mxu1 %vm8190_vm0, %v10606_v22 }
 0x851   : > { %v2479_v27 = vpop.f32.mrb[120].mxu0 }
 0x852   : > { %6887 = vmatmul.mubr.msk.f32.gmra.mrb[112].mxu1 %vm875_vm3, %v2479_v27  ;;  %v6752_v29 = vpop.f32.mrb[121].mxu0 }
 0x853   : > { %6889 = vmatprep.mubr.msk.f32.mxu1 %vm8190_vm0, %v10606_v22 }
 0x855   : > { %v2484_v31 = vpop.f32.mrb[122].mxu0 }
 0x856   : > { %6890 = vmatmul.mubr.msk.f32.gmra.mrb[114].mxu1 %vm875_vm3, %v2484_v31  ;;  %v6755_v32 = vpop.f32.mrb[123].mxu0 }
 0x857   : > { %6892 = vmatprep.mubr.msk.f32.mxu1 %vm8190_vm0, %v10606_v22 }
 0x859   : > { %v2489_v34 = vpop.f32.mrb[124].mxu0 }
 0x85a   : > { %6893 = vmatmul.mubr.msk.f32.gmra.mrb[116].mxu1 %vm875_vm3, %v2489_v34  ;;  %v6758_v36 = vpop.f32.mrb[125].mxu0 }
 0x85b   : > { %6895 = vmatprep.mubr.msk.f32.mxu1 %vm8190_vm0, %v10606_v22 }
 0x85d   : > { %v2494_v40 = vpop.f32.mrb[126].mxu0 }
 0x85e   : > { %6896 = vmatmul.mubr.msk.f32.gmra.mrb[118].mxu1 %vm875_vm3, %v2494_v40  ;;  %v6761_v42 = vpop.f32.mrb[127].mxu0 }
 0x85f   : > { %6898 = vmatprep.mubr.msk.f32.mxu1 %vm8190_vm0, %v10606_v22 }
 0x861   : > { %v2499_v44 = vpop.f32.mrb[128].mxu0 }
 0x862   : > { %6899 = vmatmul.mubr.msk.f32.gmra.mrb[120].mxu1 %vm875_vm3, %v2499_v44  ;;  %v6764_v46 = vpop.f32.mrb[129].mxu0 }
 0x863   : > { %6901 = vmatprep.mubr.msk.f32.mxu1 %vm8190_vm0, %v10606_v22 }
 0x865   : > { %v2504_v53 = vpop.f32.mrb[130].mxu0 }
 0x866   : > { %6902 = vmatmul.mubr.msk.f32.gmra.mrb[122].mxu1 %vm875_vm3, %v2504_v53  ;;  %v6767_v57 = vpop.f32.mrb[131].mxu0 }
 0x867   : > { %6904 = vmatprep.mubr.msk.f32.mxu1 %vm8190_vm0, %v10606_v22 }
 0x869   : > { %v2509_v58 = vpop.f32.mrb[132].mxu0 }
 0x86a   : > { %6905 = vmatmul.mubr.msk.f32.gmra.mrb[124].mxu1 %vm875_vm3, %v2509_v58  ;;  %v6770_v7 = vpop.f32.mrb[133].mxu0 }
 0x86b   : > { %6907 = vmatprep.mubr.msk.f32.mxu1 %vm8190_vm0, %v10606_v22 }
 0x86d   : > { %v2514_v1 = vpop.f32.mrb[134].mxu0 }
 0x86e   : > { %6908 = vmatmul.mubr.msk.f32.gmra.mrb[126].mxu1 %vm875_vm3, %v2514_v1  ;;  %v6773_v2 = vpop.f32.mrb[135].mxu0 }
 0x86f   : > { %6910 = vmatprep.mubr.msk.f32.mxu1 %vm8190_vm0, %v10606_v22 }
 0x871   : > { %v2519_v20 = vpop.f32.mrb[136].mxu0 }
 0x872   : > { %6911 = vmatmul.mubr.msk.f32.gmra.mrb[128].mxu1 %vm875_vm3, %v2519_v20  ;;  %v6776_v23 = vpop.f32.mrb[137].mxu0 }
 0x873   : > { %6913 = vmatprep.mubr.msk.f32.mxu1 %vm8190_vm0, %v10606_v22 }
 0x875   : > { %v2524_v45 = vpop.f32.mrb[138].mxu0 }
 0x876   : > { %6914 = vmatmul.mubr.msk.f32.gmra.mrb[130].mxu1 %vm875_vm3, %v2524_v45  ;;  %v6779_v27 = vpop.f32.mrb[139].mxu0 }
 0x877   : > { %6916 = vmatprep.mubr.msk.f32.mxu1 %vm8190_vm0, %v10606_v22  ;;  %v5493_v27 = vld [vmem:[%s10582_s7 + $0x40] sm:$0xff] }
 0x879   : > { %v2529_v29 = vpop.f32.mrb[140].mxu0 }
 0x87a   : > { %6917 = vmatmul.mubr.msk.f32.gmra.mrb[132].mxu1 %vm875_vm3, %v2529_v29  ;;  %v6782_v31 = vpop.f32.mrb[141].mxu0  ;;  %v5494_v29 = vld [vmem:[%s10582_s7 + $0x48] sm:$0xff] }
 0x87b   : > { %6919 = vmatprep.mubr.msk.f32.mxu1 %vm8190_vm0, %v10606_v22  ;;  %v7613_v31 = vpack.c.bf16 %v5494_v29, %v5493_v27 }
 0x87d   : > { %v2534_v32 = vpop.f32.mrb[142].mxu0  ;;  %7614 = vmatpush3.bf16.msra.mxu0 %v7613_v31 }
 0x87e   : > { %6920 = vmatmul.mubr.msk.f32.gmra.mrb[134].mxu1 %vm875_vm3, %v2534_v32  ;;  %v6785_v34 = vpop.f32.mrb[143].mxu0  ;;  %7615 = vmatprep.subr.bf16.mxu0 %v10607_v54  ;;  %v5495_v32 = vld [vmem:[%s10582_s7 + $0x50] sm:$0xff] }
 0x87f   : > { %6922 = vmatprep.mubr.msk.f32.mxu1 %vm8190_vm0, %v10606_v22  ;;  %v5496_v34 = vld [vmem:[%s10582_s7 + $0x58] sm:$0xff] }
 0x881   : > { %v2539_v36 = vpop.f32.mrb[144].mxu0 }
 0x882   : > { %6923 = vmatmul.mubr.msk.f32.gmra.mrb[136].mxu1 %vm875_vm3, %v2539_v36  ;;  %v6788_v40 = vpop.f32.mrb[145].mxu0  ;;  %v7616_v36 = vpack.c.bf16 %v5496_v34, %v5495_v32 }
 0x883   : > { %6925 = vmatprep.mubr.msk.f32.mxu1 %vm8190_vm0, %v10606_v22 }
 0x884   : > { %7617 = vmatpush3.bf16.msra.mxu0 %v7616_v36 }
 0x885   : > { %v2544_v42 = vpop.f32.mrb[146].mxu0  ;;  %7618 = vmatprep.subr.bf16.mxu0 %v10607_v54 }
 0x886   : > { %6926 = vmatmul.mubr.msk.f32.gmra.mrb[138].mxu1 %vm875_vm3, %v2544_v42  ;;  %v6791_v44 = vpop.f32.mrb[147].mxu0 }
 0x887   : > { %6928 = vmatprep.mubr.msk.f32.mxu1 %vm8190_vm0, %v10606_v22 }
 0x889   : > { %v2549_v46 = vpop.f32.mrb[148].mxu0 }
 0x88a   : > { %6929 = vmatmul.mubr.msk.f32.gmra.mrb[140].mxu1 %vm875_vm3, %v2549_v46  ;;  %v6794_v53 = vpop.f32.mrb[149].mxu0 }
 0x88b   : > { %6931 = vmatprep.mubr.msk.f32.mxu1 %vm8190_vm0, %v10606_v22 }
 0x88d   : > { %v2554_v57 = vpop.f32.mrb[150].mxu0 }
 0x88e   : > { %6932 = vmatmul.mubr.msk.f32.gmra.mrb[142].mxu1 %vm875_vm3, %v2554_v57  ;;  %v6797_v58 = vpop.f32.mrb[151].mxu0 }
 0x88f   : > { %6934 = vmatprep.mubr.msk.f32.mxu1 %vm8190_vm0, %v10606_v22 }
 0x891   : > { %v2559_v7 = vpop.f32.mrb[152].mxu0 }
 0x892   : > { %6935 = vmatmul.mubr.msk.f32.gmra.mrb[144].mxu1 %vm875_vm3, %v2559_v7  ;;  %v6800_v1 = vpop.f32.mrb[153].mxu0 }
 0x893   : > { %6937 = vmatprep.mubr.msk.f32.mxu1 %vm8190_vm0, %v10606_v22 }
 0x895   : > { %v2564_v2 = vpop.f32.mrb[154].mxu0 }
 0x896   : > { %6938 = vmatmul.mubr.msk.f32.gmra.mrb[146].mxu1 %vm875_vm3, %v2564_v2  ;;  %v6803_v20 = vpop.f32.mrb[155].mxu0 }
 0x897   : > { %6940 = vmatprep.mubr.msk.f32.mxu1 %vm8190_vm0, %v10606_v22 }
 0x899   : > { %v2569_v23 = vpop.f32.mrb[156].mxu0 }
 0x89a   : > { %6941 = vmatmul.mubr.msk.f32.gmra.mrb[148].mxu1 %vm875_vm3, %v2569_v23  ;;  %v6806_v45 = vpop.f32.mrb[157].mxu0 }
 0x89b   : > { %7080 = vmatprep.mubr.msk.f32.mxu1 %vm8190_vm0, %v10606_v22 }
 0x91d   : > { %v2879_v40 = vpop.f32.mrb[108].mxu1 }
 0x91e   : > { %v6882_v42 = vpop.f32.mrb[109].mxu1 }
 0x921   : > { %v2884_v44 = vpop.f32.mrb[110].mxu1 }
 0x922   : > { %v6885_v46 = vpop.f32.mrb[111].mxu1 }
 0x925   : > { %v2889_v53 = vpop.f32.mrb[112].mxu1 }
 0x926   : > { %v6888_v57 = vpop.f32.mrb[113].mxu1 }
 0x929   : > { %v2894_v58 = vpop.f32.mrb[114].mxu1 }
 0x92a   : > { %v6891_v7 = vpop.f32.mrb[115].mxu1 }
 0x92d   : > { %v2899_v1 = vpop.f32.mrb[116].mxu1 }
 0x92e   : > { %v6894_v2 = vpop.f32.mrb[117].mxu1 }
 0x931   : > { %v9665_v20 = vpop.f32.mrb[118].mxu1 }
 0x932   : > { %v6897_v23 = vpop.f32.mrb[119].mxu1 }
 0x935   : > { %v9667_v45 = vpop.f32.mrb[120].mxu1 }
 0x936   : > { %v6900_v27 = vpop.f32.mrb[121].mxu1 }
 0x939   : > { %v2914_v29 = vpop.f32.mrb[122].mxu1 }
 0x93a   : > { %v2983_v31 = vmax.f32 %v2879_v40, %v2914_v29  ;;  %v6903_v32 = vpop.f32.mrb[123].mxu1 }
 0x93d   : > { %v2919_v34 = vpop.f32.mrb[124].mxu1 }
 0x93e   : > { %v2984_v36 = vmax.f32 %v2884_v44, %v2919_v34  ;;  %v6906_v42 = vpop.f32.mrb[125].mxu1 }
 0x941   : > { %v2924_v5 = vpop.f32.mrb[126].mxu1 }
 0x942   : > { %v2985_v46 = vmax.f32 %v2889_v53, %v2924_v5  ;;  %v6909_v41 = vpop.f32.mrb[127].mxu1  ;;  %v5488_v5 = vld [vmem:[%s10580_s5 + $0x2] ss:$0 sm:$0xff] }
 0x945   : > { %v2929_v57 = vpop.f32.mrb[128].mxu1 }
 0x946   : > { %v2986_v26 = vmax.f32 %v2894_v58, %v2929_v57  ;;  %v6912_v7 = vpop.f32.mrb[129].mxu1 }
 0x949   : > { %v2934_v21 = vpop.f32.mrb[130].mxu1 }
 0x94a   : > { %v2987_v2 = vmax.f32 %v2899_v1, %v2934_v21  ;;  %v6915_v3 = vpop.f32.mrb[131].mxu1 }
 0x94d   : > { %v2939_v17 = vpop.f32.mrb[132].mxu1 }
 0x94e   : > { %v2988_v23 = vmax.f32 %v9665_v20, %v2939_v17  ;;  %v6918_v39 = vpop.f32.mrb[133].mxu1  ;;  %v5489_v20 = vld [vmem:[%s10581_s6 + $0x40] sm:$0xff] }
 0x951   : > { %v2944_v27 = vpop.f32.mrb[134].mxu1 }
 0x952   : > { %v2989_v40 = vmax.f32 %v9667_v45, %v2944_v27  ;;  %v6921_v29 = vpop.f32.mrb[135].mxu1  ;;  %v5490_v45 = vld [vmem:[%s10581_s6 + $0x48] sm:$0xff]  ;;  %v5491_v27 = vld [vmem:[%s10581_s6 + $0x50] sm:$0xff] }
 0x955   : > { %v2949_v32 = vpop.f32.mrb[136].mxu1 }
 0x956   : > { %v2990_v41 = vmax.f32 %v2983_v31, %v2949_v32  ;;  %v6924_v44 = vpop.f32.mrb[137].mxu1 }
 0x958   : > { %v3005_v53 = vadd.f32 %v5488_v5, %v2990_v41 }
 0x959   : > { %v2954_v58 = vpop.f32.mrb[138].mxu1 }
 0x95a   : > { %7993 = vtanh.f32 %v3005_v53  ;;  %v2991_v21 = vmax.f32 %v2984_v36, %v2954_v58  ;;  %v6927_v3 = vpop.f32.mrb[139].mxu1  ;;  %v7619_v36 = vpack.c.bf16 %v5490_v45, %v5489_v20 }
 0x95c   : > { %v3006_v1 = vadd.f32 %v5488_v5, %v2991_v21 }
 0x95d   : > { %v2959_v34 = vpop.f32.mrb[140].mxu1 }
 0x95e   : > { %7995 = vtanh.f32 %v3006_v1  ;;  %v2992_v39 = vmax.f32 %v2985_v46, %v2959_v34  ;;  %v6930_v17 = vpop.f32.mrb[141].mxu1  ;;  %v5492_v46 = vld [vmem:[%s10581_s6 + $0x58] sm:$0xff] }
 0x960   : > { %v3007_v31 = vadd.f32 %v5488_v5, %v2992_v39 }
 0x961   : > { %v2964_v42 = vpop.f32.mrb[142].mxu1 }
 0x962   : > { %7997 = vtanh.f32 %v3007_v31  ;;  %v2993_v57 = vmax.f32 %v2986_v26, %v2964_v42  ;;  %v6933_v7 = vpop.f32.mrb[143].mxu1  ;;  %v7622_v26 = vpack.c.bf16 %v5492_v46, %v5491_v27 }
 0x964   : > { %v7994_v29 = vpop.eup %7993  ;;  %v3008_v32 = vadd.f32 %v5488_v5, %v2993_v57 }
 0x965   : > { %v2969_v41 = vpop.f32.mrb[144].mxu1  ;;  %6952 = vmatmul.mubr.msk.f32.vlgmr.msra.gmra.mrb[158].mxu0 %vm875_vm3, %v7994_v29 }
 0x966   : > { %7999 = vtanh.f32 %v3008_v32  ;;  %v2994_v44 = vmax.f32 %v2987_v2, %v2969_v41  ;;  %v6936_v53 = vpop.f32.mrb[145].mxu1  ;;  %6954 = vmatprep.mubr.msk.f32.mxu0 %vm8190_vm0, %v10606_v22  ;;  %7620 = vmatpush3.bf16.msra.mxu0 %v7619_v36 }
 0x967   : > { %7621 = vmatprep.subr.bf16.mxu0 %v10607_v54 }
 0x968   : > { %v7996_v58 = vpop.eup %7995  ;;  %v3009_v21 = vadd.f32 %v5488_v5, %v2994_v44 }
 0x969   : > { %v2974_v3 = vpop.f32.mrb[146].mxu1  ;;  %6955 = vmatmul.mubr.msk.f32.gmra.mrb[160].mxu0 %vm875_vm3, %v7996_v58 }
 0x96a   : > { %8001 = vtanh.f32 %v3009_v21  ;;  %v2995_v1 = vmax.f32 %v2988_v23, %v2974_v3  ;;  %v6939_v34 = vpop.f32.mrb[147].mxu1  ;;  %6957 = vmatprep.mubr.msk.f32.mxu0 %vm8190_vm0, %v10606_v22  ;;  %7623 = vmatpush3.bf16.msra.mxu0 %v7622_v26 }
 0x96b   : > { %7624 = vmatprep.subr.bf16.mxu0 %v10607_v54 }
 0x96c   : > { %v7998_v2 = vpop.eup %7997  ;;  %v3010_v39 = vadd.f32 %v5488_v5, %v2995_v1 }
 0x96d   : > { %v2979_v17 = vpop.f32.mrb[148].mxu1  ;;  %6958 = vmatmul.mubr.msk.f32.gmra.mrb[162].mxu0 %vm875_vm3, %v7998_v2 }
 0x96e   : > { %8003 = vtanh.f32 %v3010_v39  ;;  %v2996_v20 = vmax.f32 %v2989_v40, %v2979_v17  ;;  %v6942_v45 = vpop.f32.mrb[149].mxu1  ;;  %6960 = vmatprep.mubr.msk.f32.mxu0 %vm8190_vm0, %v10606_v22 }
 0x970   : > { %v8000_v31 = vpop.eup %7999  ;;  %v3011_v23 = vadd.f32 %v5488_v5, %v2996_v20 }
 0x971   : > { %6961 = vmatmul.mubr.msk.f32.gmra.mrb[164].mxu0 %vm875_vm3, %v8000_v31 }
 0x972   : > { %8005 = vtanh.f32 %v3011_v23  ;;  %6963 = vmatprep.mubr.msk.f32.mxu0 %vm8190_vm0, %v10606_v22 }
 0x974   : > { %v8002_v42 = vpop.eup %8001 }
 0x975   : > { %6964 = vmatmul.mubr.msk.f32.gmra.mrb[166].mxu0 %vm875_vm3, %v8002_v42 }
 0x976   : > { %6966 = vmatprep.mubr.msk.f32.mxu0 %vm8190_vm0, %v10606_v22 }
 0x978   : > { %v8004_v57 = vpop.eup %8003 }
 0x979   : > { %6967 = vmatmul.mubr.msk.f32.gmra.mrb[168].mxu0 %vm875_vm3, %v8004_v57 }
 0x97a   : > { %6969 = vmatprep.mubr.msk.f32.mxu0 %vm8190_vm0, %v10606_v22 }
 0x97c   : > { %v8006_v40 = vpop.eup %8005 }
 0x97d   : > { %6970 = vmatmul.mubr.msk.f32.gmra.mrb[170].mxu0 %vm875_vm3, %v8006_v40 }
 0x97e   : > { %6980 = vmatprep.mubr.msk.f32.mxu0 %vm8190_vm0, %v10606_v22 }
 0x981   : > { %6981 = vmatmul.mubr.msk.f32.vlgmr.msra.gmra.mrb[172].mxu0 %vm875_vm3, %v9277_v35 }
 0x982   : > { %6983 = vmatprep.mubr.msk.f32.mxu0 %vm8190_vm0, %v10606_v22 }
 0x985   : > { %6984 = vmatmul.mubr.msk.f32.gmra.mrb[174].mxu0 %vm875_vm3, %v9280_v28 }
 0x986   : > { %6986 = vmatprep.mubr.msk.f32.mxu0 %vm8190_vm0, %v10606_v22 }
 0x989   : > { %6987 = vmatmul.mubr.msk.f32.gmra.mrb[176].mxu0 %vm875_vm3, %v9300_v47 }
 0x98a   : > { %6989 = vmatprep.mubr.msk.f32.mxu0 %vm8190_vm0, %v10606_v22 }
 0x98d   : > { %6990 = vmatmul.mubr.msk.f32.gmra.mrb[178].mxu0 %vm875_vm3, %v9303_v49 }
 0x98e   : > { %6992 = vmatprep.mubr.msk.f32.mxu0 %vm8190_vm0, %v10606_v22 }
 0x991   : > { %6993 = vmatmul.mubr.msk.f32.gmra.mrb[180].mxu0 %vm875_vm3, %v9323_v59 }
 0x992   : > { %6995 = vmatprep.mubr.msk.f32.mxu0 %vm8190_vm0, %v10606_v22 }
 0x995   : > { %6996 = vmatmul.mubr.msk.f32.gmra.mrb[182].mxu0 %vm875_vm3, %v9326_v60 }
 0x996   : > { %6998 = vmatprep.mubr.msk.f32.mxu0 %vm8190_vm0, %v10606_v22 }
 0x999   : > { %6999 = vmatmul.mubr.msk.f32.gmra.mrb[184].mxu0 %vm875_vm3, %v9346_v10  ;;  %v5512_v10 = vld [vmem:[%s10583_s8 + $0x2] ss:$0 sm:$0xff] }
 0x99a   : > { %7015 = vmatprep.mubr.msk.f32.mxu0 %vm8190_vm0, %v10606_v22 }
 0xa38   : > { %v3116_v35 = vpop.f32.mrb[158].mxu0 }
 0xa39   : > { %v6953_v28 = vpop.f32.mrb[159].mxu0 }
 0xa3c   : > { %v3121_v47 = vpop.f32.mrb[160].mxu0 }
 0xa3d   : > { %v6956_v49 = vpop.f32.mrb[161].mxu0 }
 0xa40   : > { %v3126_v59 = vpop.f32.mrb[162].mxu0 }
 0xa41   : > { %v6959_v5 = vpop.f32.mrb[163].mxu0 }
 0xa44   : > { %v3131_v7 = vpop.f32.mrb[164].mxu0 }
 0xa45   : > { %v6962_v36 = vpop.f32.mrb[165].mxu0 }
 0xa48   : > { %v3136_v27 = vpop.f32.mrb[166].mxu0 }
 0xa49   : > { %v6965_v46 = vpop.f32.mrb[167].mxu0 }
 0xa4c   : > { %v3141_v60 = vpop.f32.mrb[168].mxu0 }
 0xa4d   : > { %v6968_v29 = vpop.f32.mrb[169].mxu0 }
 0xa50   : > { %v3146_v32 = vpop.f32.mrb[170].mxu0 }
 0xa51   : > { %v6971_v41 = vpop.f32.mrb[171].mxu0 }
 0xa54   : > { %v3237_v44 = vpop.f32.mrb[172].mxu0 }
 0xa55   : > { %v3238_v53 = vadd.f32 %v3237_v44, %v3116_v35  ;;  %v6982_v26 = vpop.f32.mrb[173].mxu0 }
 0xa57   : > { %v3279_v58 = vadd.f32 %v5512_v10, %v3238_v53 }
 0xa58   : > { %v3242_v21 = vpop.f32.mrb[174].mxu0 }
 0xa59   : > { %8007 = vtanh.f32 %v3279_v58  ;;  %v3243_v3 = vadd.f32 %v3242_v21, %v3121_v47  ;;  %v6985_v1 = vpop.f32.mrb[175].mxu0 }
 0xa5b   : > { %v3280_v34 = vadd.f32 %v5512_v10, %v3243_v3 }
 0xa5c   : > { %v3247_v2 = vpop.f32.mrb[176].mxu0 }
 0xa5d   : > { %8009 = vtanh.f32 %v3280_v34  ;;  %v3248_v39 = vadd.f32 %v3247_v2, %v3126_v59  ;;  %v6988_v17 = vpop.f32.mrb[177].mxu0 }
 0xa5f   : > { %v3281_v20 = vadd.f32 %v5512_v10, %v3248_v39 }
 0xa60   : > { %v3252_v45 = vpop.f32.mrb[178].mxu0 }
 0xa61   : > { %8011 = vtanh.f32 %v3281_v20  ;;  %v3253_v31 = vadd.f32 %v3252_v45, %v3131_v7  ;;  %v6991_v23 = vpop.f32.mrb[179].mxu0 }
 0xa63   : > { %v9740_v42 = vpop.eup %8007  ;;  %v3282_v57 = vadd.f32 %v5512_v10, %v3253_v31 }
 0xa64   : > { %v3257_v40 = vpop.f32.mrb[180].mxu0  ;;  %v3293_v35 = vmul.f32 %v9740_v42, %v9740_v42 }
 0xa65   : > { %8013 = vtanh.f32 %v3282_v57  ;;  %v3258_v28 = vadd.f32 %v3257_v40, %v3136_v27  ;;  %v6994_v47 = vpop.f32.mrb[181].mxu0  ;;  %v5538_v40 = vld [vmem:[%s10579_s4 + $0x18] sm:$0xff] }
 0xa66   : > { %v3300_v49 = vsel %vm875_vm3, %v3293_v35, 0.0  ;;  %7079 = vmatpush3.msra.mxu1 %v5538_v40  ;;  %v8133_v35 = vld [vmem:[%s8263_s15] sm:$0xff]  ;;  %v8135_v47 = vld [vmem:[%s8263_s15 + $0x10] sm:$0xff] }
 0xa67   : > { %v9745_v5 = vpop.eup %8009  ;;  %v3283_v59 = vadd.f32 %v5512_v10, %v3258_v28  ;;  %3301 = vadd.xlane.f32.xlu0 %v3300_v49  ;;  %7081 = vmatmul.mubr.msk.f32.vlgmr.msra.gmra.mrb[150].mxu1 %vm641_vm1, %v8133_v35  ;;  %v8134_v28 = vld [vmem:[%s8263_s15 + $0x8] sm:$0xff]  ;;  %v5534_v49 = vld [vmem:[%s10578_s3 + $0x60] sm:$0xff] }
 0xa68   : > { %v3262_v36 = vpop.f32.mrb[182].mxu0  ;;  %v3294_v7 = vmul.f32 %v9745_v5, %v9745_v5  ;;  %7633 = vmatprep.subr.bf16.mxu1 %v10607_v54  ;;  %7083 = vmatprep.mubr.msk.f32.mxu1 %vm8190_vm0, %v10606_v22 }
 0xa69   : > { %8015 = vtanh.f32 %v3283_v59  ;;  %v3263_v46 = vadd.f32 %v3262_v36, %v3141_v60  ;;  %v6997_v29 = vpop.f32.mrb[183].mxu0  ;;  %v5535_v59 = vld [vmem:[%s10578_s3 + $0x68] sm:$0xff] }
 0xa6a   : > { %v3303_v41 = vsel %vm875_vm3, %v3294_v7, 0.0  ;;  %v7634_v36 = vpack.c.bf16 %v5535_v59, %v5534_v49  ;;  %v5536_v7 = vld [vmem:[%s10578_s3 + $0x70] sm:$0xff]  ;;  %v8136_v29 = vld [vmem:[%s8263_s15 + $0x18] sm:$0xff] }
 0xa6b   : > { %v9750_v44 = vpop.eup %8011  ;;  %v3284_v53 = vadd.f32 %v5512_v10, %v3263_v46  ;;  %3304 = vadd.xlane.f32.xlu1 %v3303_v41  ;;  %7084 = vmatmul.mubr.msk.f32.gmra.mrb[152].mxu1 %vm641_vm1, %v8134_v28  ;;  %v5537_v46 = vld [vmem:[%s10578_s3 + $0x78] sm:$0xff] }
 0xa6c   : > { %v3267_v27 = vpop.f32.mrb[184].mxu0  ;;  %v3295_v26 = vmul.f32 %v9750_v44, %v9750_v44  ;;  %7086 = vmatprep.mubr.msk.f32.mxu1 %vm8190_vm0, %v10606_v22  ;;  %7635 = vmatpush3.bf16.msra.mxu1 %v7634_v36  ;;  %v7637_v41 = vpack.c.bf16 %v5537_v46, %v5536_v7 }
 0xa6d   : > { %8017 = vtanh.f32 %v3284_v53  ;;  %v3268_v58 = vadd.f32 %v3267_v27, %v3146_v32  ;;  %v7000_v21 = vpop.f32.mrb[185].mxu0  ;;  %7636 = vmatprep.subr.bf16.mxu1 %v10607_v54 }
 0xa6e   : > { %v3306_v3 = vsel %vm875_vm3, %v3295_v26, 0.0  ;;  %v8137_v26 = vld [vmem:[%s8263_s15 + $0x20] sm:$0xff] }
 0xa6f   : > { %v9755_v1 = vpop.eup %8013  ;;  %v3285_v34 = vadd.f32 %v5512_v10, %v3268_v58  ;;  %3307 = vadd.xlane.f32.xlu0 %v3306_v3  ;;  %7087 = vmatmul.mubr.msk.f32.gmra.mrb[154].mxu1 %vm641_vm1, %v8135_v47  ;;  %v8138_v3 = vld [vmem:[%s8263_s15 + $0x28] sm:$0xff] }
 0xa70   : > { %v3296_v60 = vmul.f32 %v9755_v1, %v9755_v1  ;;  %7089 = vmatprep.mubr.msk.f32.mxu1 %vm8190_vm0, %v10606_v22  ;;  %7638 = vmatpush3.bf16.msra.mxu1 %v7637_v41 }
 0xa71   : > { %8019 = vtanh.f32 %v3285_v34  ;;  %7666 = vmatprep.subr.bf16.mxu1 %v10607_v54 }
 0xa72   : > { %v3309_v2 = vsel %vm875_vm3, %v3296_v60, 0.0 }
 0xa73   : > { %v9760_v39 = vpop.eup %8015  ;;  %3310 = vadd.xlane.f32.xlu1 %v3309_v2  ;;  %7090 = vmatmul.mubr.msk.f32.gmra.mrb[156].mxu1 %vm641_vm1, %v8136_v29 }
 0xa74   : > { %v3297_v32 = vmul.f32 %v9760_v39, %v9760_v39  ;;  %7092 = vmatprep.mubr.msk.f32.mxu1 %vm8190_vm0, %v10606_v22 }
 0xa76   : > { %v3312_v17 = vsel %vm875_vm3, %v3297_v32, 0.0 }
 0xa77   : > { %v9765_v20 = vpop.eup %8017  ;;  %3313 = vadd.xlane.f32.xlu0 %v3312_v17  ;;  %7093 = vmatmul.mubr.msk.f32.gmra.mrb[158].mxu1 %vm641_vm1, %v8137_v26 }
 0xa78   : > { %v3298_v10 = vmul.f32 %v9765_v20, %v9765_v20  ;;  %7095 = vmatprep.mubr.msk.f32.mxu1 %vm8190_vm0, %v10606_v22 }
 0xa7a   : > { %v3315_v45 = vsel %vm875_vm3, %v3298_v10, 0.0 }
 0xa7b   : > { %v9770_v31 = vpop.eup %8019  ;;  %3316 = vadd.xlane.f32.xlu1 %v3315_v45  ;;  %7096 = vmatmul.mubr.msk.f32.gmra.mrb[160].mxu1 %vm641_vm1, %v8138_v3 }
 0xa7c   : > { %v3299_v23 = vmul.f32 %v9770_v31, %v9770_v31  ;;  %7098 = vmatprep.mubr.msk.f32.mxu1 %vm8190_vm0, %v10606_v22 }
 0xa7e   : > { %v3318_v57 = vsel %vm875_vm3, %v3299_v23, 0.0 }
 0xa7f   : > { %3319 = vadd.xlane.f32.xlu0 %v3318_v57  ;;  %7099 = vmatmul.mubr.msk.f32.gmra.mrb[162].mxu1 %vm641_vm1, %v9263_v43 }
 0xa80   : > { %7101 = vmatprep.mubr.msk.f32.mxu1 %vm8190_vm0, %v10606_v22 }
 0xa83   : > { %7102 = vmatmul.mubr.msk.f32.gmra.mrb[164].mxu1 %vm641_vm1, %v9270_v25 }
 0xa84   : > { %7104 = vmatprep.mubr.msk.f32.mxu1 %vm8190_vm0, %v10606_v22 }
 0xa87   : > { %7105 = vmatmul.mubr.msk.f32.gmra.mrb[166].mxu1 %vm641_vm1, %v9283_v30 }
 0xa88   : > { %7107 = vmatprep.mubr.msk.f32.mxu1 %vm8190_vm0, %v10606_v22 }
 0xa8b   : > { %7108 = vmatmul.mubr.msk.f32.gmra.mrb[168].mxu1 %vm641_vm1, %v9292_v38 }
 0xa8c   : > { %7110 = vmatprep.mubr.msk.f32.mxu1 %vm8190_vm0, %v10606_v22 }
 0xa8f   : > { %7111 = vmatmul.mubr.msk.f32.gmra.mrb[170].mxu1 %vm641_vm1, %v9306_v51 }
 0xa90   : > { %7113 = vmatprep.mubr.msk.f32.mxu1 %vm8190_vm0, %v10606_v22 }
 0xa93   : > { %7114 = vmatmul.mubr.msk.f32.gmra.mrb[172].mxu1 %vm641_vm1, %v9315_v55 }
 0xa94   : > { %7116 = vmatprep.mubr.msk.f32.mxu1 %vm8190_vm0, %v10606_v22 }
 0xa97   : > { %7117 = vmatmul.mubr.msk.f32.gmra.mrb[174].mxu1 %vm641_vm1, %v9329_v14  ;;  %v10620_v14 = vld [vmem:[#allocation2_spill] sm:$0xff] }
 0xa98   : > { %7119 = vmatprep.mubr.msk.f32.mxu1 %vm8190_vm0, %v10606_v22 }
 0xa9b   : > { %7120 = vmatmul.mubr.msk.f32.gmra.mrb[176].mxu1 %vm641_vm1, %v9338_v19  ;;  %v10621_v19 = vld [vmem:[#allocation3_spill] sm:$0xff] }
 0xa9c   : > { %7122 = vmatprep.mubr.msk.f32.mxu1 %vm8190_vm0, %v10606_v22 }
 0xa9f   : > { %7123 = vmatmul.mubr.msk.f32.gmra.mrb[178].mxu1 %vm641_vm1, %v9350_v56  ;;  %v10622_v56 = vld [vmem:[#allocation4_spill] sm:$0xff] }
 0xaa0   : > { %7125 = vmatprep.mubr.msk.f32.mxu1 %vm8190_vm0, %v10606_v22 }
 0xaa3   : > { %7126 = vmatmul.mubr.msk.f32.gmra.mrb[180].mxu1 %vm641_vm1, %v9367_v6  ;;  %v10624_v6 = vld [vmem:[#allocation6_spill] sm:$0xff] }
 0xaa4   : > { %7128 = vmatprep.mubr.msk.f32.mxu1 %vm8190_vm0, %v10606_v22 }
 0xaa7   : > { %7129 = vmatmul.mubr.msk.f32.gmra.mrb[182].mxu1 %vm641_vm1, %v9383_v48  ;;  %v10626_v48 = vld [vmem:[#allocation8_spill] sm:$0xff] }
 0xaa8   : > { %7131 = vmatprep.mubr.msk.f32.mxu1 %vm8190_vm0, %v10606_v22 }
 0xaab   : > { %7132 = vmatmul.mubr.msk.f32.gmra.mrb[184].mxu1 %vm641_vm1, %v9399_v62 }
 0xaac   : > { %7134 = vmatprep.mubr.msk.f32.mxu1 %vm8190_vm0, %v10606_v22 }
 0xaaf   : > { %7135 = vmatmul.mubr.msk.f32.gmra.mrb[186].mxu1 %vm641_vm1, %v9415_v8 }
 0xab0   : > { %7137 = vmatprep.mubr.msk.f32.mxu1 %vm8190_vm0, %v10606_v22 }
 0xab3   : > { %7138 = vmatmul.mubr.msk.f32.gmra.mrb[188].mxu1 %vm641_vm1, %v9431_v4 }
 0xab4   : > { %7140 = vmatprep.mubr.msk.f32.mxu1 %vm8190_vm0, %v10606_v22 }
 0xab7   : > { %7141 = vmatmul.mubr.msk.f32.gmra.mrb[190].mxu1 %vm641_vm1, %v9447_v0 }
 0xab8   : > { %7151 = vmatprep.mubr.msk.f32.mxu1 %vm8190_vm0, %v10606_v22 }
 0xaf4   : > { %v3302_v53 = vpop.xlane.xlu0 %3301 }
 0xaf5   : > { %v3321_v27 = vadd.f32 1e-12, %v3302_v53 }
 0xaf7   : > { %8021 = vrsqrt.f32 %v3321_v27 }
 0xaf8   : > { %v3305_v58 = vpop.xlane.xlu1 %3304 }
 0xaf9   : > { %v3322_v21 = vadd.f32 1e-12, %v3305_v58 }
 0xafb   : > { %8023 = vrsqrt.f32 %v3322_v21 }
 0xafc   : > { %v3308_v34 = vpop.xlane.xlu0 %3307 }
 0xafd   : > { %v3323_v60 = vadd.f32 1e-12, %v3308_v34 }
 0xaff   : > { %8025 = vrsqrt.f32 %v3323_v60 }
 0xb00   : > { %v3311_v2 = vpop.xlane.xlu1 %3310 }
 0xb01   : > { %v3324_v32 = vadd.f32 1e-12, %v3311_v2  ;;  %v8022_v17 = vpop.eup %8021 }
 0xb02   : > { %v9826_v57 = vmul.f32 %v8022_v17, %v9740_v42 }
 0xb03   : > { %8027 = vrsqrt.f32 %v3324_v32 }
 0xb04   : > { %v3314_v10 = vpop.xlane.xlu0 %3313 }
 0xb05   : > { %v8024_v45 = vpop.eup %8023  ;;  %v3325_v23 = vadd.f32 1e-12, %v3314_v10 }
 0xb06   : > { %v9829_v43 = vmul.f32 %v8024_v45, %v9745_v5 }
 0xb07   : > { %8029 = vrsqrt.f32 %v3325_v23 }
 0xb08   : > { %v3317_v25 = vpop.xlane.xlu1 %3316  ;;  %v7625_v40 = vpack.c.bf16 %v9829_v43, %v9826_v57 }
 0xb09   : > { %v3326_v35 = vadd.f32 1e-12, %v3317_v25  ;;  %v8026_v42 = vpop.eup %8025 }
 0xb0a   : > { %7626 = vmatpush3.bf16.msra.mxu0 %v7625_v40  ;;  %v9843_v47 = vmul.f32 %v8026_v42, %v9750_v44 }
 0xb0b   : > { %8031 = vrsqrt.f32 %v3326_v35  ;;  %7627 = vmatprep.subr.bf16.mxu0 %v10607_v54 }
 0xb0c   : > { %v3320_v30 = vpop.xlane.xlu0 %3319 }
 0xb0d   : > { %v8028_v5 = vpop.eup %8027  ;;  %v3327_v28 = vadd.f32 1e-12, %v3320_v30 }
 0xb0e   : > { %v9846_v49 = vmul.f32 %v8028_v5, %v9755_v1 }
 0xb0f   : > { %8033 = vrsqrt.f32 %v3327_v28  ;;  %v5587_v28 = vld [vmem:[%s10582_s7 + $0x60] sm:$0xff] }
 0xb10   : > { %v7628_v38 = vpack.c.bf16 %v9846_v49, %v9843_v47 }
 0xb11   : > { %v8030_v59 = vpop.eup %8029 }
 0xb12   : > { %7629 = vmatpush3.bf16.msra.mxu0 %v7628_v38  ;;  %v9860_v51 = vmul.f32 %v8030_v59, %v9760_v39  ;;  %v5588_v38 = vld [vmem:[%s10582_s7 + $0x68] sm:$0xff] }
 0xb13   : > { %7630 = vmatprep.subr.bf16.mxu0 %v10607_v54  ;;  %v7640_v59 = vpack.c.bf16 %v5588_v38, %v5587_v28 }
 0xb15   : > { %v8032_v44 = vpop.eup %8031 }
 0xb16   : > { %v9863_v1 = vmul.f32 %v8032_v44, %v9765_v20  ;;  %v5589_v44 = vld [vmem:[%s10582_s7 + $0x70] sm:$0xff] }
 0xb18   : > { %v7631_v55 = vpack.c.bf16 %v9863_v1, %v9860_v51 }
 0xb19   : > { %v8034_v36 = vpop.eup %8033 }
 0xb1a   : > { %7632 = vmatpush3.bf16.msra.mxu0 %v7631_v55  ;;  %v9877_v39 = vmul.f32 %v8034_v36, %v9770_v31  ;;  %v5590_v55 = vld [vmem:[%s10582_s7 + $0x78] sm:$0xff] }
 0xb1b   : > { %7013 = vmatprep.subr.mxu0 %v10606_v22  ;;  %v7643_v36 = vpack.c.bf16 %v5590_v55, %v5589_v44 }
 0xb1e   : > { %7014 = vmatpush3.msra.mxu0 %v9877_v39 }
 0xb1f   : > { %7016 = vmatmul.mubr.msk.f32.vlgmr.msra.gmra.mrb[186].mxu0 %vm402_vm2, %v9357_v52  ;;  %7639 = vmatprep.subr.bf16.mxu0 %v10607_v54  ;;  %v10623_v52 = vld [vmem:[#allocation5_spill] sm:$0xff] }
 0xb20   : > { %7018 = vmatprep.mubr.msk.f32.mxu0 %vm8190_vm0, %v10606_v22  ;;  %7641 = vmatpush3.bf16.msra.mxu0 %v7640_v59 }
 0xb21   : > { %7642 = vmatprep.subr.bf16.mxu0 %v10607_v54 }
 0xb23   : > { %7019 = vmatmul.mubr.msk.f32.gmra.mrb[188].mxu0 %vm402_vm2, %v9374_v13  ;;  %v10625_v13 = vld [vmem:[#allocation7_spill] sm:$0xff] }
 0xb24   : > { %7021 = vmatprep.mubr.msk.f32.mxu0 %vm8190_vm0, %v10606_v22  ;;  %7644 = vmatpush3.bf16.msra.mxu0 %v7643_v36  ;;  %v5585_v36 = vld [vmem:[%s10581_s6 + $0x70] sm:$0xff] }
 0xb25   : > { %7645 = vmatprep.subr.bf16.mxu0 %v10607_v54 }
 0xb27   : > { %7022 = vmatmul.mubr.msk.f32.gmra.mrb[190].mxu0 %vm402_vm2, %v9390_v50 }
 0xb28   : > { %7024 = vmatprep.mubr.msk.f32.mxu0 %vm8190_vm0, %v10606_v22 }
 0xb2b   : > { %7025 = vmatmul.mubr.msk.f32.gmra.mrb[192].mxu0 %vm402_vm2, %v9406_v9 }
 0xb2c   : > { %7027 = vmatprep.mubr.msk.f32.mxu0 %vm8190_vm0, %v10606_v22 }
 0xb2f   : > { %7028 = vmatmul.mubr.msk.f32.gmra.mrb[194].mxu0 %vm402_vm2, %v9422_v61 }
 0xb30   : > { %7030 = vmatprep.mubr.msk.f32.mxu0 %vm8190_vm0, %v10606_v22 }
 0xb33   : > { %7031 = vmatmul.mubr.msk.f32.gmra.mrb[196].mxu0 %vm402_vm2, %v9438_v12 }
 0xb34   : > { %7033 = vmatprep.mubr.msk.f32.mxu0 %vm8190_vm0, %v10606_v22 }
 0xb37   : > { %7034 = vmatmul.mubr.msk.f32.gmra.mrb[198].mxu0 %vm402_vm2, %v9454_v16 }
 0xb38   : > { %7036 = vmatprep.mubr.msk.f32.mxu0 %vm8190_vm0, %v10606_v22 }
 0xb3b   : > { %7037 = vmatmul.mubr.msk.f32.gmra.mrb[200].mxu0 %vm402_vm2, %v9465_v11 }
 0xb3c   : > { %7039 = vmatprep.mubr.msk.f32.mxu0 %vm8190_vm0, %v10606_v22 }
 0xb3f   : > { %7040 = vmatmul.mubr.msk.f32.gmra.mrb[202].mxu0 %vm402_vm2, %v9474_v63 }
 0xb40   : > { %7042 = vmatprep.mubr.msk.f32.mxu0 %vm8190_vm0, %v10606_v22 }
 0xb43   : > { %7043 = vmatmul.mubr.msk.f32.gmra.mrb[204].mxu0 %vm402_vm2, %v9483_v24 }
 0xb44   : > { %7045 = vmatprep.mubr.msk.f32.mxu0 %vm8190_vm0, %v10606_v22 }
 0xb47   : > { %7046 = vmatmul.mubr.msk.f32.gmra.mrb[206].mxu0 %vm402_vm2, %v9492_v33 }
 0xb48   : > { %7048 = vmatprep.mubr.msk.f32.mxu0 %vm8190_vm0, %v10606_v22 }
 0xb4b   : > { %7049 = vmatmul.mubr.msk.f32.gmra.mrb[208].mxu0 %vm402_vm2, %v9501_v15 }
 0xb4c   : > { %7051 = vmatprep.mubr.msk.f32.mxu0 %vm8190_vm0, %v10606_v22 }
 0xb4f   : > { %7052 = vmatmul.mubr.msk.f32.gmra.mrb[210].mxu0 %vm402_vm2, %v9510_v18 }
 0xb50   : > { %7054 = vmatprep.mubr.msk.f32.mxu0 %vm8190_vm0, %v10606_v22 }
 0xb53   : > { %7055 = vmatmul.mubr.msk.f32.gmra.mrb[212].mxu0 %vm402_vm2, %v9519_v37 }
 0xb54   : > { %7057 = vmatprep.mubr.msk.f32.mxu0 %vm8190_vm0, %v10606_v22 }
 0xb57   : > { %7058 = vmatmul.mubr.msk.f32.gmra.mrb[214].mxu0 %vm402_vm2, %v10620_v14 }
 0xb58   : > { %7060 = vmatprep.mubr.msk.f32.mxu0 %vm8190_vm0, %v10606_v22 }
 0xb5b   : > { %7061 = vmatmul.mubr.msk.f32.gmra.mrb[216].mxu0 %vm402_vm2, %v10621_v19 }
 0xb5c   : > { %7063 = vmatprep.mubr.msk.f32.mxu0 %vm8190_vm0, %v10606_v22 }
 0xb5f   : > { %7064 = vmatmul.mubr.msk.f32.gmra.mrb[218].mxu0 %vm402_vm2, %v10622_v56 }
 0xb60   : > { %7066 = vmatprep.mubr.msk.f32.mxu0 %vm8190_vm0, %v10606_v22 }
 0xb63   : > { %7067 = vmatmul.mubr.msk.f32.gmra.mrb[220].mxu0 %vm402_vm2, %v10623_v52 }
 0xb64   : > { %7069 = vmatprep.mubr.msk.f32.mxu0 %vm8190_vm0, %v10606_v22 }
 0xb67   : > { %7070 = vmatmul.mubr.msk.f32.gmra.mrb[222].mxu0 %vm402_vm2, %v10624_v6 }
 0xb68   : > { %7072 = vmatprep.mubr.msk.f32.mxu0 %vm8190_vm0, %v10606_v22 }
 0xb6b   : > { %7073 = vmatmul.mubr.msk.f32.gmra.mrb[224].mxu0 %vm402_vm2, %v10625_v13 }
 0xb6c   : > { %7075 = vmatprep.mubr.msk.f32.mxu0 %vm8190_vm0, %v10606_v22 }
 0xb6f   : > { %7076 = vmatmul.mubr.msk.f32.gmra.mrb[226].mxu0 %vm402_vm2, %v10626_v48 }
 0xb70   : > { %7222 = vmatprep.mubr.msk.f32.mxu0 %vm8190_vm0, %v10606_v22 }
 0xbf2   : > { %v3408_v50 = vpop.f32.mrb[186].mxu0 }
 0xbf3   : > { %7152 = vmatmul.mubr.msk.f32.vlgmr.msra.gmra.mrb[150].mxu1 %vm875_vm3, %v3408_v50  ;;  %v7017_v62 = vpop.f32.mrb[187].mxu0 }
 0xbf4   : > { %7154 = vmatprep.mubr.msk.f32.mxu1 %vm8190_vm0, %v10606_v22 }
 0xbf6   : > { %v3413_v9 = vpop.f32.mrb[188].mxu0 }
 0xbf7   : > { %7155 = vmatmul.mubr.msk.f32.gmra.mrb[152].mxu1 %vm875_vm3, %v3413_v9  ;;  %v7020_v8 = vpop.f32.mrb[189].mxu0 }
 0xbf8   : > { %7157 = vmatprep.mubr.msk.f32.mxu1 %vm8190_vm0, %v10606_v22 }
 0xbfa   : > { %v3418_v61 = vpop.f32.mrb[190].mxu0 }
 0xbfb   : > { %7158 = vmatmul.mubr.msk.f32.gmra.mrb[154].mxu1 %vm875_vm3, %v3418_v61  ;;  %v7023_v4 = vpop.f32.mrb[191].mxu0 }
 0xbfc   : > { %7160 = vmatprep.mubr.msk.f32.mxu1 %vm8190_vm0, %v10606_v22 }
 0xbfe   : > { %v3423_v12 = vpop.f32.mrb[192].mxu0 }
 0xbff   : > { %7161 = vmatmul.mubr.msk.f32.gmra.mrb[156].mxu1 %vm875_vm3, %v3423_v12  ;;  %v7026_v0 = vpop.f32.mrb[193].mxu0 }
 0xc00   : > { %7163 = vmatprep.mubr.msk.f32.mxu1 %vm8190_vm0, %v10606_v22 }
 0xc02   : > { %v3428_v16 = vpop.f32.mrb[194].mxu0 }
 0xc03   : > { %7164 = vmatmul.mubr.msk.f32.gmra.mrb[158].mxu1 %vm875_vm3, %v3428_v16  ;;  %v7029_v11 = vpop.f32.mrb[195].mxu0 }
 0xc04   : > { %7166 = vmatprep.mubr.msk.f32.mxu1 %vm8190_vm0, %v10606_v22 }
 0xc06   : > { %v3433_v63 = vpop.f32.mrb[196].mxu0 }
 0xc07   : > { %7167 = vmatmul.mubr.msk.f32.gmra.mrb[160].mxu1 %vm875_vm3, %v3433_v63  ;;  %v7032_v24 = vpop.f32.mrb[197].mxu0 }
 0xc08   : > { %7169 = vmatprep.mubr.msk.f32.mxu1 %vm8190_vm0, %v10606_v22 }
 0xc0a   : > { %v3438_v33 = vpop.f32.mrb[198].mxu0 }
 0xc0b   : > { %7170 = vmatmul.mubr.msk.f32.gmra.mrb[162].mxu1 %vm875_vm3, %v3438_v33  ;;  %v7035_v15 = vpop.f32.mrb[199].mxu0 }
 0xc0c   : > { %7172 = vmatprep.mubr.msk.f32.mxu1 %vm8190_vm0, %v10606_v22 }
 0xc0e   : > { %v3443_v18 = vpop.f32.mrb[200].mxu0 }
 0xc0f   : > { %7173 = vmatmul.mubr.msk.f32.gmra.mrb[164].mxu1 %vm875_vm3, %v3443_v18  ;;  %v7038_v37 = vpop.f32.mrb[201].mxu0 }
 0xc10   : > { %7175 = vmatprep.mubr.msk.f32.mxu1 %vm8190_vm0, %v10606_v22 }
 0xc12   : > { %v3448_v20 = vpop.f32.mrb[202].mxu0 }
 0xc13   : > { %7176 = vmatmul.mubr.msk.f32.gmra.mrb[166].mxu1 %vm875_vm3, %v3448_v20  ;;  %v7041_v31 = vpop.f32.mrb[203].mxu0 }
 0xc14   : > { %7178 = vmatprep.mubr.msk.f32.mxu1 %vm8190_vm0, %v10606_v22 }
 0xc16   : > { %v3453_v7 = vpop.f32.mrb[204].mxu0 }
 0xc17   : > { %7179 = vmatmul.mubr.msk.f32.gmra.mrb[168].mxu1 %vm875_vm3, %v3453_v7  ;;  %v7044_v46 = vpop.f32.mrb[205].mxu0 }
 0xc18   : > { %7181 = vmatprep.mubr.msk.f32.mxu1 %vm8190_vm0, %v10606_v22 }
 0xc1a   : > { %v3458_v29 = vpop.f32.mrb[206].mxu0 }
 0xc1b   : > { %7182 = vmatmul.mubr.msk.f32.gmra.mrb[170].mxu1 %vm875_vm3, %v3458_v29  ;;  %v7047_v41 = vpop.f32.mrb[207].mxu0 }
 0xc1c   : > { %7184 = vmatprep.mubr.msk.f32.mxu1 %vm8190_vm0, %v10606_v22 }
 0xc1e   : > { %v3463_v53 = vpop.f32.mrb[208].mxu0 }
 0xc1f   : > { %7185 = vmatmul.mubr.msk.f32.gmra.mrb[172].mxu1 %vm875_vm3, %v3463_v53  ;;  %v7050_v27 = vpop.f32.mrb[209].mxu0 }
 0xc20   : > { %7187 = vmatprep.mubr.msk.f32.mxu1 %vm8190_vm0, %v10606_v22 }
 0xc22   : > { %v3468_v26 = vpop.f32.mrb[210].mxu0 }
 0xc23   : > { %7188 = vmatmul.mubr.msk.f32.gmra.mrb[174].mxu1 %vm875_vm3, %v3468_v26  ;;  %v7053_v58 = vpop.f32.mrb[211].mxu0 }
 0xc24   : > { %7190 = vmatprep.mubr.msk.f32.mxu1 %vm8190_vm0, %v10606_v22 }
 0xc26   : > { %v3473_v21 = vpop.f32.mrb[212].mxu0 }
 0xc27   : > { %7191 = vmatmul.mubr.msk.f32.gmra.mrb[176].mxu1 %vm875_vm3, %v3473_v21  ;;  %v7056_v3 = vpop.f32.mrb[213].mxu0 }
 0xc28   : > { %7193 = vmatprep.mubr.msk.f32.mxu1 %vm8190_vm0, %v10606_v22 }
 0xc2a   : > { %v3478_v34 = vpop.f32.mrb[214].mxu0 }
 0xc2b   : > { %7194 = vmatmul.mubr.msk.f32.gmra.mrb[178].mxu1 %vm875_vm3, %v3478_v34  ;;  %v7059_v60 = vpop.f32.mrb[215].mxu0 }
 0xc2c   : > { %7196 = vmatprep.mubr.msk.f32.mxu1 %vm8190_vm0, %v10606_v22  ;;  %v5582_v60 = vld [vmem:[%s10580_s5 + $0x3] ss:$0 sm:$0xff] }
 0xc2e   : > { %v3483_v2 = vpop.f32.mrb[216].mxu0 }
 0xc2f   : > { %7197 = vmatmul.mubr.msk.f32.gmra.mrb[180].mxu1 %vm875_vm3, %v3483_v2  ;;  %v7062_v32 = vpop.f32.mrb[217].mxu0 }
 0xc30   : > { %7199 = vmatprep.mubr.msk.f32.mxu1 %vm8190_vm0, %v10606_v22 }
 0xc32   : > { %v3488_v17 = vpop.f32.mrb[218].mxu0 }
 0xc33   : > { %7200 = vmatmul.mubr.msk.f32.gmra.mrb[182].mxu1 %vm875_vm3, %v3488_v17  ;;  %v7065_v10 = vpop.f32.mrb[219].mxu0 }
 0xc34   : > { %7202 = vmatprep.mubr.msk.f32.mxu1 %vm8190_vm0, %v10606_v22 }
 0xc36   : > { %v3493_v45 = vpop.f32.mrb[220].mxu0 }
 0xc37   : > { %7203 = vmatmul.mubr.msk.f32.gmra.mrb[184].mxu1 %vm875_vm3, %v3493_v45  ;;  %v7068_v23 = vpop.f32.mrb[221].mxu0 }
 0xc38   : > { %7205 = vmatprep.mubr.msk.f32.mxu1 %vm8190_vm0, %v10606_v22 }
 0xc3a   : > { %v3498_v25 = vpop.f32.mrb[222].mxu0 }
 0xc3b   : > { %7206 = vmatmul.mubr.msk.f32.gmra.mrb[186].mxu1 %vm875_vm3, %v3498_v25  ;;  %v7071_v40 = vpop.f32.mrb[223].mxu0 }
 0xc3c   : > { %7208 = vmatprep.mubr.msk.f32.mxu1 %vm8190_vm0, %v10606_v22 }
 0xc3e   : > { %v3503_v35 = vpop.f32.mrb[224].mxu0 }
 0xc3f   : > { %7209 = vmatmul.mubr.msk.f32.gmra.mrb[188].mxu1 %vm875_vm3, %v3503_v35  ;;  %v7074_v42 = vpop.f32.mrb[225].mxu0 }
 0xc40   : > { %7211 = vmatprep.mubr.msk.f32.mxu1 %vm8190_vm0, %v10606_v22 }
 0xc42   : > { %v3508_v30 = vpop.f32.mrb[226].mxu0 }
 0xc43   : > { %7212 = vmatmul.mubr.msk.f32.gmra.mrb[190].mxu1 %vm875_vm3, %v3508_v30  ;;  %v7077_v5 = vpop.f32.mrb[227].mxu0  ;;  %v5583_v30 = vld [vmem:[%s10581_s6 + $0x60] sm:$0xff] }
 0xc44   : > { %7493 = vmatprep.mubr.msk.f32.mxu1 %vm8190_vm0, %v10606_v22  ;;  %v5584_v5 = vld [vmem:[%s10581_s6 + $0x68] sm:$0xff] }
 0xc45   : > { %v7646_v55 = vpack.c.bf16 %v5584_v5, %v5583_v30 }
 0xcc6   : > { %v3818_v14 = vpop.f32.mrb[150].mxu1 }
 0xcc7   : > { %v7153_v19 = vpop.f32.mrb[151].mxu1 }
 0xcca   : > { %v3823_v56 = vpop.f32.mrb[152].mxu1 }
 0xccb   : > { %v7156_v52 = vpop.f32.mrb[153].mxu1 }
 0xcce   : > { %v3828_v6 = vpop.f32.mrb[154].mxu1 }
 0xccf   : > { %v7159_v13 = vpop.f32.mrb[155].mxu1 }
 0xcd2   : > { %v3833_v48 = vpop.f32.mrb[156].mxu1 }
 0xcd3   : > { %v7162_v50 = vpop.f32.mrb[157].mxu1 }
 0xcd6   : > { %v3838_v62 = vpop.f32.mrb[158].mxu1 }
 0xcd7   : > { %v7165_v9 = vpop.f32.mrb[159].mxu1 }
 0xcda   : > { %v10070_v8 = vpop.f32.mrb[160].mxu1 }
 0xcdb   : > { %v7168_v61 = vpop.f32.mrb[161].mxu1 }
 0xcde   : > { %v10072_v4 = vpop.f32.mrb[162].mxu1 }
 0xcdf   : > { %v7171_v12 = vpop.f32.mrb[163].mxu1 }
 0xce2   : > { %v3853_v0 = vpop.f32.mrb[164].mxu1 }
 0xce3   : > { %v3922_v16 = vmax.f32 %v3818_v14, %v3853_v0  ;;  %v7174_v11 = vpop.f32.mrb[165].mxu1  ;;  %v5586_v14 = vld [vmem:[%s10581_s6 + $0x78] sm:$0xff] }
 0xce6   : > { %v3858_v63 = vpop.f32.mrb[166].mxu1 }
 0xce7   : > { %v3923_v24 = vmax.f32 %v3823_v56, %v3858_v63  ;;  %v7177_v33 = vpop.f32.mrb[167].mxu1 }
 0xcea   : > { %v3863_v15 = vpop.f32.mrb[168].mxu1 }
 0xceb   : > { %v3924_v18 = vmax.f32 %v3828_v6, %v3863_v15  ;;  %v7180_v37 = vpop.f32.mrb[169].mxu1 }
 0xcee   : > { %v3868_v20 = vpop.f32.mrb[170].mxu1 }
 0xcef   : > { %v3925_v31 = vmax.f32 %v3833_v48, %v3868_v20  ;;  %v7183_v7 = vpop.f32.mrb[171].mxu1  ;;  %v7649_v48 = vpack.c.bf16 %v5586_v14, %v5585_v36 }
 0xcf2   : > { %v3873_v46 = vpop.f32.mrb[172].mxu1 }
 0xcf3   : > { %v3926_v29 = vmax.f32 %v3838_v62, %v3873_v46  ;;  %v7186_v41 = vpop.f32.mrb[173].mxu1 }
 0xcf6   : > { %v3878_v53 = vpop.f32.mrb[174].mxu1 }
 0xcf7   : > { %v3927_v27 = vmax.f32 %v10070_v8, %v3878_v53  ;;  %v7189_v26 = vpop.f32.mrb[175].mxu1 }
 0xcfa   : > { %v3883_v58 = vpop.f32.mrb[176].mxu1 }
 0xcfb   : > { %v3928_v21 = vmax.f32 %v10072_v4, %v3883_v58  ;;  %v7192_v3 = vpop.f32.mrb[177].mxu1 }
 0xcfe   : > { %v3888_v34 = vpop.f32.mrb[178].mxu1 }
 0xcff   : > { %v3929_v2 = vmax.f32 %v3922_v16, %v3888_v34  ;;  %v7195_v32 = vpop.f32.mrb[179].mxu1 }
 0xd01   : > { %v3944_v17 = vadd.f32 %v5582_v60, %v3929_v2 }
 0xd02   : > { %v3893_v10 = vpop.f32.mrb[180].mxu1 }
 0xd03   : > { %8035 = vtanh.f32 %v3944_v17  ;;  %v3930_v45 = vmax.f32 %v3923_v24, %v3893_v10  ;;  %v7198_v23 = vpop.f32.mrb[181].mxu1 }
 0xd05   : > { %v3945_v25 = vadd.f32 %v5582_v60, %v3930_v45 }
 0xd06   : > { %v3898_v40 = vpop.f32.mrb[182].mxu1 }
 0xd07   : > { %8037 = vtanh.f32 %v3945_v25  ;;  %v3931_v35 = vmax.f32 %v3924_v18, %v3898_v40  ;;  %v7201_v42 = vpop.f32.mrb[183].mxu1 }
 0xd09   : > { %v3946_v28 = vadd.f32 %v5582_v60, %v3931_v35 }
 0xd0a   : > { %v3903_v38 = vpop.f32.mrb[184].mxu1 }
 0xd0b   : > { %8039 = vtanh.f32 %v3946_v28  ;;  %v3932_v59 = vmax.f32 %v3925_v31, %v3903_v38  ;;  %v7204_v44 = vpop.f32.mrb[185].mxu1 }
 0xd0d   : > { %v8036_v19 = vpop.eup %8035  ;;  %v3947_v56 = vadd.f32 %v5582_v60, %v3932_v59 }
 0xd0e   : > { %v3908_v52 = vpop.f32.mrb[186].mxu1  ;;  %7223 = vmatmul.mubr.msk.f32.vlgmr.msra.gmra.mrb[228].mxu0 %vm875_vm3, %v8036_v19 }
 0xd0f   : > { %8041 = vtanh.f32 %v3947_v56  ;;  %v3933_v6 = vmax.f32 %v3926_v29, %v3908_v52  ;;  %v7207_v13 = vpop.f32.mrb[187].mxu1  ;;  %7225 = vmatprep.mubr.msk.f32.mxu0 %vm8190_vm0, %v10606_v22  ;;  %7647 = vmatpush3.bf16.msra.mxu0 %v7646_v55 }
 0xd10   : > { %7648 = vmatprep.subr.bf16.mxu0 %v10607_v54 }
 0xd11   : > { %v8038_v50 = vpop.eup %8037  ;;  %v3948_v62 = vadd.f32 %v5582_v60, %v3933_v6 }
 0xd12   : > { %v3913_v9 = vpop.f32.mrb[188].mxu1  ;;  %7226 = vmatmul.mubr.msk.f32.gmra.mrb[230].mxu0 %vm875_vm3, %v8038_v50 }
 0xd13   : > { %8043 = vtanh.f32 %v3948_v62  ;;  %v3934_v8 = vmax.f32 %v3927_v27, %v3913_v9  ;;  %v7210_v61 = vpop.f32.mrb[189].mxu1  ;;  %7228 = vmatprep.mubr.msk.f32.mxu0 %vm8190_vm0, %v10606_v22  ;;  %7650 = vmatpush3.bf16.msra.mxu0 %v7649_v48 }
 0xd14   : > { %7651 = vmatprep.subr.bf16.mxu0 %v10607_v54 }
 0xd15   : > { %v8040_v4 = vpop.eup %8039  ;;  %v3949_v12 = vadd.f32 %v5582_v60, %v3934_v8 }
 0xd16   : > { %v3918_v0 = vpop.f32.mrb[190].mxu1  ;;  %7229 = vmatmul.mubr.msk.f32.gmra.mrb[232].mxu0 %vm875_vm3, %v8040_v4 }
 0xd17   : > { %8045 = vtanh.f32 %v3949_v12  ;;  %v3935_v16 = vmax.f32 %v3928_v21, %v3918_v0  ;;  %v7213_v11 = vpop.f32.mrb[191].mxu1  ;;  %7231 = vmatprep.mubr.msk.f32.mxu0 %vm8190_vm0, %v10606_v22 }
 0xd19   : > { %v8042_v63 = vpop.eup %8041  ;;  %v3950_v24 = vadd.f32 %v5582_v60, %v3935_v16 }
 0xd1a   : > { %7232 = vmatmul.mubr.msk.f32.gmra.mrb[234].mxu0 %vm875_vm3, %v8042_v63 }
 0xd1b   : > { %8047 = vtanh.f32 %v3950_v24  ;;  %7234 = vmatprep.mubr.msk.f32.mxu0 %vm8190_vm0, %v10606_v22 }
 0xd1d   : > { %v8044_v33 = vpop.eup %8043 }
 0xd1e   : > { %7235 = vmatmul.mubr.msk.f32.gmra.mrb[236].mxu0 %vm875_vm3, %v8044_v33 }
 0xd1f   : > { %7237 = vmatprep.mubr.msk.f32.mxu0 %vm8190_vm0, %v10606_v22 }
 0xd21   : > { %v8046_v15 = vpop.eup %8045 }
 0xd22   : > { %7238 = vmatmul.mubr.msk.f32.gmra.mrb[238].mxu0 %vm875_vm3, %v8046_v15 }
 0xd23   : > { %7240 = vmatprep.mubr.msk.f32.mxu0 %vm8190_vm0, %v10606_v22 }
 0xd25   : > { %v8048_v18 = vpop.eup %8047 }
 0xd26   : > { %7241 = vmatmul.mubr.msk.f32.gmra.mrb[240].mxu0 %vm875_vm3, %v8048_v18 }
 0xd27   : > { %7251 = vmatprep.mubr.msk.f32.mxu0 %vm8190_vm0, %v10606_v22 }
 0xd2a   : > { %7252 = vmatmul.mubr.msk.f32.vlgmr.msra.gmra.mrb[242].mxu0 %vm875_vm3, %v9826_v57 }
 0xd2b   : > { %7254 = vmatprep.mubr.msk.f32.mxu0 %vm8190_vm0, %v10606_v22 }
 0xd2e   : > { %7255 = vmatmul.mubr.msk.f32.gmra.mrb[244].mxu0 %vm875_vm3, %v9829_v43 }
 0xd2f   : > { %7257 = vmatprep.mubr.msk.f32.mxu0 %vm8190_vm0, %v10606_v22 }
 0xd32   : > { %7258 = vmatmul.mubr.msk.f32.gmra.mrb[246].mxu0 %vm875_vm3, %v9843_v47 }
 0xd33   : > { %7260 = vmatprep.mubr.msk.f32.mxu0 %vm8190_vm0, %v10606_v22 }
 0xd36   : > { %7261 = vmatmul.mubr.msk.f32.gmra.mrb[248].mxu0 %vm875_vm3, %v9846_v49 }
 0xd37   : > { %7263 = vmatprep.mubr.msk.f32.mxu0 %vm8190_vm0, %v10606_v22 }
 0xd3a   : > { %7264 = vmatmul.mubr.msk.f32.gmra.mrb[250].mxu0 %vm875_vm3, %v9860_v51 }
 0xd3b   : > { %7266 = vmatprep.mubr.msk.f32.mxu0 %vm8190_vm0, %v10606_v22 }
 0xd3e   : > { %7267 = vmatmul.mubr.msk.f32.gmra.mrb[252].mxu0 %vm875_vm3, %v9863_v1 }
 0xd3f   : > { %7269 = vmatprep.mubr.msk.f32.mxu0 %vm8190_vm0, %v10606_v22 }
 0xd42   : > { %7270 = vmatmul.mubr.msk.f32.gmra.mrb[254].mxu0 %vm875_vm3, %v9877_v39  ;;  %v5606_v39 = vld [vmem:[%s10583_s8 + $0x3] ss:$0 sm:$0xff] }
 0xd43   : > { %7286 = vmatprep.mubr.msk.f32.mxu0 %vm8190_vm0, %v10606_v22 }
 0xde1   : > { %v4055_v57 = vpop.f32.mrb[228].mxu0 }
 0xde2   : > { %v7224_v43 = vpop.f32.mrb[229].mxu0 }
 0xde5   : > { %v4060_v47 = vpop.f32.mrb[230].mxu0 }
 0xde6   : > { %v7227_v49 = vpop.f32.mrb[231].mxu0 }
 0xde9   : > { %v4065_v51 = vpop.f32.mrb[232].mxu0 }
 0xdea   : > { %v7230_v37 = vpop.f32.mrb[233].mxu0 }
 0xded   : > { %v4070_v20 = vpop.f32.mrb[234].mxu0 }
 0xdee   : > { %v7233_v31 = vpop.f32.mrb[235].mxu0 }
 0xdf1   : > { %v4075_v7 = vpop.f32.mrb[236].mxu0 }
 0xdf2   : > { %v7236_v46 = vpop.f32.mrb[237].mxu0 }
 0xdf5   : > { %v4080_v1 = vpop.f32.mrb[238].mxu0 }
 0xdf6   : > { %v7239_v29 = vpop.f32.mrb[239].mxu0 }
 0xdf9   : > { %v4085_v41 = vpop.f32.mrb[240].mxu0 }
 0xdfa   : > { %v7242_v53 = vpop.f32.mrb[241].mxu0 }
 0xdfd   : > { %v4176_v27 = vpop.f32.mrb[242].mxu0 }
 0xdfe   : > { %v4177_v26 = vadd.f32 %v4176_v27, %v4055_v57  ;;  %v7253_v58 = vpop.f32.mrb[243].mxu0 }
 0xe00   : > { %v4218_v21 = vadd.f32 %v5606_v39, %v4177_v26 }
 0xe01   : > { %v4181_v3 = vpop.f32.mrb[244].mxu0 }
 0xe02   : > { %8049 = vtanh.f32 %v4218_v21  ;;  %v4182_v34 = vadd.f32 %v4181_v3, %v4060_v47  ;;  %v7256_v60 = vpop.f32.mrb[245].mxu0 }
 0xe04   : > { %v4219_v2 = vadd.f32 %v5606_v39, %v4182_v34 }
 0xe05   : > { %v4186_v32 = vpop.f32.mrb[246].mxu0 }
 0xe06   : > { %8051 = vtanh.f32 %v4219_v2  ;;  %v4187_v17 = vadd.f32 %v4186_v32, %v4065_v51  ;;  %v7259_v10 = vpop.f32.mrb[247].mxu0 }
 0xe08   : > { %v4220_v45 = vadd.f32 %v5606_v39, %v4187_v17 }
 0xe09   : > { %v4191_v23 = vpop.f32.mrb[248].mxu0 }
 0xe0a   : > { %8053 = vtanh.f32 %v4220_v45  ;;  %v4192_v25 = vadd.f32 %v4191_v23, %v4070_v20  ;;  %v7262_v40 = vpop.f32.mrb[249].mxu0 }
 0xe0c   : > { %v8050_v35 = vpop.eup %8049  ;;  %v4221_v42 = vadd.f32 %v5606_v39, %v4192_v25 }
 0xe0d   : > { %v4196_v30 = vpop.f32.mrb[250].mxu0  ;;  %v4232_v5 = vmul.f32 %v8050_v35, %v8050_v35 }
 0xe0e   : > { %8055 = vtanh.f32 %v4221_v42  ;;  %v4197_v28 = vadd.f32 %v4196_v30, %v4075_v7  ;;  %v7265_v38 = vpop.f32.mrb[251].mxu0 }
 0xe0f   : > { %v4239_v59 = vsel %vm875_vm3, %v4232_v5, 0.0  ;;  %v5632_v5 = vld [vmem:[%s10579_s4 + $0x20] sm:$0xff]  ;;  %v8140_v38 = vld [vmem:[%s10575_s0 + $0x8] sm:$0xff] }
 0xe10   : > { %v8052_v44 = vpop.eup %8051  ;;  %v4222_v55 = vadd.f32 %v5606_v39, %v4197_v28  ;;  %4240 = vadd.xlane.f32.xlu1 %v4239_v59  ;;  %v8139_v28 = vld [vmem:[%s10575_s0] sm:$0xff]  ;;  %v8141_v59 = vld [vmem:[%s10575_s0 + $0x10] sm:$0xff] }
 0xe11   : > { %v4201_v36 = vpop.f32.mrb[252].mxu0  ;;  %v4233_v14 = vmul.f32 %v8052_v44, %v8052_v44 }
 0xe12   : > { %8057 = vtanh.f32 %v4222_v55  ;;  %v4202_v19 = vadd.f32 %v4201_v36, %v4080_v1  ;;  %v7268_v56 = vpop.f32.mrb[253].mxu0  ;;  %v8143_v55 = vld [vmem:[%s10575_s0 + $0x20] sm:$0xff]  ;;  %v8144_v36 = vld [vmem:[%s10575_s0 + $0x28] sm:$0xff] }
 0xe13   : > { %v4242_v52 = vsel %vm875_vm3, %v4233_v14, 0.0  ;;  %v8145_v14 = vld [vmem:[%s10575_s0 + $0x30] sm:$0xff]  ;;  %v8147_v56 = vld [vmem:[%s10575_s0 + $0x40] sm:$0xff] }
 0xe14   : > { %v8054_v6 = vpop.eup %8053  ;;  %v4223_v13 = vadd.f32 %v5606_v39, %v4202_v19  ;;  %4243 = vadd.xlane.f32.xlu0 %v4242_v52  ;;  %v8146_v19 = vld [vmem:[%s10575_s0 + $0x38] sm:$0xff]  ;;  %v8148_v52 = vld [vmem:[%s10575_s0 + $0x48] sm:$0xff] }
 0xe15   : > { %v4206_v48 = vpop.f32.mrb[254].mxu0  ;;  %v4234_v50 = vmul.f32 %v8054_v6, %v8054_v6 }
 0xe16   : > { %8059 = vtanh.f32 %v4223_v13  ;;  %v4207_v62 = vadd.f32 %v4206_v48, %v4085_v41  ;;  %v7271_v9 = vpop.f32.mrb[255].mxu0  ;;  %v8150_v13 = vld [vmem:[%s10575_s0 + $0x58] sm:$0xff]  ;;  %v8151_v48 = vld [vmem:[%s10575_s0 + $0x60] sm:$0xff] }
 0xe17   : > { %v4245_v8 = vsel %vm875_vm3, %v4234_v50, 0.0  ;;  %v8152_v50 = vld [vmem:[%s10575_s0 + $0x68] sm:$0xff]  ;;  %v8154_v9 = vld [vmem:[%s10575_s0 + $0x78] sm:$0xff] }
 0xe18   : > { %v8056_v61 = vpop.eup %8055  ;;  %v4224_v4 = vadd.f32 %v5606_v39, %v4207_v62  ;;  %4246 = vadd.xlane.f32.xlu1 %v4245_v8  ;;  %v8153_v62 = vld [vmem:[%s10575_s0 + $0x70] sm:$0xff]  ;;  %v8155_v8 = vld [vmem:[%s10575_s0 + $0x80] sm:$0xff] }
 0xe19   : > { %v4235_v12 = vmul.f32 %v8056_v61, %v8056_v61 }
 0xe1a   : > { %8061 = vtanh.f32 %v4224_v4  ;;  %v8157_v4 = vld [vmem:[%s10575_s0 + $0x90] sm:$0xff] }
 0xe1b   : > { %v4248_v0 = vsel %vm875_vm3, %v4235_v12, 0.0  ;;  %v8158_v12 = vld [vmem:[%s10575_s0 + $0x98] sm:$0xff] }
 0xe1c   : > { %v8058_v16 = vpop.eup %8057  ;;  %4249 = vadd.xlane.f32.xlu0 %v4248_v0  ;;  %v5628_v0 = vld [vmem:[%s10578_s3 + $0x80] sm:$0xff] }
 0xe1d   : > { %v4236_v11 = vmul.f32 %v8058_v16, %v8058_v16 }
 0xe1f   : > { %v4251_v63 = vsel %vm875_vm3, %v4236_v11, 0.0  ;;  %v8159_v11 = vld [vmem:[%s10575_s0 + $0xa0] sm:$0xff] }
 0xe20   : > { %v8060_v24 = vpop.eup %8059  ;;  %4252 = vadd.xlane.f32.xlu1 %v4251_v63 }
 0xe21   : > { %v4237_v33 = vmul.f32 %v8060_v24, %v8060_v24 }
 0xe23   : > { %v4254_v15 = vsel %vm875_vm3, %v4237_v33, 0.0  ;;  %v5631_v33 = vld [vmem:[%s10578_s3 + $0x98] sm:$0xff] }
 0xe24   : > { %v8062_v18 = vpop.eup %8061  ;;  %4255 = vadd.xlane.f32.xlu0 %v4254_v15  ;;  %v8160_v15 = vld [vmem:[%s8263_s15] sm:$0xff] }
 0xe25   : > { %v4238_v57 = vmul.f32 %v8062_v18, %v8062_v18 }
 0xe27   : > { %v4257_v43 = vsel %vm875_vm3, %v4238_v57, 0.0  ;;  %v8161_v57 = vld [vmem:[%s8263_s15 + $0x8] sm:$0xff] }
 0xe28   : > { %4258 = vadd.xlane.f32.xlu1 %v4257_v43  ;;  %v8162_v43 = vld [vmem:[%s8263_s15 + $0x10] sm:$0xff] }
 0xe9d   : > { %v4241_v47 = vpop.xlane.xlu1 %4240 }
 0xe9e   : > { %v4260_v49 = vadd.f32 1e-12, %v4241_v47  ;;  %v8163_v47 = vld [vmem:[%s8263_s15 + $0x18] sm:$0xff] }
 0xea0   : > { %8063 = vrsqrt.f32 %v4260_v49  ;;  %v8164_v49 = vld [vmem:[%s8263_s15 + $0x20] sm:$0xff] }
 0xea1   : > { %v4244_v51 = vpop.xlane.xlu0 %4243 }
 0xea2   : > { %v4261_v37 = vadd.f32 1e-12, %v4244_v51  ;;  %v8165_v51 = vld [vmem:[%s8263_s15 + $0x28] sm:$0xff] }
 0xea4   : > { %8065 = vrsqrt.f32 %v4261_v37  ;;  %v8166_v37 = vld [vmem:[%s8263_s15 + $0x30] sm:$0xff] }
 0xea5   : > { %v4247_v20 = vpop.xlane.xlu1 %4246 }
 0xea6   : > { %v4262_v31 = vadd.f32 1e-12, %v4247_v20  ;;  %v8167_v20 = vld [vmem:[%s8263_s15 + $0x38] sm:$0xff] }
 0xea8   : > { %8067 = vrsqrt.f32 %v4262_v31  ;;  %v8168_v31 = vld [vmem:[%s8263_s15 + $0x40] sm:$0xff] }
 0xea9   : > { %v4250_v7 = vpop.xlane.xlu0 %4249 }
 0xeaa   : > { %v4263_v46 = vadd.f32 1e-12, %v4250_v7  ;;  %v8064_v1 = vpop.eup %8063  ;;  %v8169_v7 = vld [vmem:[%s8263_s15 + $0x48] sm:$0xff] }
 0xeab   : > { %v10152_v27 = vmul.f32 %v8064_v1, %v8050_v35  ;;  %v8171_v1 = vld [vmem:[%s8263_s15 + $0x58] sm:$0xff] }
 0xeac   : > { %8069 = vrsqrt.f32 %v4263_v46  ;;  %v8170_v46 = vld [vmem:[%s8263_s15 + $0x50] sm:$0xff] }
 0xead   : > { %v4253_v29 = vpop.xlane.xlu1 %4252 }
 0xeae   : > { %v8066_v41 = vpop.eup %8065  ;;  %v4264_v53 = vadd.f32 1e-12, %v4253_v29  ;;  %v8172_v29 = vld [vmem:[%s8263_s15 + $0x60] sm:$0xff] }
 0xeaf   : > { %v10154_v39 = vmul.f32 %v8066_v41, %v8052_v44  ;;  %v8142_v44 = vld [vmem:[%s10575_s0 + $0x18] sm:$0xff]  ;;  %v8173_v41 = vld [vmem:[%s8263_s15 + $0x68] sm:$0xff] }
 0xeb0   : > { %8071 = vrsqrt.f32 %v4264_v53  ;;  %v8174_v53 = vld [vmem:[%s8263_s15 + $0x70] sm:$0xff] }
 0xeb1   : > { %v4256_v26 = vpop.xlane.xlu0 %4255  ;;  %v7652_v58 = vpack.c.bf16 %v10154_v39, %v10152_v27 }
 0xeb2   : > { %v4265_v21 = vadd.f32 1e-12, %v4256_v26  ;;  %v8068_v3 = vpop.eup %8067  ;;  %v8175_v26 = vld [vmem:[%s8263_s15 + $0x78] sm:$0xff] }
 0xeb3   : > { %7653 = vmatpush3.bf16.msra.mxu0 %v7652_v58  ;;  %v10159_v32 = vmul.f32 %v8068_v3, %v8054_v6  ;;  %v8149_v6 = vld [vmem:[%s10575_s0 + $0x50] sm:$0xff]  ;;  %v8176_v58 = vld [vmem:[%s8263_s15 + $0x80] sm:$0xff] }
 0xeb4   : > { %8073 = vrsqrt.f32 %v4265_v21  ;;  %7654 = vmatprep.subr.bf16.mxu0 %v10607_v54  ;;  %v8177_v21 = vld [vmem:[%s8263_s15 + $0x88] sm:$0xff]  ;;  %v8178_v3 = vld [vmem:[%s8263_s15 + $0x90] sm:$0xff] }
 0xeb5   : > { %v4259_v34 = vpop.xlane.xlu1 %4258 }
 0xeb6   : > { %v8070_v60 = vpop.eup %8069  ;;  %v4266_v2 = vadd.f32 1e-12, %v4259_v34  ;;  %v8179_v34 = vld [vmem:[%s8263_s15 + $0x98] sm:$0xff] }
 0xeb7   : > { %v10161_v17 = vmul.f32 %v8070_v60, %v8056_v61  ;;  %v8156_v61 = vld [vmem:[%s10575_s0 + $0x88] sm:$0xff]  ;;  %v8180_v60 = vld [vmem:[%s8263_s15 + $0xa0] sm:$0xff] }
 0xeb8   : > { %8075 = vrsqrt.f32 %v4266_v2 }
 0xeb9   : > { %v7655_v10 = vpack.c.bf16 %v10161_v17, %v10159_v32 }
 0xeba   : > { %v8072_v45 = vpop.eup %8071 }
 0xebb   : > { %7656 = vmatpush3.bf16.msra.mxu0 %v7655_v10  ;;  %v10166_v25 = vmul.f32 %v8072_v45, %v8058_v16  ;;  %v5629_v16 = vld [vmem:[%s10578_s3 + $0x88] sm:$0xff] }
 0xebc   : > { %7657 = vmatprep.subr.bf16.mxu0 %v10607_v54  ;;  %v7661_v63 = vpack.c.bf16 %v5629_v16, %v5628_v0 }
 0xebe   : > { %v8074_v23 = vpop.eup %8073 }
 0xebf   : > { %v10168_v40 = vmul.f32 %v8074_v23, %v8060_v24  ;;  %v5630_v24 = vld [vmem:[%s10578_s3 + $0x90] sm:$0xff] }
 0xec1   : > { %v7658_v35 = vpack.c.bf16 %v10168_v40, %v10166_v25 }
 0xec2   : > { %v8076_v42 = vpop.eup %8075 }
 0xec3   : > { %7659 = vmatpush3.bf16.msra.mxu0 %v7658_v35  ;;  %v10173_v30 = vmul.f32 %v8076_v42, %v8062_v18  ;;  %v7664_v18 = vpack.c.bf16 %v5631_v33, %v5630_v24 }
 0xec4   : > { %7284 = vmatprep.subr.mxu0 %v10606_v22 }
 0xec7   : > { %7285 = vmatpush3.msra.mxu0 %v10173_v30 }
 0xec8   : > { %7287 = vmatmul.mubr.msk.f32.vlgmr.msra.gmra.mrb[0].mxu0 %vm402_vm2, %v8139_v28  ;;  %7349 = vmatprep.subr.mxu0 %v10606_v22 }
 0xec9   : > { %7289 = vmatprep.mubr.msk.f32.mxu0 %vm8190_vm0, %v10606_v22  ;;  %7350 = vmatpush3.msra.mxu0 %v5632_v5 }
 0xeca   : > { %7660 = vmatprep.subr.bf16.mxu0 %v10607_v54 }
 0xecc   : > { %7290 = vmatmul.mubr.msk.f32.gmra.mrb[2].mxu0 %vm402_vm2, %v8140_v38 }
 0xecd   : > { %7292 = vmatprep.mubr.msk.f32.mxu0 %vm8190_vm0, %v10606_v22 }
 0xed0   : > { %7293 = vmatmul.mubr.msk.f32.gmra.mrb[4].mxu0 %vm402_vm2, %v8141_v59 }
 0xed1   : > { %7295 = vmatprep.mubr.msk.f32.mxu0 %vm8190_vm0, %v10606_v22 }
 0xed4   : > { %7296 = vmatmul.mubr.msk.f32.gmra.mrb[6].mxu0 %vm402_vm2, %v8142_v44 }
 0xed5   : > { %7298 = vmatprep.mubr.msk.f32.mxu0 %vm8190_vm0, %v10606_v22 }
 0xed8   : > { %7299 = vmatmul.mubr.msk.f32.gmra.mrb[8].mxu0 %vm402_vm2, %v8143_v55 }
 0xed9   : > { %7301 = vmatprep.mubr.msk.f32.mxu0 %vm8190_vm0, %v10606_v22 }
 0xedc   : > { %7302 = vmatmul.mubr.msk.f32.gmra.mrb[10].mxu0 %vm402_vm2, %v8144_v36 }
 0xedd   : > { %7304 = vmatprep.mubr.msk.f32.mxu0 %vm8190_vm0, %v10606_v22 }
 0xee0   : > { %7305 = vmatmul.mubr.msk.f32.gmra.mrb[12].mxu0 %vm402_vm2, %v8145_v14 }
 0xee1   : > { %7307 = vmatprep.mubr.msk.f32.mxu0 %vm8190_vm0, %v10606_v22 }
 0xee4   : > { %7308 = vmatmul.mubr.msk.f32.gmra.mrb[14].mxu0 %vm402_vm2, %v8146_v19 }
 0xee5   : > { %7310 = vmatprep.mubr.msk.f32.mxu0 %vm8190_vm0, %v10606_v22 }
 0xee8   : > { %7311 = vmatmul.mubr.msk.f32.gmra.mrb[16].mxu0 %vm402_vm2, %v8147_v56 }
 0xee9   : > { %7313 = vmatprep.mubr.msk.f32.mxu0 %vm8190_vm0, %v10606_v22 }
 0xeec   : > { %7314 = vmatmul.mubr.msk.f32.gmra.mrb[18].mxu0 %vm402_vm2, %v8148_v52 }
 0xeed   : > { %7316 = vmatprep.mubr.msk.f32.mxu0 %vm8190_vm0, %v10606_v22 }
 0xef0   : > { %7317 = vmatmul.mubr.msk.f32.gmra.mrb[20].mxu0 %vm402_vm2, %v8149_v6 }
 0xef1   : > { %7319 = vmatprep.mubr.msk.f32.mxu0 %vm8190_vm0, %v10606_v22 }
 0xef4   : > { %7320 = vmatmul.mubr.msk.f32.gmra.mrb[22].mxu0 %vm402_vm2, %v8150_v13 }
 0xef5   : > { %7322 = vmatprep.mubr.msk.f32.mxu0 %vm8190_vm0, %v10606_v22 }
 0xef8   : > { %7323 = vmatmul.mubr.msk.f32.gmra.mrb[24].mxu0 %vm402_vm2, %v8151_v48 }
 0xef9   : > { %7325 = vmatprep.mubr.msk.f32.mxu0 %vm8190_vm0, %v10606_v22 }
 0xefc   : > { %7326 = vmatmul.mubr.msk.f32.gmra.mrb[26].mxu0 %vm402_vm2, %v8152_v50 }
 0xefd   : > { %7328 = vmatprep.mubr.msk.f32.mxu0 %vm8190_vm0, %v10606_v22 }
 0xf00   : > { %7329 = vmatmul.mubr.msk.f32.gmra.mrb[28].mxu0 %vm402_vm2, %v8153_v62 }
 0xf01   : > { %7331 = vmatprep.mubr.msk.f32.mxu0 %vm8190_vm0, %v10606_v22 }
 0xf04   : > { %7332 = vmatmul.mubr.msk.f32.gmra.mrb[30].mxu0 %vm402_vm2, %v8154_v9 }
 0xf05   : > { %7334 = vmatprep.mubr.msk.f32.mxu0 %vm8190_vm0, %v10606_v22 }
 0xf08   : > { %7335 = vmatmul.mubr.msk.f32.gmra.mrb[32].mxu0 %vm402_vm2, %v8155_v8 }
 0xf09   : > { %7337 = vmatprep.mubr.msk.f32.mxu0 %vm8190_vm0, %v10606_v22 }
 0xf0c   : > { %7338 = vmatmul.mubr.msk.f32.gmra.mrb[34].mxu0 %vm402_vm2, %v8156_v61 }
 0xf0d   : > { %7340 = vmatprep.mubr.msk.f32.mxu0 %vm8190_vm0, %v10606_v22 }
 0xf10   : > { %7341 = vmatmul.mubr.msk.f32.gmra.mrb[36].mxu0 %vm402_vm2, %v8157_v4 }
 0xf11   : > { %7343 = vmatprep.mubr.msk.f32.mxu0 %vm8190_vm0, %v10606_v22 }
 0xf14   : > { %7344 = vmatmul.mubr.msk.f32.gmra.mrb[38].mxu0 %vm402_vm2, %v8158_v12 }
 0xf15   : > { %7346 = vmatprep.mubr.msk.f32.mxu0 %vm8190_vm0, %v10606_v22 }
 0xf18   : > { %7347 = vmatmul.mubr.msk.f32.gmra.mrb[40].mxu0 %vm402_vm2, %v8159_v11 }
 0xf19   : > { %7351 = vmatprep.mubr.msk.f32.mxu0 %vm8190_vm0, %v10606_v22 }
 0xf1c   : > { %7352 = vmatmul.mubr.msk.f32.vlgmr.msra.gmra.mrb[42].mxu0 %vm641_vm1, %v8160_v15 }
 0xf1d   : > { %7354 = vmatprep.mubr.msk.f32.mxu0 %vm8190_vm0, %v10606_v22  ;;  %7662 = vmatpush3.bf16.msra.mxu0 %v7661_v63 }
 0xf1e   : > { %7663 = vmatprep.subr.bf16.mxu0 %v10607_v54 }
 0xf20   : > { %7355 = vmatmul.mubr.msk.f32.gmra.mrb[44].mxu0 %vm641_vm1, %v8161_v57 }
 0xf21   : > { %7357 = vmatprep.mubr.msk.f32.mxu0 %vm8190_vm0, %v10606_v22  ;;  %7665 = vmatpush3.bf16.msra.mxu0 %v7664_v18 }
 0xf24   : > { %7358 = vmatmul.mubr.msk.f32.gmra.mrb[46].mxu0 %vm641_vm1, %v8162_v43 }
 0xf25   : > { %7360 = vmatprep.mubr.msk.f32.mxu0 %vm8190_vm0, %v10606_v22 }
 0xf28   : > { %7361 = vmatmul.mubr.msk.f32.gmra.mrb[48].mxu0 %vm641_vm1, %v8163_v47 }
 0xf29   : > { %7363 = vmatprep.mubr.msk.f32.mxu0 %vm8190_vm0, %v10606_v22 }
 0xf2c   : > { %7364 = vmatmul.mubr.msk.f32.gmra.mrb[50].mxu0 %vm641_vm1, %v8164_v49 }
 0xf2d   : > { %7366 = vmatprep.mubr.msk.f32.mxu0 %vm8190_vm0, %v10606_v22 }
 0xf30   : > { %7367 = vmatmul.mubr.msk.f32.gmra.mrb[52].mxu0 %vm641_vm1, %v8165_v51 }
 0xf31   : > { %7369 = vmatprep.mubr.msk.f32.mxu0 %vm8190_vm0, %v10606_v22 }
 0xf34   : > { %7370 = vmatmul.mubr.msk.f32.gmra.mrb[54].mxu0 %vm641_vm1, %v8166_v37 }
 0xf35   : > { %7372 = vmatprep.mubr.msk.f32.mxu0 %vm8190_vm0, %v10606_v22 }
 0xf38   : > { %7373 = vmatmul.mubr.msk.f32.gmra.mrb[56].mxu0 %vm641_vm1, %v8167_v20 }
 0xf39   : > { %7375 = vmatprep.mubr.msk.f32.mxu0 %vm8190_vm0, %v10606_v22 }
 0xf3c   : > { %7376 = vmatmul.mubr.msk.f32.gmra.mrb[58].mxu0 %vm641_vm1, %v8168_v31  ;;  %v5681_v31 = vld [vmem:[%s10582_s7 + $0x80] sm:$0xff] }
 0xf3d   : > { %7378 = vmatprep.mubr.msk.f32.mxu0 %vm8190_vm0, %v10606_v22 }
 0xf40   : > { %7379 = vmatmul.mubr.msk.f32.gmra.mrb[60].mxu0 %vm641_vm1, %v8169_v7  ;;  %v5682_v7 = vld [vmem:[%s10582_s7 + $0x88] sm:$0xff] }
 0xf41   : > { %7381 = vmatprep.mubr.msk.f32.mxu0 %vm8190_vm0, %v10606_v22 }
 0xf44   : > { %7382 = vmatmul.mubr.msk.f32.gmra.mrb[62].mxu0 %vm641_vm1, %v8170_v46  ;;  %v7667_v46 = vpack.c.bf16 %v5682_v7, %v5681_v31 }
 0xf45   : > { %7384 = vmatprep.mubr.msk.f32.mxu0 %vm8190_vm0, %v10606_v22 }
 0xf46   : > { %7668 = vmatpush3.bf16.msra.mxu1 %v7667_v46 }
 0xf47   : > { %7669 = vmatprep.subr.bf16.mxu1 %v10607_v54 }
 0xf48   : > { %7385 = vmatmul.mubr.msk.f32.gmra.mrb[64].mxu0 %vm641_vm1, %v8171_v1  ;;  %v5683_v1 = vld [vmem:[%s10582_s7 + $0x90] sm:$0xff] }
 0xf49   : > { %7387 = vmatprep.mubr.msk.f32.mxu0 %vm8190_vm0, %v10606_v22 }
 0xf4c   : > { %7388 = vmatmul.mubr.msk.f32.gmra.mrb[66].mxu0 %vm641_vm1, %v8172_v29  ;;  %v5684_v29 = vld [vmem:[%s10582_s7 + $0x98] sm:$0xff] }
 0xf4d   : > { %7390 = vmatprep.mubr.msk.f32.mxu0 %vm8190_vm0, %v10606_v22 }
 0xf50   : > { %7391 = vmatmul.mubr.msk.f32.gmra.mrb[68].mxu0 %vm641_vm1, %v8173_v41  ;;  %v7670_v41 = vpack.c.bf16 %v5684_v29, %v5683_v1 }
 0xf51   : > { %7393 = vmatprep.mubr.msk.f32.mxu0 %vm8190_vm0, %v10606_v22 }
 0xf52   : > { %7671 = vmatpush3.bf16.msra.mxu1 %v7670_v41  ;;  %v5679_v41 = vld [vmem:[%s10581_s6 + $0x90] sm:$0xff] }
 0xf53   : > { %7672 = vmatprep.subr.bf16.mxu1 %v10607_v54 }
 0xf54   : > { %7394 = vmatmul.mubr.msk.f32.gmra.mrb[70].mxu0 %vm641_vm1, %v8174_v53 }
 0xf55   : > { %7396 = vmatprep.mubr.msk.f32.mxu0 %vm8190_vm0, %v10606_v22 }
 0xf58   : > { %7397 = vmatmul.mubr.msk.f32.gmra.mrb[72].mxu0 %vm641_vm1, %v8175_v26 }
 0xf59   : > { %7399 = vmatprep.mubr.msk.f32.mxu0 %vm8190_vm0, %v10606_v22 }
 0xf5c   : > { %7400 = vmatmul.mubr.msk.f32.gmra.mrb[74].mxu0 %vm641_vm1, %v8176_v58 }
 0xf5d   : > { %7402 = vmatprep.mubr.msk.f32.mxu0 %vm8190_vm0, %v10606_v22 }
 0xf60   : > { %7403 = vmatmul.mubr.msk.f32.gmra.mrb[76].mxu0 %vm641_vm1, %v8177_v21 }
 0xf61   : > { %7405 = vmatprep.mubr.msk.f32.mxu0 %vm8190_vm0, %v10606_v22 }
 0xf64   : > { %7406 = vmatmul.mubr.msk.f32.gmra.mrb[78].mxu0 %vm641_vm1, %v8178_v3 }
 0xf65   : > { %7408 = vmatprep.mubr.msk.f32.mxu0 %vm8190_vm0, %v10606_v22 }
 0xf68   : > { %7409 = vmatmul.mubr.msk.f32.gmra.mrb[80].mxu0 %vm641_vm1, %v8179_v34 }
 0xf69   : > { %7411 = vmatprep.mubr.msk.f32.mxu0 %vm8190_vm0, %v10606_v22 }
 0xf6c   : > { %7412 = vmatmul.mubr.msk.f32.gmra.mrb[82].mxu0 %vm641_vm1, %v8180_v60 }
 0xf6d   : > { %7422 = vmatprep.mubr.msk.f32.mxu0 %vm8190_vm0, %v10606_v22 }
 0xf9b   : > { %v4347_v2 = vpop.f32.mrb[0].mxu0 }
 0xf9c   : > { %7423 = vmatmul.mubr.msk.f32.vlgmr.msra.gmra.mrb[42].mxu0 %vm875_vm3, %v4347_v2  ;;  %v7288_v10 = vpop.f32.mrb[1].mxu0 }
 0xf9d   : > { %7425 = vmatprep.mubr.msk.f32.mxu0 %vm8190_vm0, %v10606_v22 }
 0xf9f   : > { %v4352_v45 = vpop.f32.mrb[2].mxu0 }
 0xfa0   : > { %7426 = vmatmul.mubr.msk.f32.gmra.mrb[44].mxu0 %vm875_vm3, %v4352_v45  ;;  %v7291_v23 = vpop.f32.mrb[3].mxu0 }
 0xfa1   : > { %7428 = vmatprep.mubr.msk.f32.mxu0 %vm8190_vm0, %v10606_v22 }
 0xfa3   : > { %v4357_v35 = vpop.f32.mrb[4].mxu0 }
 0xfa4   : > { %7429 = vmatmul.mubr.msk.f32.gmra.mrb[46].mxu0 %vm875_vm3, %v4357_v35  ;;  %v7294_v42 = vpop.f32.mrb[5].mxu0 }
 0xfa5   : > { %7431 = vmatprep.mubr.msk.f32.mxu0 %vm8190_vm0, %v10606_v22 }
 0xfa7   : > { %v4362_v5 = vpop.f32.mrb[6].mxu0 }
 0xfa8   : > { %7432 = vmatmul.mubr.msk.f32.gmra.mrb[48].mxu0 %vm875_vm3, %v4362_v5  ;;  %v7297_v28 = vpop.f32.mrb[7].mxu0 }
 0xfa9   : > { %7434 = vmatprep.mubr.msk.f32.mxu0 %vm8190_vm0, %v10606_v22 }
 0xfab   : > { %v4367_v38 = vpop.f32.mrb[8].mxu0 }
 0xfac   : > { %7435 = vmatmul.mubr.msk.f32.gmra.mrb[50].mxu0 %vm875_vm3, %v4367_v38  ;;  %v7300_v59 = vpop.f32.mrb[9].mxu0 }
 0xfad   : > { %7437 = vmatprep.mubr.msk.f32.mxu0 %vm8190_vm0, %v10606_v22 }
 0xfaf   : > { %v4372_v44 = vpop.f32.mrb[10].mxu0 }
 0xfb0   : > { %7438 = vmatmul.mubr.msk.f32.gmra.mrb[52].mxu0 %vm875_vm3, %v4372_v44  ;;  %v7303_v55 = vpop.f32.mrb[11].mxu0 }
 0xfb1   : > { %7440 = vmatprep.mubr.msk.f32.mxu0 %vm8190_vm0, %v10606_v22 }
 0xfb3   : > { %v4377_v36 = vpop.f32.mrb[12].mxu0 }
 0xfb4   : > { %7441 = vmatmul.mubr.msk.f32.gmra.mrb[54].mxu0 %vm875_vm3, %v4377_v36  ;;  %v7306_v14 = vpop.f32.mrb[13].mxu0 }
 0xfb5   : > { %7443 = vmatprep.mubr.msk.f32.mxu0 %vm8190_vm0, %v10606_v22 }
 0xfb7   : > { %v4382_v19 = vpop.f32.mrb[14].mxu0 }
 0xfb8   : > { %7444 = vmatmul.mubr.msk.f32.gmra.mrb[56].mxu0 %vm875_vm3, %v4382_v19  ;;  %v7309_v56 = vpop.f32.mrb[15].mxu0 }
 0xfb9   : > { %7446 = vmatprep.mubr.msk.f32.mxu0 %vm8190_vm0, %v10606_v22 }
 0xfbb   : > { %v4387_v52 = vpop.f32.mrb[16].mxu0 }
 0xfbc   : > { %7447 = vmatmul.mubr.msk.f32.gmra.mrb[58].mxu0 %vm875_vm3, %v4387_v52  ;;  %v7312_v6 = vpop.f32.mrb[17].mxu0 }
 0xfbd   : > { %7449 = vmatprep.mubr.msk.f32.mxu0 %vm8190_vm0, %v10606_v22 }
 0xfbf   : > { %v4392_v13 = vpop.f32.mrb[18].mxu0 }
 0xfc0   : > { %7450 = vmatmul.mubr.msk.f32.gmra.mrb[60].mxu0 %vm875_vm3, %v4392_v13  ;;  %v7315_v48 = vpop.f32.mrb[19].mxu0 }
 0xfc1   : > { %7452 = vmatprep.mubr.msk.f32.mxu0 %vm8190_vm0, %v10606_v22 }
 0xfc3   : > { %v4397_v50 = vpop.f32.mrb[20].mxu0 }
 0xfc4   : > { %7453 = vmatmul.mubr.msk.f32.gmra.mrb[62].mxu0 %vm875_vm3, %v4397_v50  ;;  %v7318_v62 = vpop.f32.mrb[21].mxu0 }
 0xfc5   : > { %7455 = vmatprep.mubr.msk.f32.mxu0 %vm8190_vm0, %v10606_v22 }
 0xfc7   : > { %v4402_v9 = vpop.f32.mrb[22].mxu0 }
 0xfc8   : > { %7456 = vmatmul.mubr.msk.f32.gmra.mrb[64].mxu0 %vm875_vm3, %v4402_v9  ;;  %v7321_v8 = vpop.f32.mrb[23].mxu0 }
 0xfc9   : > { %7458 = vmatprep.mubr.msk.f32.mxu0 %vm8190_vm0, %v10606_v22 }
 0xfcb   : > { %v4407_v61 = vpop.f32.mrb[24].mxu0 }
 0xfcc   : > { %7459 = vmatmul.mubr.msk.f32.gmra.mrb[66].mxu0 %vm875_vm3, %v4407_v61  ;;  %v7324_v4 = vpop.f32.mrb[25].mxu0 }
 0xfcd   : > { %7461 = vmatprep.mubr.msk.f32.mxu0 %vm8190_vm0, %v10606_v22 }
 0xfcf   : > { %v4412_v12 = vpop.f32.mrb[26].mxu0 }
 0xfd0   : > { %7462 = vmatmul.mubr.msk.f32.gmra.mrb[68].mxu0 %vm875_vm3, %v4412_v12  ;;  %v7327_v0 = vpop.f32.mrb[27].mxu0 }
 0xfd1   : > { %7464 = vmatprep.mubr.msk.f32.mxu0 %vm8190_vm0, %v10606_v22 }
 0xfd3   : > { %v4417_v16 = vpop.f32.mrb[28].mxu0 }
 0xfd4   : > { %7465 = vmatmul.mubr.msk.f32.gmra.mrb[70].mxu0 %vm875_vm3, %v4417_v16  ;;  %v7330_v11 = vpop.f32.mrb[29].mxu0 }
 0xfd5   : > { %7467 = vmatprep.mubr.msk.f32.mxu0 %vm8190_vm0, %v10606_v22  ;;  %v5676_v11 = vld [vmem:[%s10580_s5 + $0x4] ss:$0 sm:$0xff] }
 0xfd7   : > { %v4422_v63 = vpop.f32.mrb[30].mxu0 }
 0xfd8   : > { %7468 = vmatmul.mubr.msk.f32.gmra.mrb[72].mxu0 %vm875_vm3, %v4422_v63  ;;  %v7333_v24 = vpop.f32.mrb[31].mxu0 }
 0xfd9   : > { %7470 = vmatprep.mubr.msk.f32.mxu0 %vm8190_vm0, %v10606_v22 }
 0xfdb   : > { %v4427_v33 = vpop.f32.mrb[32].mxu0 }
 0xfdc   : > { %7471 = vmatmul.mubr.msk.f32.gmra.mrb[74].mxu0 %vm875_vm3, %v4427_v33  ;;  %v7336_v15 = vpop.f32.mrb[33].mxu0 }
 0xfdd   : > { %7473 = vmatprep.mubr.msk.f32.mxu0 %vm8190_vm0, %v10606_v22 }
 0xfdf   : > { %v4432_v18 = vpop.f32.mrb[34].mxu0 }
 0xfe0   : > { %7474 = vmatmul.mubr.msk.f32.gmra.mrb[76].mxu0 %vm875_vm3, %v4432_v18  ;;  %v7339_v57 = vpop.f32.mrb[35].mxu0 }
 0xfe1   : > { %7476 = vmatprep.mubr.msk.f32.mxu0 %vm8190_vm0, %v10606_v22 }
 0xfe3   : > { %v4437_v43 = vpop.f32.mrb[36].mxu0 }
 0xfe4   : > { %7477 = vmatmul.mubr.msk.f32.gmra.mrb[78].mxu0 %vm875_vm3, %v4437_v43  ;;  %v7342_v47 = vpop.f32.mrb[37].mxu0 }
 0xfe5   : > { %7479 = vmatprep.mubr.msk.f32.mxu0 %vm8190_vm0, %v10606_v22 }
 0xfe7   : > { %v4442_v49 = vpop.f32.mrb[38].mxu0 }
 0xfe8   : > { %7480 = vmatmul.mubr.msk.f32.gmra.mrb[80].mxu0 %vm875_vm3, %v4442_v49  ;;  %v7345_v51 = vpop.f32.mrb[39].mxu0 }
 0xfe9   : > { %7482 = vmatprep.mubr.msk.f32.mxu0 %vm8190_vm0, %v10606_v22 }
 0xfeb   : > { %v4447_v37 = vpop.f32.mrb[40].mxu0 }
 0xfec   : > { %7483 = vmatmul.mubr.msk.f32.gmra.mrb[82].mxu0 %vm875_vm3, %v4447_v37  ;;  %v7348_v20 = vpop.f32.mrb[41].mxu0  ;;  %v5677_v37 = vld [vmem:[%s10581_s6 + $0x80] sm:$0xff] }
 0xfed   : > { %v5678_v20 = vld [vmem:[%s10581_s6 + $0x88] sm:$0xff] }
 0xfee   : > { %v7673_v29 = vpack.c.bf16 %v5678_v20, %v5677_v37 }
0x106f   : > { %v4757_v53 = vpop.f32.mrb[42].mxu0 }
0x1070   : > { %v7424_v26 = vpop.f32.mrb[43].mxu0 }
0x1073   : > { %v4762_v58 = vpop.f32.mrb[44].mxu0 }
0x1074   : > { %v7427_v21 = vpop.f32.mrb[45].mxu0 }
0x1077   : > { %v4767_v3 = vpop.f32.mrb[46].mxu0 }
0x1078   : > { %v7430_v34 = vpop.f32.mrb[47].mxu0 }
0x107b   : > { %v4772_v60 = vpop.f32.mrb[48].mxu0 }
0x107c   : > { %v7433_v2 = vpop.f32.mrb[49].mxu0 }
0x107f   : > { %v4777_v10 = vpop.f32.mrb[50].mxu0 }
0x1080   : > { %v7436_v45 = vpop.f32.mrb[51].mxu0 }
0x1083   : > { %v10479_v23 = vpop.f32.mrb[52].mxu0 }
0x1084   : > { %v7439_v35 = vpop.f32.mrb[53].mxu0 }
0x1087   : > { %v10481_v42 = vpop.f32.mrb[54].mxu0 }
0x1088   : > { %v7442_v5 = vpop.f32.mrb[55].mxu0 }
0x108b   : > { %v4792_v28 = vpop.f32.mrb[56].mxu0 }
0x108c   : > { %v4861_v38 = vmax.f32 %v4757_v53, %v4792_v28  ;;  %v7445_v59 = vpop.f32.mrb[57].mxu0  ;;  %v5680_v53 = vld [vmem:[%s10581_s6 + $0x98] sm:$0xff] }
0x108f   : > { %v4797_v44 = vpop.f32.mrb[58].mxu0 }
0x1090   : > { %v4862_v55 = vmax.f32 %v4762_v58, %v4797_v44  ;;  %v7448_v36 = vpop.f32.mrb[59].mxu0 }
0x1093   : > { %v4802_v14 = vpop.f32.mrb[60].mxu0 }
0x1094   : > { %v4863_v19 = vmax.f32 %v4767_v3, %v4802_v14  ;;  %v7451_v56 = vpop.f32.mrb[61].mxu0 }
0x1097   : > { %v4807_v52 = vpop.f32.mrb[62].mxu0 }
0x1098   : > { %v4864_v6 = vmax.f32 %v4772_v60, %v4807_v52  ;;  %v7454_v13 = vpop.f32.mrb[63].mxu0  ;;  %v7676_v60 = vpack.c.bf16 %v5680_v53, %v5679_v41 }
0x109b   : > { %v4812_v48 = vpop.f32.mrb[64].mxu0 }
0x109c   : > { %v4865_v50 = vmax.f32 %v4777_v10, %v4812_v48  ;;  %v7457_v62 = vpop.f32.mrb[65].mxu0 }
0x109f   : > { %v4817_v9 = vpop.f32.mrb[66].mxu0 }
0x10a0   : > { %v4866_v8 = vmax.f32 %v10479_v23, %v4817_v9  ;;  %v7460_v61 = vpop.f32.mrb[67].mxu0 }
0x10a3   : > { %v4822_v4 = vpop.f32.mrb[68].mxu0 }
0x10a4   : > { %v4867_v12 = vmax.f32 %v10481_v42, %v4822_v4  ;;  %v7463_v0 = vpop.f32.mrb[69].mxu0 }
0x10a7   : > { %v4827_v16 = vpop.f32.mrb[70].mxu0 }
0x10a8   : > { %v4868_v63 = vmax.f32 %v4861_v38, %v4827_v16  ;;  %v7466_v24 = vpop.f32.mrb[71].mxu0 }
0x10aa   : > { %v4883_v33 = vadd.f32 %v5676_v11, %v4868_v63 }
0x10ab   : > { %v4832_v15 = vpop.f32.mrb[72].mxu0 }
0x10ac   : > { %8077 = vtanh.f32 %v4883_v33  ;;  %v4869_v18 = vmax.f32 %v4862_v55, %v4832_v15  ;;  %v7469_v57 = vpop.f32.mrb[73].mxu0 }
0x10ae   : > { %v4884_v43 = vadd.f32 %v5676_v11, %v4869_v18 }
0x10af   : > { %v4837_v47 = vpop.f32.mrb[74].mxu0 }
0x10b0   : > { %8079 = vtanh.f32 %v4884_v43  ;;  %v4870_v49 = vmax.f32 %v4863_v19, %v4837_v47  ;;  %v7472_v51 = vpop.f32.mrb[75].mxu0 }
0x10b2   : > { %v4885_v31 = vadd.f32 %v5676_v11, %v4870_v49 }
0x10b3   : > { %v4842_v7 = vpop.f32.mrb[76].mxu0 }
0x10b4   : > { %8081 = vtanh.f32 %v4885_v31  ;;  %v4871_v46 = vmax.f32 %v4864_v6, %v4842_v7  ;;  %v7475_v1 = vpop.f32.mrb[77].mxu0 }
0x10b6   : > { %v8078_v26 = vpop.eup %8077  ;;  %v4886_v58 = vadd.f32 %v5676_v11, %v4871_v46 }
0x10b7   : > { %v4847_v21 = vpop.f32.mrb[78].mxu0  ;;  %7494 = vmatmul.mubr.msk.f32.vlgmr.msra.gmra.mrb[192].mxu1 %vm875_vm3, %v8078_v26 }
0x10b8   : > { %8083 = vtanh.f32 %v4886_v58  ;;  %v4872_v3 = vmax.f32 %v4865_v50, %v4847_v21  ;;  %v7478_v34 = vpop.f32.mrb[79].mxu0  ;;  %7496 = vmatprep.mubr.msk.f32.mxu1 %vm8190_vm0, %v10606_v22  ;;  %7674 = vmatpush3.bf16.msra.mxu1 %v7673_v29 }
0x10b9   : > { %7675 = vmatprep.subr.bf16.mxu1 %v10607_v54 }
0x10ba   : > { %v8080_v2 = vpop.eup %8079  ;;  %v4887_v10 = vadd.f32 %v5676_v11, %v4872_v3 }
0x10bb   : > { %v4852_v45 = vpop.f32.mrb[80].mxu0  ;;  %7497 = vmatmul.mubr.msk.f32.gmra.mrb[194].mxu1 %vm875_vm3, %v8080_v2 }
0x10bc   : > { %8085 = vtanh.f32 %v4887_v10  ;;  %v4873_v23 = vmax.f32 %v4866_v8, %v4852_v45  ;;  %v7481_v35 = vpop.f32.mrb[81].mxu0  ;;  %7499 = vmatprep.mubr.msk.f32.mxu1 %vm8190_vm0, %v10606_v22  ;;  %7677 = vmatpush3.bf16.msra.mxu1 %v7676_v60 }
0x10be   : > { %v8082_v42 = vpop.eup %8081  ;;  %v4888_v5 = vadd.f32 %v5676_v11, %v4873_v23 }
0x10bf   : > { %v4857_v28 = vpop.f32.mrb[82].mxu0  ;;  %7500 = vmatmul.mubr.msk.f32.gmra.mrb[196].mxu1 %vm875_vm3, %v8082_v42 }
0x10c0   : > { %8087 = vtanh.f32 %v4888_v5  ;;  %v4874_v38 = vmax.f32 %v4867_v12, %v4857_v28  ;;  %v7484_v54 = vpop.f32.mrb[83].mxu0  ;;  %7502 = vmatprep.mubr.msk.f32.mxu1 %vm8190_vm0, %v10606_v22 }
0x10c2   : > { %v8084_v59 = vpop.eup %8083  ;;  %v4889_v44 = vadd.f32 %v5676_v11, %v4874_v38 }
0x10c3   : > { %7503 = vmatmul.mubr.msk.f32.gmra.mrb[198].mxu1 %vm875_vm3, %v8084_v59 }
0x10c4   : > { %8089 = vtanh.f32 %v4889_v44  ;;  %7505 = vmatprep.mubr.msk.f32.mxu1 %vm8190_vm0, %v10606_v22 }
0x10c6   : > { %v8086_v55 = vpop.eup %8085 }
0x10c7   : > { %7506 = vmatmul.mubr.msk.f32.gmra.mrb[200].mxu1 %vm875_vm3, %v8086_v55 }
0x10c8   : > { %7508 = vmatprep.mubr.msk.f32.mxu1 %vm8190_vm0, %v10606_v22 }
0x10ca   : > { %v8088_v36 = vpop.eup %8087 }
0x10cb   : > { %7509 = vmatmul.mubr.msk.f32.gmra.mrb[202].mxu1 %vm875_vm3, %v8088_v36 }
0x10cc   : > { %7511 = vmatprep.mubr.msk.f32.mxu1 %vm8190_vm0, %v10606_v22 }
0x10ce   : > { %v8090_v14 = vpop.eup %8089 }
0x10cf   : > { %7512 = vmatmul.mubr.msk.f32.gmra.mrb[204].mxu1 %vm875_vm3, %v8090_v14 }
0x10d0   : > { %7522 = vmatprep.mubr.msk.f32.mxu1 %vm8190_vm0, %v10606_v22 }
0x10d3   : > { %7523 = vmatmul.mubr.msk.f32.vlgmr.msra.gmra.mrb[206].mxu1 %vm875_vm3, %v10152_v27 }
0x10d4   : > { %7525 = vmatprep.mubr.msk.f32.mxu1 %vm8190_vm0, %v10606_v22 }
0x10d7   : > { %7526 = vmatmul.mubr.msk.f32.gmra.mrb[208].mxu1 %vm875_vm3, %v10154_v39 }
0x10d8   : > { %7528 = vmatprep.mubr.msk.f32.mxu1 %vm8190_vm0, %v10606_v22 }
0x10db   : > { %7529 = vmatmul.mubr.msk.f32.gmra.mrb[210].mxu1 %vm875_vm3, %v10159_v32 }
0x10dc   : > { %7531 = vmatprep.mubr.msk.f32.mxu1 %vm8190_vm0, %v10606_v22 }
0x10df   : > { %7532 = vmatmul.mubr.msk.f32.gmra.mrb[212].mxu1 %vm875_vm3, %v10161_v17 }
0x10e0   : > { %7534 = vmatprep.mubr.msk.f32.mxu1 %vm8190_vm0, %v10606_v22 }
0x10e3   : > { %7535 = vmatmul.mubr.msk.f32.gmra.mrb[214].mxu1 %vm875_vm3, %v10166_v25 }
0x10e4   : > { %7537 = vmatprep.mubr.msk.f32.mxu1 %vm8190_vm0, %v10606_v22 }
0x10e7   : > { %7538 = vmatmul.mubr.msk.f32.gmra.mrb[216].mxu1 %vm875_vm3, %v10168_v40 }
0x10e8   : > { %7540 = vmatprep.mubr.msk.f32.mxu1 %vm8190_vm0, %v10606_v22  ;;  %v5700_v22 = vld [vmem:[%s10583_s8 + $0x4] ss:$0 sm:$0xff] }
0x10eb   : > { %7541 = vmatmul.mubr.msk.f32.gmra.mrb[218].mxu1 %vm875_vm3, %v10173_v30 }
0x118a   : > { %v4994_v27 = vpop.f32.mrb[192].mxu1 }
0x118b   : > { %v7495_v39 = vpop.f32.mrb[193].mxu1 }
0x118e   : > { %v4999_v32 = vpop.f32.mrb[194].mxu1 }
0x118f   : > { %v7498_v17 = vpop.f32.mrb[195].mxu1 }
0x1192   : > { %v5004_v19 = vpop.f32.mrb[196].mxu1 }
0x1193   : > { %v7501_v56 = vpop.f32.mrb[197].mxu1 }
0x1196   : > { %v5009_v25 = vpop.f32.mrb[198].mxu1 }
0x1197   : > { %v7504_v52 = vpop.f32.mrb[199].mxu1 }
0x119a   : > { %v5014_v6 = vpop.f32.mrb[200].mxu1 }
0x119b   : > { %v7507_v13 = vpop.f32.mrb[201].mxu1 }
0x119e   : > { %v5019_v48 = vpop.f32.mrb[202].mxu1 }
0x119f   : > { %v7510_v50 = vpop.f32.mrb[203].mxu1 }
0x11a2   : > { %v5024_v40 = vpop.f32.mrb[204].mxu1 }
0x11a3   : > { %v7513_v62 = vpop.f32.mrb[205].mxu1 }
0x11a6   : > { %v5115_v9 = vpop.f32.mrb[206].mxu1 }
0x11a7   : > { %v5116_v30 = vadd.f32 %v5115_v9, %v4994_v27  ;;  %v7524_v8 = vpop.f32.mrb[207].mxu1 }
0x11a9   : > { %v5157_v61 = vadd.f32 %v5700_v22, %v5116_v30 }
0x11aa   : > { %v5120_v4 = vpop.f32.mrb[208].mxu1 }
0x11ab   : > { %5164 = vst.msk [vmem:[%s10556_s23] sm:$0xff] %vm875_vm3, %v5157_v61  ;;  %v5121_v12 = vadd.f32 %v5120_v4, %v4999_v32  ;;  %v7527_v0 = vpop.f32.mrb[209].mxu1 }
0x11ad   : > { %v5158_v16 = vadd.f32 %v5700_v22, %v5121_v12 }
0x11ae   : > { %v5125_v11 = vpop.f32.mrb[210].mxu1 }
0x11af   : > { %5165 = vst.msk [vmem:[%s10556_s23 + $0x8] sm:$0xff] %vm875_vm3, %v5158_v16  ;;  %v5126_v63 = vadd.f32 %v5125_v11, %v5004_v19  ;;  %v7530_v24 = vpop.f32.mrb[211].mxu1 }
0x11b1   : > { %v5159_v33 = vadd.f32 %v5700_v22, %v5126_v63 }
0x11b2   : > { %v5130_v15 = vpop.f32.mrb[212].mxu1 }
0x11b3   : > { %5166 = vst.msk [vmem:[%s10556_s23 + $0x10] sm:$0xff] %vm875_vm3, %v5159_v33  ;;  %v5131_v18 = vadd.f32 %v5130_v15, %v5009_v25  ;;  %v7533_v57 = vpop.f32.mrb[213].mxu1 }
0x11b5   : > { %v5160_v43 = vadd.f32 %v5700_v22, %v5131_v18 }
0x11b6   : > { %v5135_v47 = vpop.f32.mrb[214].mxu1 }
0x11b7   : > { %5167 = vst.msk [vmem:[%s10556_s23 + $0x18] sm:$0xff] %vm875_vm3, %v5160_v43  ;;  %v5136_v49 = vadd.f32 %v5135_v47, %v5014_v6  ;;  %v7536_v51 = vpop.f32.mrb[215].mxu1 }
0x11b9   : > { %v5161_v37 = vadd.f32 %v5700_v22, %v5136_v49 }
0x11ba   : > { %v5140_v20 = vpop.f32.mrb[216].mxu1 }
0x11bb   : > { %5168 = vst.msk [vmem:[%s10556_s23 + $0x20] sm:$0xff] %vm875_vm3, %v5161_v37  ;;  %v5141_v31 = vadd.f32 %v5140_v20, %v5019_v48  ;;  %v7539_v7 = vpop.f32.mrb[217].mxu1 }
0x11bd   : > { %v5162_v46 = vadd.f32 %v5700_v22, %v5141_v31 }
0x11be   : > { %v5145_v1 = vpop.f32.mrb[218].mxu1 }
0x11bf   : > { %5169 = vst.msk [vmem:[%s10556_s23 + $0x28] sm:$0xff] %vm875_vm3, %v5162_v46  ;;  %v5146_v29 = vadd.f32 %v5145_v1, %v5024_v40  ;;  %v7542_v41 = vpop.f32.mrb[219].mxu1 }
0x11c1   : > { %v5163_v53 = vadd.f32 %v5700_v22, %v5146_v29 }
0x11c3   : > { %5170 = vst.msk [vmem:[%s10556_s23 + $0x30] sm:$0xff] %vm875_vm3, %v5163_v53 }
0x11c4 PF: > { %s19_s30 = sadd.s32 1, %s8187_s30  }
0x11c5   : > { %p16_p4 = scmp.ge.s32.totalorder %s19_s30, 4  }
0x11c7   :  { %18 = sbr.rel (!%p16_p4) target bundleno = 1 (0x1), region = 113 }

</bundles_post_ra>
